<compile_context>
chip_gen: v7x
topology: tpu7x:2x2x1
jax: 0.10.0
libtpu: 0.0.40
codegen_flags: <defaults>
</compile_context>

<pallas_src>
import math

import numpy as np
import jax
import jax.numpy as jnp
from jax.experimental import pallas as pl
from jax.experimental.pallas import tpu as pltpu


# ----------------------------------------------------------------------------- #
# Config
# ----------------------------------------------------------------------------- #
CHANS = (4, 8)
NBLOCK = 1
CNN_OUTSIZE = 32
OUTPUT_SIZE = 32
IMG_SHAPE = (2, 2, 16, 16, 3)   # (B, T, H, W, C)
CPAD = 8                        # every activation keeps 8 channel sublanes (zero padded)


def _grid_plan(n_images):
    """Return (grid_steps, images_per_step).

    Two steps keep both v7x TensorCores busy via dimension_semantics=('parallel',);
    on single-core v5e/v6e the second step only adds one ~0.35 us step overhead.
    """
    if n_images % 2 == 0 and n_images > 1:
        return 2, n_images // 2
    return 1, n_images


# ----------------------------------------------------------------------------- #
# In-kernel helpers (trace-time; operate on VMEM-resident values)
# ----------------------------------------------------------------------------- #
def _tap_masks(H, W, G):
    """Per-lane validity masks for all 9 taps of a 3x3 / pad-1 stencil on a
    lane-batched (CPAD, G*H*W) activation (lane = g*H*W + h*W + w).

    mask[(dh, dw)][0, l] == 1.0 iff (h+dh, w+dw) stays inside image g.  This also
    zeroes every lane a plain 1-D lane shift would contaminate with data from a
    neighbouring image or with wrap-around, so the same masks serve conv and pool.
    Computed once per resolution (memoized by the kernel builder).
    """
    # TODO(synk): generalize to non-power-of-two spatial dims (needs int div/mod).
    assert W & (W - 1) == 0 and H & (H - 1) == 0, "spatial dims must be powers of two"
    P = G * H * W
    lane = jax.lax.broadcasted_iota(jnp.int32, (1, P), 1)
    ww = lane & (W - 1)
    hh = (lane >> int(round(math.log2(W)))) & (H - 1)
    masks = {}
    for dh in (-1, 0, 1):
        for dw in (-1, 0, 1):
            valid = ((hh + dh >= 0) & (hh + dh < H) &
                     (ww + dw >= 0) & (ww + dw < W))
            masks[(dh, dw)] = valid.astype(jnp.float32)
    return masks


def _shifted_tap(x, xp, off, pad, mask):
    """out[:, l] = x[:, l + off] where valid, else 0 (static slice of the margin buf)."""
    if off == 0:
        return x
    P = x.shape[1]
    return xp[:, pad + off: pad + off + P] * mask


def _conv3x3_relu(x, w_ref, b_ref, masks, W):
    """3x3 / stride 1 / pad 1 conv + bias + ReLU on a lane-batched (CPAD, P) activation.

    All 9 shifted taps are stacked along sublanes (each tap is a full 8-sublane tile, so
    the stack is tile aligned) and contracted with the pre-packed (CPAD, 72) weight in a
    single MXU matmul.  Padded channel rows stay exactly zero (zero weight rows / zero
    bias / ReLU(0) == 0), so they can flow through the whole network untouched.
    """
    C, P = x.shape
    pad = W + 1
    zeros = jnp.zeros((C, pad), x.dtype)
    xp = jnp.concatenate([zeros, x, zeros], axis=1)      # one margin buffer per conv
    taps = [_shifted_tap(x, xp, dh * W + dw, pad, masks[(dh, dw)])
            for dh in (-1, 0, 1) for dw in (-1, 0, 1)]
    xs = jnp.concatenate(taps, axis=0)                   # (9*CPAD, P), tile aligned
    y = jnp.dot(w_ref[...], xs, preferred_element_type=jnp.float32) + b_ref[...]
    return jnp.maximum(y, 0.0)


def _maxpool_3x3_s2_p1(x, sel_ref, masks, W):
    """F.max_pool2d(kernel=3, stride=2, padding=1) on a lane-batched (CPAD, P) activation.

    Stride-1 3x3 max via 8 shifted VPU maxes — the zero fill of masked lanes stands in
    for -inf ONLY because x >= 0 post-ReLU (do not reuse on signed data) — followed by a
    block-diagonal 0/1 selection matmul implementing the stride-2 subsample.
    """
    C, P = x.shape
    pad = W + 1
    zeros = jnp.zeros((C, pad), x.dtype)
    xp = jnp.concatenate([zeros, x, zeros], axis=1)
    m = x
    for dh in (-1, 0, 1):
        for dw in (-1, 0, 1):
            if dh == 0 and dw == 0:
                continue
            m = jnp.maximum(m, _shifted_tap(x, xp, dh * W + dw, pad, masks[(dh, dw)]))
    return jnp.dot(m, sel_ref[...], preferred_element_type=jnp.float32)


# ----------------------------------------------------------------------------- #
# Fused kernel: whole ImgObsProcess forward for G lane-batched images per grid step
# ----------------------------------------------------------------------------- #
def _build_fused_kernel(spatial_dims, nblock, G):
    def kernel(x_ref, *refs):
        o_ref = refs[-1]
        refs = refs[:-1]
        x = x_ref[0]                                     # (CPAD, G*H0*W0)

        mask_cache = {}

        def masks_for(H, W):                             # hoisted: one mask set / resolution
            if (H, W) not in mask_cache:
                mask_cache[(H, W)] = _tap_masks(H, W, G)
            return mask_cache[(H, W)]

        idx = 0
        for (H, W) in spatial_dims:                      # CnnDownStack
            fcw, fcb, sel = refs[idx], refs[idx + 1], refs[idx + 2]
            idx += 3
            mk = masks_for(H, W)
            x = _conv3x3_relu(x, fcw, fcb, mk, W)        # firstconv + ReLU
            x = _maxpool_3x3_s2_p1(x, sel, mk, W)        # max_pool2d(3, 2, 1)
            Ho, Wo = (H + 1) // 2, (W + 1) // 2
            mko = masks_for(Ho, Wo)
            for _ in range(nblock):                      # CnnBasicBlock (residual)
                c0w, c0b, c1w, c1b = refs[idx:idx + 4]
                idx += 4
                h1 = _conv3x3_relu(x, c0w, c0b, mko, Wo)
                x = x + _conv3x3_relu(h1, c1w, c1b, mko, Wo)

        dw_ref, db_ref, lw_ref, lb_ref = refs[idx:idx + 4]
        # Flatten ONCE per step: lane-concat the CPAD channel rows -> (1, CPAD*G*Sf) with
        # index order (c, g, s).  The (c, s) -> feature permutation and the per-image
        # block structure are folded into the pre-packed dense/linear weights, so the
        # whole epilogue is two whole-batch matmuls and one lane-dense (1, G*32) store.
        xf = jnp.concatenate([x[c:c + 1, :] for c in range(CPAD)], axis=1)
        xf = jnp.maximum(xf, 0.0)                        # th.relu before dense (x>=0: no-op)
        h = jnp.maximum(
            jnp.dot(xf, dw_ref[...], preferred_element_type=jnp.float32)
            + db_ref[...], 0.0)                          # ImpalaCNN dense + ReLU
        out = jnp.maximum(
            jnp.dot(h, lw_ref[...], preferred_element_type=jnp.float32)
            + lb_ref[...], 0.0)                          # ImgObsProcess.linear + ReLU
        o_ref[0] = out.astype(o_ref.dtype)
    return kernel


# ----------------------------------------------------------------------------- #
# Forward pass (ImgObsProcess.forward) — single pallas_call
# ----------------------------------------------------------------------------- #
def img_obs_process(packed, img):
    B, T, H, W, C = img.shape
    N = B * T
    n_steps, G = _grid_plan(N)

    # Layout plumbing (XLA side, once): NHWC -> (steps, CPAD, G*H*W); channels on
    # sublanes (zero padded to 8), G images side by side on the lane axis.
    x = img.reshape(N, H, W, C).astype(jnp.float32)
    x = jnp.transpose(x, (0, 3, 1, 2)).reshape(N, C, H * W)
    x = jnp.pad(x, ((0, 0), (0, CPAD - C), (0, 0)))
    x = x.reshape(n_steps, G, CPAD, H * W).transpose(0, 2, 1, 3)
    x = x.reshape(n_steps, CPAD, G * H * W)

    spatial_dims = []
    h, w = H, W
    for _ in CHANS:
        spatial_dims.append((h, w))
        h, w = (h + 1) // 2, (w + 1) // 2

    kernel = _build_fused_kernel(spatial_dims, NBLOCK, G)

    in_specs = [pl.BlockSpec((1, CPAD, G * H * W), lambda i: (i, 0, 0))]
    for arr in packed:   # weights / selection matrices: full blocks, constant index maps
        in_specs.append(pl.BlockSpec(arr.shape, lambda i, nd=arr.ndim: (0,) * nd))

    out = pl.pallas_call(
        kernel,
        grid=(n_steps,),
        in_specs=in_specs,
        out_specs=pl.BlockSpec((1, 1, G * OUTPUT_SIZE), lambda i: (i, 0, 0)),
        out_shape=jax.ShapeDtypeStruct((n_steps, 1, G * OUTPUT_SIZE), jnp.float32),
        compiler_params=pltpu.CompilerParams(
            dimension_semantics=("parallel",)),  # v7x: two TensorCores split the steps
    )(x, *packed)
    return out.reshape(B, T, OUTPUT_SIZE)


# ----------------------------------------------------------------------------- #
# Parameters (deterministic, FanInInitReLULayer-style init)
# ----------------------------------------------------------------------------- #
def _fanin_init(key, shape, scale):
    w = jax.random.normal(key, shape, dtype=jnp.float32)
    norm = jnp.sqrt(jnp.sum(w * w, axis=tuple(range(1, len(shape))), keepdims=True))
    return w * (scale / norm)


def init_params(key):
    B, T, H, W, C = IMG_SHAPE
    stack_scale = math.sqrt(len(CHANS))                       # ImpalaCNN: sqrt(len(chans))
    block_scale = math.sqrt(stack_scale / math.sqrt(NBLOCK))  # CnnBasicBlock scaling
    keys = iter(jax.random.split(key, 64))
    params = {"stacks": []}
    in_c, h, w = C, H, W
    for outc in CHANS:
        st = {
            "fc_w": _fanin_init(next(keys), (outc, in_c, 3, 3), 1.0),
            "fc_b": jnp.zeros((outc,), jnp.float32),
            "blocks": [],
        }
        for _ in range(NBLOCK):
            st["blocks"].append({
                "c0_w": _fanin_init(next(keys), (outc, outc, 3, 3), block_scale),
                "c0_b": jnp.zeros((outc,), jnp.float32),
                "c1_w": _fanin_init(next(keys), (outc, outc, 3, 3), block_scale),
                "c1_b": jnp.zeros((outc,), jnp.float32),
            })
        params["stacks"].append(st)
        in_c, h, w = outc, (h + 1) // 2, (w + 1) // 2
    flat = in_c * h * w
    params["dense_w"] = _fanin_init(next(keys), (CNN_OUTSIZE, flat), 1.4)
    params["dense_b"] = jnp.zeros((CNN_OUTSIZE,), jnp.float32)
    params["linear_w"] = _fanin_init(next(keys), (OUTPUT_SIZE, CNN_OUTSIZE), 1.0)
    params["linear_b"] = jnp.zeros((OUTPUT_SIZE,), jnp.float32)
    return params


# ----------------------------------------------------------------------------- #
# One-time packing of PyTorch-layout params into the kernel's consumption layout
# ----------------------------------------------------------------------------- #
def _pack_conv(w, b):
    """(Cout, Cin, 3, 3) conv weight -> tap-fused (CPAD, 9*CPAD) + padded (CPAD, 1) bias."""
    w = np.asarray(w)
    b = np.asarray(b)
    co, ci = w.shape[0], w.shape[1]
    wp = np.zeros((CPAD, 9 * CPAD), np.float32)
    for kh in range(3):
        for kw in range(3):
            k = kh * 3 + kw
            wp[:co, k * CPAD:k * CPAD + ci] = w[:, :, kh, kw]
    bp = np.zeros((CPAD, 1), np.float32)
    bp[:co, 0] = b
    return jnp.asarray(wp), jnp.asarray(bp)


def _make_pool_select(H, W, G):
    """Block-diagonal 0/1 matrix: stride-2 subsample of a stride-1 3x3 max, G images."""
    Ho, Wo = (H + 1) // 2, (W + 1) // 2
    sel = np.zeros((G * H * W, G * Ho * Wo), np.float32)
    for g in range(G):
        for ho in range(Ho):
            for wo in range(Wo):
                sel[g * H * W + (2 * ho) * W + (2 * wo),
                    g * Ho * Wo + ho * Wo + wo] = 1.0
    return jnp.asarray(sel)


def _pack_head(dense_w, dense_b, linear_w, linear_b, cf, sf, G):
    """Fold the (c, g, s) flatten order, the per-image block structure and both
    transposes into the dense / linear weights so the epilogue is two plain matmuls."""
    dw = np.asarray(dense_w)                                  # (CNN_OUTSIZE, cf*sf)
    dbig = np.zeros((CPAD * G * sf, G * CNN_OUTSIZE), np.float32)
    for c in range(cf):
        for g in range(G):
            for s in range(sf):
                dbig[(c * G + g) * sf + s,
                     g * CNN_OUTSIZE:(g + 1) * CNN_OUTSIZE] = dw[:, c * sf + s]
    dbias = np.tile(np.asarray(dense_b), G).reshape(1, G * CNN_OUTSIZE)
    lw = np.asarray(linear_w)                                 # (OUTPUT_SIZE, CNN_OUTSIZE)
    lbig = np.zeros((G * CNN_OUTSIZE, G * OUTPUT_SIZE), np.float32)
    for g in range(G):
        lbig[g * CNN_OUTSIZE:(g + 1) * CNN_OUTSIZE,
             g * OUTPUT_SIZE:(g + 1) * OUTPUT_SIZE] = lw.T
    lbias = np.tile(np.asarray(linear_b), G).reshape(1, G * OUTPUT_SIZE)
    return (jnp.asarray(dbig), jnp.asarray(dbias),
            jnp.asarray(lbig), jnp.asarray(lbias))


def pack_params(params, img_shape=IMG_SHAPE):
    B, T, H, W, C = img_shape
    _, G = _grid_plan(B * T)
    flat = []
    h, w = H, W
    for st in params["stacks"]:
        wp, bp = _pack_conv(st["fc_w"], st["fc_b"])
        flat += [wp, bp, _make_pool_select(h, w, G)]
        h, w = (h + 1) // 2, (w + 1) // 2
        for blk in st["blocks"]:
            for wname, bname in (("c0_w", "c0_b"), ("c1_w", "c1_b")):
                wpk, bpk = _pack_conv(blk[wname], blk[bname])
                flat += [wpk, bpk]
    flat += list(_pack_head(params["dense_w"], params["dense_b"],
                            params["linear_w"], params["linear_b"],
                            CHANS[-1], h * w, G))
    return flat


# ----------------------------------------------------------------------------- #
# Pure-JAX reference (for correctness check)
# ----------------------------------------------------------------------------- #
def _ref_conv_relu(x, w, b):
    y = jax.lax.conv_general_dilated(
        x, jnp.transpose(w, (2, 3, 1, 0)), window_strides=(1, 1), padding="SAME",
        dimension_numbers=("NHWC", "HWIO", "NHWC"),
        precision=jax.lax.Precision.HIGHEST)
    return jnp.maximum(y + b, 0.0)


def _ref_maxpool(x):
    return jax.lax.reduce_window(
        x, jnp.float32(-jnp.inf), jax.lax.max,
        (1, 3, 3, 1), (1, 2, 2, 1), ((0, 0), (1, 1), (1, 1), (0, 0)))


def reference_forward(params, img):
    B, T, H, W, C = img.shape
    x = img.reshape(B * T, H, W, C).astype(jnp.float32)
    for st in params["stacks"]:
        x = _ref_conv_relu(x, st["fc_w"], st["fc_b"])
        x = _ref_maxpool(x)
        for blk in st["blocks"]:
            h1 = _ref_conv_relu(x, blk["c0_w"], blk["c0_b"])
            x = x + _ref_conv_relu(h1, blk["c1_w"], blk["c1_b"])
    N = x.shape[0]
    x = jnp.transpose(x, (0, 3, 1, 2)).reshape(N, -1)
    x = jnp.maximum(x, 0.0)
    x = jnp.maximum(jnp.dot(x, params["dense_w"].T,
                            precision=jax.lax.Precision.HIGHEST) + params["dense_b"], 0.0)
    x = jnp.maximum(jnp.dot(x, params["linear_w"].T,
                            precision=jax.lax.Precision.HIGHEST) + params["linear_b"], 0.0)
    return x.reshape(B, T, OUTPUT_SIZE)


# ----------------------------------------------------------------------------- #
if __name__ == "__main__":
    key = jax.random.PRNGKey(0)
    pkey, xkey = jax.random.split(key)
    params = init_params(pkey)
    img = jax.random.uniform(xkey, IMG_SHAPE, dtype=jnp.float32)

    packed = pack_params(params)                 # one-time, outside the jitted forward

    out = jax.jit(img_obs_process)(packed, img)
    out = jax.block_until_ready(out)

    ref = reference_forward(params, img)
    assert out.shape == (IMG_SHAPE[0], IMG_SHAPE[1], OUTPUT_SIZE), out.shape
    if not jnp.allclose(out, ref, atol=1e-2, rtol=1e-2):
        raise AssertionError(
            f"Pallas output mismatch vs reference; max abs err = "
            f"{float(jnp.max(jnp.abs(out - ref)))}")
    print("KERNEL_OK")
</pallas_src>

<mosaic_0001>
module attributes {stable_mosaic.version = 11 : i64} {
  func.func @kernel(%arg0: i32, %arg1: memref<1x8x512xf32, #tpu.memory_space<vmem>>, %arg2: memref<8x72xf32, #tpu.memory_space<vmem>>, %arg3: memref<8x1xf32, #tpu.memory_space<vmem>>, %arg4: memref<512x128xf32, #tpu.memory_space<vmem>>, %arg5: memref<8x72xf32, #tpu.memory_space<vmem>>, %arg6: memref<8x1xf32, #tpu.memory_space<vmem>>, %arg7: memref<8x72xf32, #tpu.memory_space<vmem>>, %arg8: memref<8x1xf32, #tpu.memory_space<vmem>>, %arg9: memref<8x72xf32, #tpu.memory_space<vmem>>, %arg10: memref<8x1xf32, #tpu.memory_space<vmem>>, %arg11: memref<128x32xf32, #tpu.memory_space<vmem>>, %arg12: memref<8x72xf32, #tpu.memory_space<vmem>>, %arg13: memref<8x1xf32, #tpu.memory_space<vmem>>, %arg14: memref<8x72xf32, #tpu.memory_space<vmem>>, %arg15: memref<8x1xf32, #tpu.memory_space<vmem>>, %arg16: memref<256x64xf32, #tpu.memory_space<vmem>>, %arg17: memref<1x64xf32, #tpu.memory_space<vmem>>, %arg18: memref<64x64xf32, #tpu.memory_space<vmem>>, %arg19: memref<1x64xf32, #tpu.memory_space<vmem>>, %arg20: memref<1x1x64xf32, #tpu.memory_space<vmem>>) attributes {dimension_semantics = [#tpu.dimension_semantics<parallel>], iteration_bounds = array<i64: 2>, scalar_prefetch = 0 : i64, scratch_operands = 0 : i64, tpu.core_type = #tpu.core_type<tc>, window_params = [{transform_indices = @transform_0, window_bounds = array<i64: 1, 8, 512>}, {pipeline_mode = #tpu.pipeline_mode<synchronous>, transform_indices = @transform_1, window_bounds = array<i64: 8, 72>}, {pipeline_mode = #tpu.pipeline_mode<synchronous>, transform_indices = @transform_2, window_bounds = array<i64: 8, 1>}, {pipeline_mode = #tpu.pipeline_mode<synchronous>, transform_indices = @transform_3, window_bounds = array<i64: 512, 128>}, {pipeline_mode = #tpu.pipeline_mode<synchronous>, transform_indices = @transform_4, window_bounds = array<i64: 8, 72>}, {pipeline_mode = #tpu.pipeline_mode<synchronous>, transform_indices = @transform_5, window_bounds = array<i64: 8, 1>}, {pipeline_mode = #tpu.pipeline_mode<synchronous>, transform_indices = @transform_6, window_bounds = array<i64: 8, 72>}, {pipeline_mode = #tpu.pipeline_mode<synchronous>, transform_indices = @transform_7, window_bounds = array<i64: 8, 1>}, {pipeline_mode = #tpu.pipeline_mode<synchronous>, transform_indices = @transform_8, window_bounds = array<i64: 8, 72>}, {pipeline_mode = #tpu.pipeline_mode<synchronous>, transform_indices = @transform_9, window_bounds = array<i64: 8, 1>}, {pipeline_mode = #tpu.pipeline_mode<synchronous>, transform_indices = @transform_10, window_bounds = array<i64: 128, 32>}, {pipeline_mode = #tpu.pipeline_mode<synchronous>, transform_indices = @transform_11, window_bounds = array<i64: 8, 72>}, {pipeline_mode = #tpu.pipeline_mode<synchronous>, transform_indices = @transform_12, window_bounds = array<i64: 8, 1>}, {pipeline_mode = #tpu.pipeline_mode<synchronous>, transform_indices = @transform_13, window_bounds = array<i64: 8, 72>}, {pipeline_mode = #tpu.pipeline_mode<synchronous>, transform_indices = @transform_14, window_bounds = array<i64: 8, 1>}, {pipeline_mode = #tpu.pipeline_mode<synchronous>, transform_indices = @transform_15, window_bounds = array<i64: 256, 64>}, {pipeline_mode = #tpu.pipeline_mode<synchronous>, transform_indices = @transform_16, window_bounds = array<i64: 1, 64>}, {pipeline_mode = #tpu.pipeline_mode<synchronous>, transform_indices = @transform_17, window_bounds = array<i64: 64, 64>}, {pipeline_mode = #tpu.pipeline_mode<synchronous>, transform_indices = @transform_18, window_bounds = array<i64: 1, 64>}, {transform_indices = @transform_19, window_bounds = array<i64: 1, 1, 64>}]} {
    %c0 = arith.constant 0 : index
    %c0_0 = arith.constant 0 : index
    %c0_1 = arith.constant 0 : index
    %0 = vector.load %arg1[%c0, %c0_0, %c0_1] : memref<1x8x512xf32, #tpu.memory_space<vmem>>, vector<1x8x512xf32>
    %1 = vector.shape_cast %0 : vector<1x8x512xf32> to vector<8x512xf32>
    %2 = tpu.iota {dimensions = array<i32: 1>} : vector<1x512xi32>
    %c15_i32 = arith.constant 15 : i32
    %3 = vector.broadcast %c15_i32 : i32 to vector<1x512xi32>
    %4 = arith.andi %2, %3 : vector<1x512xi32>
    %c4_i32 = arith.constant 4 : i32
    %5 = vector.broadcast %c4_i32 : i32 to vector<1x512xi32>
    %6 = arith.shrsi %2, %5 : vector<1x512xi32>
    %c15_i32_2 = arith.constant 15 : i32
    %7 = vector.broadcast %c15_i32_2 : i32 to vector<1x512xi32>
    %8 = arith.andi %6, %7 : vector<1x512xi32>
    %c-1_i32 = arith.constant -1 : i32
    %9 = vector.broadcast %c-1_i32 : i32 to vector<1x512xi32>
    %10 = arith.addi %8, %9 : vector<1x512xi32>
    %c0_i32 = arith.constant 0 : i32
    %11 = vector.broadcast %c0_i32 : i32 to vector<1x512xi32>
    %12 = arith.cmpi sge, %10, %11 : vector<1x512xi32>
    %c-1_i32_3 = arith.constant -1 : i32
    %13 = vector.broadcast %c-1_i32_3 : i32 to vector<1x512xi32>
    %14 = arith.addi %8, %13 : vector<1x512xi32>
    %c16_i32 = arith.constant 16 : i32
    %15 = vector.broadcast %c16_i32 : i32 to vector<1x512xi32>
    %16 = arith.cmpi slt, %14, %15 : vector<1x512xi32>
    %17 = arith.andi %12, %16 : vector<1x512xi1>
    %c-1_i32_4 = arith.constant -1 : i32
    %18 = vector.broadcast %c-1_i32_4 : i32 to vector<1x512xi32>
    %19 = arith.addi %4, %18 : vector<1x512xi32>
    %c0_i32_5 = arith.constant 0 : i32
    %20 = vector.broadcast %c0_i32_5 : i32 to vector<1x512xi32>
    %21 = arith.cmpi sge, %19, %20 : vector<1x512xi32>
    %22 = arith.andi %17, %21 : vector<1x512xi1>
    %c-1_i32_6 = arith.constant -1 : i32
    %23 = vector.broadcast %c-1_i32_6 : i32 to vector<1x512xi32>
    %24 = arith.addi %4, %23 : vector<1x512xi32>
    %c16_i32_7 = arith.constant 16 : i32
    %25 = vector.broadcast %c16_i32_7 : i32 to vector<1x512xi32>
    %26 = arith.cmpi slt, %24, %25 : vector<1x512xi32>
    %27 = arith.andi %22, %26 : vector<1x512xi1>
    %28 = arith.extui %27 : vector<1x512xi1> to vector<1x512xi32>
    %29 = arith.sitofp %28 : vector<1x512xi32> to vector<1x512xf32>
    %c-1_i32_8 = arith.constant -1 : i32
    %30 = vector.broadcast %c-1_i32_8 : i32 to vector<1x512xi32>
    %31 = arith.addi %8, %30 : vector<1x512xi32>
    %c0_i32_9 = arith.constant 0 : i32
    %32 = vector.broadcast %c0_i32_9 : i32 to vector<1x512xi32>
    %33 = arith.cmpi sge, %31, %32 : vector<1x512xi32>
    %c-1_i32_10 = arith.constant -1 : i32
    %34 = vector.broadcast %c-1_i32_10 : i32 to vector<1x512xi32>
    %35 = arith.addi %8, %34 : vector<1x512xi32>
    %c16_i32_11 = arith.constant 16 : i32
    %36 = vector.broadcast %c16_i32_11 : i32 to vector<1x512xi32>
    %37 = arith.cmpi slt, %35, %36 : vector<1x512xi32>
    %38 = arith.andi %33, %37 : vector<1x512xi1>
    %c0_i32_12 = arith.constant 0 : i32
    %39 = vector.broadcast %c0_i32_12 : i32 to vector<1x512xi32>
    %40 = arith.addi %4, %39 : vector<1x512xi32>
    %c0_i32_13 = arith.constant 0 : i32
    %41 = vector.broadcast %c0_i32_13 : i32 to vector<1x512xi32>
    %42 = arith.cmpi sge, %40, %41 : vector<1x512xi32>
    %43 = arith.andi %38, %42 : vector<1x512xi1>
    %c0_i32_14 = arith.constant 0 : i32
    %44 = vector.broadcast %c0_i32_14 : i32 to vector<1x512xi32>
    %45 = arith.addi %4, %44 : vector<1x512xi32>
    %c16_i32_15 = arith.constant 16 : i32
    %46 = vector.broadcast %c16_i32_15 : i32 to vector<1x512xi32>
    %47 = arith.cmpi slt, %45, %46 : vector<1x512xi32>
    %48 = arith.andi %43, %47 : vector<1x512xi1>
    %49 = arith.extui %48 : vector<1x512xi1> to vector<1x512xi32>
    %50 = arith.sitofp %49 : vector<1x512xi32> to vector<1x512xf32>
    %c-1_i32_16 = arith.constant -1 : i32
    %51 = vector.broadcast %c-1_i32_16 : i32 to vector<1x512xi32>
    %52 = arith.addi %8, %51 : vector<1x512xi32>
    %c0_i32_17 = arith.constant 0 : i32
    %53 = vector.broadcast %c0_i32_17 : i32 to vector<1x512xi32>
    %54 = arith.cmpi sge, %52, %53 : vector<1x512xi32>
    %c-1_i32_18 = arith.constant -1 : i32
    %55 = vector.broadcast %c-1_i32_18 : i32 to vector<1x512xi32>
    %56 = arith.addi %8, %55 : vector<1x512xi32>
    %c16_i32_19 = arith.constant 16 : i32
    %57 = vector.broadcast %c16_i32_19 : i32 to vector<1x512xi32>
    %58 = arith.cmpi slt, %56, %57 : vector<1x512xi32>
    %59 = arith.andi %54, %58 : vector<1x512xi1>
    %c1_i32 = arith.constant 1 : i32
    %60 = vector.broadcast %c1_i32 : i32 to vector<1x512xi32>
    %61 = arith.addi %4, %60 : vector<1x512xi32>
    %c0_i32_20 = arith.constant 0 : i32
    %62 = vector.broadcast %c0_i32_20 : i32 to vector<1x512xi32>
    %63 = arith.cmpi sge, %61, %62 : vector<1x512xi32>
    %64 = arith.andi %59, %63 : vector<1x512xi1>
    %c1_i32_21 = arith.constant 1 : i32
    %65 = vector.broadcast %c1_i32_21 : i32 to vector<1x512xi32>
    %66 = arith.addi %4, %65 : vector<1x512xi32>
    %c16_i32_22 = arith.constant 16 : i32
    %67 = vector.broadcast %c16_i32_22 : i32 to vector<1x512xi32>
    %68 = arith.cmpi slt, %66, %67 : vector<1x512xi32>
    %69 = arith.andi %64, %68 : vector<1x512xi1>
    %70 = arith.extui %69 : vector<1x512xi1> to vector<1x512xi32>
    %71 = arith.sitofp %70 : vector<1x512xi32> to vector<1x512xf32>
    %c0_i32_23 = arith.constant 0 : i32
    %72 = vector.broadcast %c0_i32_23 : i32 to vector<1x512xi32>
    %73 = arith.addi %8, %72 : vector<1x512xi32>
    %c0_i32_24 = arith.constant 0 : i32
    %74 = vector.broadcast %c0_i32_24 : i32 to vector<1x512xi32>
    %75 = arith.cmpi sge, %73, %74 : vector<1x512xi32>
    %c0_i32_25 = arith.constant 0 : i32
    %76 = vector.broadcast %c0_i32_25 : i32 to vector<1x512xi32>
    %77 = arith.addi %8, %76 : vector<1x512xi32>
    %c16_i32_26 = arith.constant 16 : i32
    %78 = vector.broadcast %c16_i32_26 : i32 to vector<1x512xi32>
    %79 = arith.cmpi slt, %77, %78 : vector<1x512xi32>
    %80 = arith.andi %75, %79 : vector<1x512xi1>
    %c-1_i32_27 = arith.constant -1 : i32
    %81 = vector.broadcast %c-1_i32_27 : i32 to vector<1x512xi32>
    %82 = arith.addi %4, %81 : vector<1x512xi32>
    %c0_i32_28 = arith.constant 0 : i32
    %83 = vector.broadcast %c0_i32_28 : i32 to vector<1x512xi32>
    %84 = arith.cmpi sge, %82, %83 : vector<1x512xi32>
    %85 = arith.andi %80, %84 : vector<1x512xi1>
    %c-1_i32_29 = arith.constant -1 : i32
    %86 = vector.broadcast %c-1_i32_29 : i32 to vector<1x512xi32>
    %87 = arith.addi %4, %86 : vector<1x512xi32>
    %c16_i32_30 = arith.constant 16 : i32
    %88 = vector.broadcast %c16_i32_30 : i32 to vector<1x512xi32>
    %89 = arith.cmpi slt, %87, %88 : vector<1x512xi32>
    %90 = arith.andi %85, %89 : vector<1x512xi1>
    %91 = arith.extui %90 : vector<1x512xi1> to vector<1x512xi32>
    %92 = arith.sitofp %91 : vector<1x512xi32> to vector<1x512xf32>
    %c0_i32_31 = arith.constant 0 : i32
    %93 = vector.broadcast %c0_i32_31 : i32 to vector<1x512xi32>
    %94 = arith.addi %8, %93 : vector<1x512xi32>
    %c0_i32_32 = arith.constant 0 : i32
    %95 = vector.broadcast %c0_i32_32 : i32 to vector<1x512xi32>
    %96 = arith.cmpi sge, %94, %95 : vector<1x512xi32>
    %c0_i32_33 = arith.constant 0 : i32
    %97 = vector.broadcast %c0_i32_33 : i32 to vector<1x512xi32>
    %98 = arith.addi %8, %97 : vector<1x512xi32>
    %c16_i32_34 = arith.constant 16 : i32
    %99 = vector.broadcast %c16_i32_34 : i32 to vector<1x512xi32>
    %100 = arith.cmpi slt, %98, %99 : vector<1x512xi32>
    %101 = arith.andi %96, %100 : vector<1x512xi1>
    %c1_i32_35 = arith.constant 1 : i32
    %102 = vector.broadcast %c1_i32_35 : i32 to vector<1x512xi32>
    %103 = arith.addi %4, %102 : vector<1x512xi32>
    %c0_i32_36 = arith.constant 0 : i32
    %104 = vector.broadcast %c0_i32_36 : i32 to vector<1x512xi32>
    %105 = arith.cmpi sge, %103, %104 : vector<1x512xi32>
    %106 = arith.andi %101, %105 : vector<1x512xi1>
    %c1_i32_37 = arith.constant 1 : i32
    %107 = vector.broadcast %c1_i32_37 : i32 to vector<1x512xi32>
    %108 = arith.addi %4, %107 : vector<1x512xi32>
    %c16_i32_38 = arith.constant 16 : i32
    %109 = vector.broadcast %c16_i32_38 : i32 to vector<1x512xi32>
    %110 = arith.cmpi slt, %108, %109 : vector<1x512xi32>
    %111 = arith.andi %106, %110 : vector<1x512xi1>
    %112 = arith.extui %111 : vector<1x512xi1> to vector<1x512xi32>
    %113 = arith.sitofp %112 : vector<1x512xi32> to vector<1x512xf32>
    %c1_i32_39 = arith.constant 1 : i32
    %114 = vector.broadcast %c1_i32_39 : i32 to vector<1x512xi32>
    %115 = arith.addi %8, %114 : vector<1x512xi32>
    %c0_i32_40 = arith.constant 0 : i32
    %116 = vector.broadcast %c0_i32_40 : i32 to vector<1x512xi32>
    %117 = arith.cmpi sge, %115, %116 : vector<1x512xi32>
    %c1_i32_41 = arith.constant 1 : i32
    %118 = vector.broadcast %c1_i32_41 : i32 to vector<1x512xi32>
    %119 = arith.addi %8, %118 : vector<1x512xi32>
    %c16_i32_42 = arith.constant 16 : i32
    %120 = vector.broadcast %c16_i32_42 : i32 to vector<1x512xi32>
    %121 = arith.cmpi slt, %119, %120 : vector<1x512xi32>
    %122 = arith.andi %117, %121 : vector<1x512xi1>
    %c-1_i32_43 = arith.constant -1 : i32
    %123 = vector.broadcast %c-1_i32_43 : i32 to vector<1x512xi32>
    %124 = arith.addi %4, %123 : vector<1x512xi32>
    %c0_i32_44 = arith.constant 0 : i32
    %125 = vector.broadcast %c0_i32_44 : i32 to vector<1x512xi32>
    %126 = arith.cmpi sge, %124, %125 : vector<1x512xi32>
    %127 = arith.andi %122, %126 : vector<1x512xi1>
    %c-1_i32_45 = arith.constant -1 : i32
    %128 = vector.broadcast %c-1_i32_45 : i32 to vector<1x512xi32>
    %129 = arith.addi %4, %128 : vector<1x512xi32>
    %c16_i32_46 = arith.constant 16 : i32
    %130 = vector.broadcast %c16_i32_46 : i32 to vector<1x512xi32>
    %131 = arith.cmpi slt, %129, %130 : vector<1x512xi32>
    %132 = arith.andi %127, %131 : vector<1x512xi1>
    %133 = arith.extui %132 : vector<1x512xi1> to vector<1x512xi32>
    %134 = arith.sitofp %133 : vector<1x512xi32> to vector<1x512xf32>
    %c1_i32_47 = arith.constant 1 : i32
    %135 = vector.broadcast %c1_i32_47 : i32 to vector<1x512xi32>
    %136 = arith.addi %8, %135 : vector<1x512xi32>
    %c0_i32_48 = arith.constant 0 : i32
    %137 = vector.broadcast %c0_i32_48 : i32 to vector<1x512xi32>
    %138 = arith.cmpi sge, %136, %137 : vector<1x512xi32>
    %c1_i32_49 = arith.constant 1 : i32
    %139 = vector.broadcast %c1_i32_49 : i32 to vector<1x512xi32>
    %140 = arith.addi %8, %139 : vector<1x512xi32>
    %c16_i32_50 = arith.constant 16 : i32
    %141 = vector.broadcast %c16_i32_50 : i32 to vector<1x512xi32>
    %142 = arith.cmpi slt, %140, %141 : vector<1x512xi32>
    %143 = arith.andi %138, %142 : vector<1x512xi1>
    %c0_i32_51 = arith.constant 0 : i32
    %144 = vector.broadcast %c0_i32_51 : i32 to vector<1x512xi32>
    %145 = arith.addi %4, %144 : vector<1x512xi32>
    %c0_i32_52 = arith.constant 0 : i32
    %146 = vector.broadcast %c0_i32_52 : i32 to vector<1x512xi32>
    %147 = arith.cmpi sge, %145, %146 : vector<1x512xi32>
    %148 = arith.andi %143, %147 : vector<1x512xi1>
    %c0_i32_53 = arith.constant 0 : i32
    %149 = vector.broadcast %c0_i32_53 : i32 to vector<1x512xi32>
    %150 = arith.addi %4, %149 : vector<1x512xi32>
    %c16_i32_54 = arith.constant 16 : i32
    %151 = vector.broadcast %c16_i32_54 : i32 to vector<1x512xi32>
    %152 = arith.cmpi slt, %150, %151 : vector<1x512xi32>
    %153 = arith.andi %148, %152 : vector<1x512xi1>
    %154 = arith.extui %153 : vector<1x512xi1> to vector<1x512xi32>
    %155 = arith.sitofp %154 : vector<1x512xi32> to vector<1x512xf32>
    %c1_i32_55 = arith.constant 1 : i32
    %156 = vector.broadcast %c1_i32_55 : i32 to vector<1x512xi32>
    %157 = arith.addi %8, %156 : vector<1x512xi32>
    %c0_i32_56 = arith.constant 0 : i32
    %158 = vector.broadcast %c0_i32_56 : i32 to vector<1x512xi32>
    %159 = arith.cmpi sge, %157, %158 : vector<1x512xi32>
    %c1_i32_57 = arith.constant 1 : i32
    %160 = vector.broadcast %c1_i32_57 : i32 to vector<1x512xi32>
    %161 = arith.addi %8, %160 : vector<1x512xi32>
    %c16_i32_58 = arith.constant 16 : i32
    %162 = vector.broadcast %c16_i32_58 : i32 to vector<1x512xi32>
    %163 = arith.cmpi slt, %161, %162 : vector<1x512xi32>
    %164 = arith.andi %159, %163 : vector<1x512xi1>
    %c1_i32_59 = arith.constant 1 : i32
    %165 = vector.broadcast %c1_i32_59 : i32 to vector<1x512xi32>
    %166 = arith.addi %4, %165 : vector<1x512xi32>
    %c0_i32_60 = arith.constant 0 : i32
    %167 = vector.broadcast %c0_i32_60 : i32 to vector<1x512xi32>
    %168 = arith.cmpi sge, %166, %167 : vector<1x512xi32>
    %169 = arith.andi %164, %168 : vector<1x512xi1>
    %c1_i32_61 = arith.constant 1 : i32
    %170 = vector.broadcast %c1_i32_61 : i32 to vector<1x512xi32>
    %171 = arith.addi %4, %170 : vector<1x512xi32>
    %c16_i32_62 = arith.constant 16 : i32
    %172 = vector.broadcast %c16_i32_62 : i32 to vector<1x512xi32>
    %173 = arith.cmpi slt, %171, %172 : vector<1x512xi32>
    %174 = arith.andi %169, %173 : vector<1x512xi1>
    %175 = arith.extui %174 : vector<1x512xi1> to vector<1x512xi32>
    %176 = arith.sitofp %175 : vector<1x512xi32> to vector<1x512xf32>
    %cst = arith.constant 0.000000e+00 : f32
    %177 = vector.broadcast %cst : f32 to vector<8x17xf32>
    %178 = tpu.concatenate %177, %1, %177 in 1 : vector<8x17xf32>, vector<8x512xf32>, vector<8x17xf32> -> vector<8x546xf32>
    %179 = vector.extract_strided_slice %178 {offsets = [0, 0], sizes = [8, 512], strides = [1, 1]} : vector<8x546xf32> to vector<8x512xf32>
    %180 = vector.broadcast %29 : vector<1x512xf32> to vector<8x512xf32>
    %181 = arith.mulf %179, %180 : vector<8x512xf32>
    %182 = vector.extract_strided_slice %178 {offsets = [0, 1], sizes = [8, 512], strides = [1, 1]} : vector<8x546xf32> to vector<8x512xf32>
    %183 = vector.broadcast %50 : vector<1x512xf32> to vector<8x512xf32>
    %184 = arith.mulf %182, %183 : vector<8x512xf32>
    %185 = vector.extract_strided_slice %178 {offsets = [0, 2], sizes = [8, 512], strides = [1, 1]} : vector<8x546xf32> to vector<8x512xf32>
    %186 = vector.broadcast %71 : vector<1x512xf32> to vector<8x512xf32>
    %187 = arith.mulf %185, %186 : vector<8x512xf32>
    %188 = vector.extract_strided_slice %178 {offsets = [0, 16], sizes = [8, 512], strides = [1, 1]} : vector<8x546xf32> to vector<8x512xf32>
    %189 = vector.broadcast %92 : vector<1x512xf32> to vector<8x512xf32>
    %190 = arith.mulf %188, %189 : vector<8x512xf32>
    %191 = vector.extract_strided_slice %178 {offsets = [0, 18], sizes = [8, 512], strides = [1, 1]} : vector<8x546xf32> to vector<8x512xf32>
    %192 = vector.broadcast %113 : vector<1x512xf32> to vector<8x512xf32>
    %193 = arith.mulf %191, %192 : vector<8x512xf32>
    %194 = vector.extract_strided_slice %178 {offsets = [0, 32], sizes = [8, 512], strides = [1, 1]} : vector<8x546xf32> to vector<8x512xf32>
    %195 = vector.broadcast %134 : vector<1x512xf32> to vector<8x512xf32>
    %196 = arith.mulf %194, %195 : vector<8x512xf32>
    %197 = vector.extract_strided_slice %178 {offsets = [0, 33], sizes = [8, 512], strides = [1, 1]} : vector<8x546xf32> to vector<8x512xf32>
    %198 = vector.broadcast %155 : vector<1x512xf32> to vector<8x512xf32>
    %199 = arith.mulf %197, %198 : vector<8x512xf32>
    %200 = vector.extract_strided_slice %178 {offsets = [0, 34], sizes = [8, 512], strides = [1, 1]} : vector<8x546xf32> to vector<8x512xf32>
    %201 = vector.broadcast %176 : vector<1x512xf32> to vector<8x512xf32>
    %202 = arith.mulf %200, %201 : vector<8x512xf32>
    %203 = tpu.concatenate %181, %184, %187, %190, %1, %193, %196, %199, %202 in 0 : vector<8x512xf32>, vector<8x512xf32>, vector<8x512xf32>, vector<8x512xf32>, vector<8x512xf32>, vector<8x512xf32>, vector<8x512xf32>, vector<8x512xf32>, vector<8x512xf32> -> vector<72x512xf32>
    %c0_63 = arith.constant 0 : index
    %c0_64 = arith.constant 0 : index
    %204 = vector.load %arg2[%c0_63, %c0_64] : memref<8x72xf32, #tpu.memory_space<vmem>>, vector<8x72xf32>
    %cst_65 = arith.constant dense<0.000000e+00> : vector<8x512xf32>
    %205 = tpu.matmul %204, %203, %cst_65 {dimension_numbers = #tpu.dot_dimension_numbers<[1], [0], [0], [1], [0, 0, 1, 1], [], []>} : vector<8x72xf32>, vector<72x512xf32>, vector<8x512xf32> -> vector<8x512xf32>
    %c0_66 = arith.constant 0 : index
    %c0_67 = arith.constant 0 : index
    %206 = vector.load %arg3[%c0_66, %c0_67] : memref<8x1xf32, #tpu.memory_space<vmem>>, vector<8x1xf32>
    %207 = vector.broadcast %206 : vector<8x1xf32> to vector<8x512xf32>
    %208 = arith.addf %205, %207 : vector<8x512xf32>
    %cst_68 = arith.constant 0.000000e+00 : f32
    %209 = vector.broadcast %cst_68 : f32 to vector<8x512xf32>
    %210 = arith.maximumf %208, %209 : vector<8x512xf32>
    %cst_69 = arith.constant 0.000000e+00 : f32
    %211 = vector.broadcast %cst_69 : f32 to vector<8x17xf32>
    %212 = tpu.concatenate %211, %210, %211 in 1 : vector<8x17xf32>, vector<8x512xf32>, vector<8x17xf32> -> vector<8x546xf32>
    %213 = vector.extract_strided_slice %212 {offsets = [0, 0], sizes = [8, 512], strides = [1, 1]} : vector<8x546xf32> to vector<8x512xf32>
    %214 = vector.broadcast %29 : vector<1x512xf32> to vector<8x512xf32>
    %215 = arith.mulf %213, %214 : vector<8x512xf32>
    %216 = arith.maximumf %210, %215 : vector<8x512xf32>
    %217 = vector.extract_strided_slice %212 {offsets = [0, 1], sizes = [8, 512], strides = [1, 1]} : vector<8x546xf32> to vector<8x512xf32>
    %218 = vector.broadcast %50 : vector<1x512xf32> to vector<8x512xf32>
    %219 = arith.mulf %217, %218 : vector<8x512xf32>
    %220 = arith.maximumf %216, %219 : vector<8x512xf32>
    %221 = vector.extract_strided_slice %212 {offsets = [0, 2], sizes = [8, 512], strides = [1, 1]} : vector<8x546xf32> to vector<8x512xf32>
    %222 = vector.broadcast %71 : vector<1x512xf32> to vector<8x512xf32>
    %223 = arith.mulf %221, %222 : vector<8x512xf32>
    %224 = arith.maximumf %220, %223 : vector<8x512xf32>
    %225 = vector.extract_strided_slice %212 {offsets = [0, 16], sizes = [8, 512], strides = [1, 1]} : vector<8x546xf32> to vector<8x512xf32>
    %226 = vector.broadcast %92 : vector<1x512xf32> to vector<8x512xf32>
    %227 = arith.mulf %225, %226 : vector<8x512xf32>
    %228 = arith.maximumf %224, %227 : vector<8x512xf32>
    %229 = vector.extract_strided_slice %212 {offsets = [0, 18], sizes = [8, 512], strides = [1, 1]} : vector<8x546xf32> to vector<8x512xf32>
    %230 = vector.broadcast %113 : vector<1x512xf32> to vector<8x512xf32>
    %231 = arith.mulf %229, %230 : vector<8x512xf32>
    %232 = arith.maximumf %228, %231 : vector<8x512xf32>
    %233 = vector.extract_strided_slice %212 {offsets = [0, 32], sizes = [8, 512], strides = [1, 1]} : vector<8x546xf32> to vector<8x512xf32>
    %234 = vector.broadcast %134 : vector<1x512xf32> to vector<8x512xf32>
    %235 = arith.mulf %233, %234 : vector<8x512xf32>
    %236 = arith.maximumf %232, %235 : vector<8x512xf32>
    %237 = vector.extract_strided_slice %212 {offsets = [0, 33], sizes = [8, 512], strides = [1, 1]} : vector<8x546xf32> to vector<8x512xf32>
    %238 = vector.broadcast %155 : vector<1x512xf32> to vector<8x512xf32>
    %239 = arith.mulf %237, %238 : vector<8x512xf32>
    %240 = arith.maximumf %236, %239 : vector<8x512xf32>
    %241 = vector.extract_strided_slice %212 {offsets = [0, 34], sizes = [8, 512], strides = [1, 1]} : vector<8x546xf32> to vector<8x512xf32>
    %242 = vector.broadcast %176 : vector<1x512xf32> to vector<8x512xf32>
    %243 = arith.mulf %241, %242 : vector<8x512xf32>
    %244 = arith.maximumf %240, %243 : vector<8x512xf32>
    %c0_70 = arith.constant 0 : index
    %c0_71 = arith.constant 0 : index
    %245 = vector.load %arg4[%c0_70, %c0_71] : memref<512x128xf32, #tpu.memory_space<vmem>>, vector<512x128xf32>
    %cst_72 = arith.constant dense<0.000000e+00> : vector<8x128xf32>
    %246 = tpu.matmul %244, %245, %cst_72 {dimension_numbers = #tpu.dot_dimension_numbers<[1], [0], [0], [1], [0, 0, 1, 1], [], []>} : vector<8x512xf32>, vector<512x128xf32>, vector<8x128xf32> -> vector<8x128xf32>
    %247 = tpu.iota {dimensions = array<i32: 1>} : vector<1x128xi32>
    %c7_i32 = arith.constant 7 : i32
    %248 = vector.broadcast %c7_i32 : i32 to vector<1x128xi32>
    %249 = arith.andi %247, %248 : vector<1x128xi32>
    %c3_i32 = arith.constant 3 : i32
    %250 = vector.broadcast %c3_i32 : i32 to vector<1x128xi32>
    %251 = arith.shrsi %247, %250 : vector<1x128xi32>
    %c7_i32_73 = arith.constant 7 : i32
    %252 = vector.broadcast %c7_i32_73 : i32 to vector<1x128xi32>
    %253 = arith.andi %251, %252 : vector<1x128xi32>
    %c-1_i32_74 = arith.constant -1 : i32
    %254 = vector.broadcast %c-1_i32_74 : i32 to vector<1x128xi32>
    %255 = arith.addi %253, %254 : vector<1x128xi32>
    %c0_i32_75 = arith.constant 0 : i32
    %256 = vector.broadcast %c0_i32_75 : i32 to vector<1x128xi32>
    %257 = arith.cmpi sge, %255, %256 : vector<1x128xi32>
    %c-1_i32_76 = arith.constant -1 : i32
    %258 = vector.broadcast %c-1_i32_76 : i32 to vector<1x128xi32>
    %259 = arith.addi %253, %258 : vector<1x128xi32>
    %c8_i32 = arith.constant 8 : i32
    %260 = vector.broadcast %c8_i32 : i32 to vector<1x128xi32>
    %261 = arith.cmpi slt, %259, %260 : vector<1x128xi32>
    %262 = arith.andi %257, %261 : vector<1x128xi1>
    %c-1_i32_77 = arith.constant -1 : i32
    %263 = vector.broadcast %c-1_i32_77 : i32 to vector<1x128xi32>
    %264 = arith.addi %249, %263 : vector<1x128xi32>
    %c0_i32_78 = arith.constant 0 : i32
    %265 = vector.broadcast %c0_i32_78 : i32 to vector<1x128xi32>
    %266 = arith.cmpi sge, %264, %265 : vector<1x128xi32>
    %267 = arith.andi %262, %266 : vector<1x128xi1>
    %c-1_i32_79 = arith.constant -1 : i32
    %268 = vector.broadcast %c-1_i32_79 : i32 to vector<1x128xi32>
    %269 = arith.addi %249, %268 : vector<1x128xi32>
    %c8_i32_80 = arith.constant 8 : i32
    %270 = vector.broadcast %c8_i32_80 : i32 to vector<1x128xi32>
    %271 = arith.cmpi slt, %269, %270 : vector<1x128xi32>
    %272 = arith.andi %267, %271 : vector<1x128xi1>
    %273 = arith.extui %272 : vector<1x128xi1> to vector<1x128xi32>
    %274 = arith.sitofp %273 : vector<1x128xi32> to vector<1x128xf32>
    %c-1_i32_81 = arith.constant -1 : i32
    %275 = vector.broadcast %c-1_i32_81 : i32 to vector<1x128xi32>
    %276 = arith.addi %253, %275 : vector<1x128xi32>
    %c0_i32_82 = arith.constant 0 : i32
    %277 = vector.broadcast %c0_i32_82 : i32 to vector<1x128xi32>
    %278 = arith.cmpi sge, %276, %277 : vector<1x128xi32>
    %c-1_i32_83 = arith.constant -1 : i32
    %279 = vector.broadcast %c-1_i32_83 : i32 to vector<1x128xi32>
    %280 = arith.addi %253, %279 : vector<1x128xi32>
    %c8_i32_84 = arith.constant 8 : i32
    %281 = vector.broadcast %c8_i32_84 : i32 to vector<1x128xi32>
    %282 = arith.cmpi slt, %280, %281 : vector<1x128xi32>
    %283 = arith.andi %278, %282 : vector<1x128xi1>
    %c0_i32_85 = arith.constant 0 : i32
    %284 = vector.broadcast %c0_i32_85 : i32 to vector<1x128xi32>
    %285 = arith.addi %249, %284 : vector<1x128xi32>
    %c0_i32_86 = arith.constant 0 : i32
    %286 = vector.broadcast %c0_i32_86 : i32 to vector<1x128xi32>
    %287 = arith.cmpi sge, %285, %286 : vector<1x128xi32>
    %288 = arith.andi %283, %287 : vector<1x128xi1>
    %c0_i32_87 = arith.constant 0 : i32
    %289 = vector.broadcast %c0_i32_87 : i32 to vector<1x128xi32>
    %290 = arith.addi %249, %289 : vector<1x128xi32>
    %c8_i32_88 = arith.constant 8 : i32
    %291 = vector.broadcast %c8_i32_88 : i32 to vector<1x128xi32>
    %292 = arith.cmpi slt, %290, %291 : vector<1x128xi32>
    %293 = arith.andi %288, %292 : vector<1x128xi1>
    %294 = arith.extui %293 : vector<1x128xi1> to vector<1x128xi32>
    %295 = arith.sitofp %294 : vector<1x128xi32> to vector<1x128xf32>
    %c-1_i32_89 = arith.constant -1 : i32
    %296 = vector.broadcast %c-1_i32_89 : i32 to vector<1x128xi32>
    %297 = arith.addi %253, %296 : vector<1x128xi32>
    %c0_i32_90 = arith.constant 0 : i32
    %298 = vector.broadcast %c0_i32_90 : i32 to vector<1x128xi32>
    %299 = arith.cmpi sge, %297, %298 : vector<1x128xi32>
    %c-1_i32_91 = arith.constant -1 : i32
    %300 = vector.broadcast %c-1_i32_91 : i32 to vector<1x128xi32>
    %301 = arith.addi %253, %300 : vector<1x128xi32>
    %c8_i32_92 = arith.constant 8 : i32
    %302 = vector.broadcast %c8_i32_92 : i32 to vector<1x128xi32>
    %303 = arith.cmpi slt, %301, %302 : vector<1x128xi32>
    %304 = arith.andi %299, %303 : vector<1x128xi1>
    %c1_i32_93 = arith.constant 1 : i32
    %305 = vector.broadcast %c1_i32_93 : i32 to vector<1x128xi32>
    %306 = arith.addi %249, %305 : vector<1x128xi32>
    %c0_i32_94 = arith.constant 0 : i32
    %307 = vector.broadcast %c0_i32_94 : i32 to vector<1x128xi32>
    %308 = arith.cmpi sge, %306, %307 : vector<1x128xi32>
    %309 = arith.andi %304, %308 : vector<1x128xi1>
    %c1_i32_95 = arith.constant 1 : i32
    %310 = vector.broadcast %c1_i32_95 : i32 to vector<1x128xi32>
    %311 = arith.addi %249, %310 : vector<1x128xi32>
    %c8_i32_96 = arith.constant 8 : i32
    %312 = vector.broadcast %c8_i32_96 : i32 to vector<1x128xi32>
    %313 = arith.cmpi slt, %311, %312 : vector<1x128xi32>
    %314 = arith.andi %309, %313 : vector<1x128xi1>
    %315 = arith.extui %314 : vector<1x128xi1> to vector<1x128xi32>
    %316 = arith.sitofp %315 : vector<1x128xi32> to vector<1x128xf32>
    %c0_i32_97 = arith.constant 0 : i32
    %317 = vector.broadcast %c0_i32_97 : i32 to vector<1x128xi32>
    %318 = arith.addi %253, %317 : vector<1x128xi32>
    %c0_i32_98 = arith.constant 0 : i32
    %319 = vector.broadcast %c0_i32_98 : i32 to vector<1x128xi32>
    %320 = arith.cmpi sge, %318, %319 : vector<1x128xi32>
    %c0_i32_99 = arith.constant 0 : i32
    %321 = vector.broadcast %c0_i32_99 : i32 to vector<1x128xi32>
    %322 = arith.addi %253, %321 : vector<1x128xi32>
    %c8_i32_100 = arith.constant 8 : i32
    %323 = vector.broadcast %c8_i32_100 : i32 to vector<1x128xi32>
    %324 = arith.cmpi slt, %322, %323 : vector<1x128xi32>
    %325 = arith.andi %320, %324 : vector<1x128xi1>
    %c-1_i32_101 = arith.constant -1 : i32
    %326 = vector.broadcast %c-1_i32_101 : i32 to vector<1x128xi32>
    %327 = arith.addi %249, %326 : vector<1x128xi32>
    %c0_i32_102 = arith.constant 0 : i32
    %328 = vector.broadcast %c0_i32_102 : i32 to vector<1x128xi32>
    %329 = arith.cmpi sge, %327, %328 : vector<1x128xi32>
    %330 = arith.andi %325, %329 : vector<1x128xi1>
    %c-1_i32_103 = arith.constant -1 : i32
    %331 = vector.broadcast %c-1_i32_103 : i32 to vector<1x128xi32>
    %332 = arith.addi %249, %331 : vector<1x128xi32>
    %c8_i32_104 = arith.constant 8 : i32
    %333 = vector.broadcast %c8_i32_104 : i32 to vector<1x128xi32>
    %334 = arith.cmpi slt, %332, %333 : vector<1x128xi32>
    %335 = arith.andi %330, %334 : vector<1x128xi1>
    %336 = arith.extui %335 : vector<1x128xi1> to vector<1x128xi32>
    %337 = arith.sitofp %336 : vector<1x128xi32> to vector<1x128xf32>
    %c0_i32_105 = arith.constant 0 : i32
    %338 = vector.broadcast %c0_i32_105 : i32 to vector<1x128xi32>
    %339 = arith.addi %253, %338 : vector<1x128xi32>
    %c0_i32_106 = arith.constant 0 : i32
    %340 = vector.broadcast %c0_i32_106 : i32 to vector<1x128xi32>
    %341 = arith.cmpi sge, %339, %340 : vector<1x128xi32>
    %c0_i32_107 = arith.constant 0 : i32
    %342 = vector.broadcast %c0_i32_107 : i32 to vector<1x128xi32>
    %343 = arith.addi %253, %342 : vector<1x128xi32>
    %c8_i32_108 = arith.constant 8 : i32
    %344 = vector.broadcast %c8_i32_108 : i32 to vector<1x128xi32>
    %345 = arith.cmpi slt, %343, %344 : vector<1x128xi32>
    %346 = arith.andi %341, %345 : vector<1x128xi1>
    %c1_i32_109 = arith.constant 1 : i32
    %347 = vector.broadcast %c1_i32_109 : i32 to vector<1x128xi32>
    %348 = arith.addi %249, %347 : vector<1x128xi32>
    %c0_i32_110 = arith.constant 0 : i32
    %349 = vector.broadcast %c0_i32_110 : i32 to vector<1x128xi32>
    %350 = arith.cmpi sge, %348, %349 : vector<1x128xi32>
    %351 = arith.andi %346, %350 : vector<1x128xi1>
    %c1_i32_111 = arith.constant 1 : i32
    %352 = vector.broadcast %c1_i32_111 : i32 to vector<1x128xi32>
    %353 = arith.addi %249, %352 : vector<1x128xi32>
    %c8_i32_112 = arith.constant 8 : i32
    %354 = vector.broadcast %c8_i32_112 : i32 to vector<1x128xi32>
    %355 = arith.cmpi slt, %353, %354 : vector<1x128xi32>
    %356 = arith.andi %351, %355 : vector<1x128xi1>
    %357 = arith.extui %356 : vector<1x128xi1> to vector<1x128xi32>
    %358 = arith.sitofp %357 : vector<1x128xi32> to vector<1x128xf32>
    %c1_i32_113 = arith.constant 1 : i32
    %359 = vector.broadcast %c1_i32_113 : i32 to vector<1x128xi32>
    %360 = arith.addi %253, %359 : vector<1x128xi32>
    %c0_i32_114 = arith.constant 0 : i32
    %361 = vector.broadcast %c0_i32_114 : i32 to vector<1x128xi32>
    %362 = arith.cmpi sge, %360, %361 : vector<1x128xi32>
    %c1_i32_115 = arith.constant 1 : i32
    %363 = vector.broadcast %c1_i32_115 : i32 to vector<1x128xi32>
    %364 = arith.addi %253, %363 : vector<1x128xi32>
    %c8_i32_116 = arith.constant 8 : i32
    %365 = vector.broadcast %c8_i32_116 : i32 to vector<1x128xi32>
    %366 = arith.cmpi slt, %364, %365 : vector<1x128xi32>
    %367 = arith.andi %362, %366 : vector<1x128xi1>
    %c-1_i32_117 = arith.constant -1 : i32
    %368 = vector.broadcast %c-1_i32_117 : i32 to vector<1x128xi32>
    %369 = arith.addi %249, %368 : vector<1x128xi32>
    %c0_i32_118 = arith.constant 0 : i32
    %370 = vector.broadcast %c0_i32_118 : i32 to vector<1x128xi32>
    %371 = arith.cmpi sge, %369, %370 : vector<1x128xi32>
    %372 = arith.andi %367, %371 : vector<1x128xi1>
    %c-1_i32_119 = arith.constant -1 : i32
    %373 = vector.broadcast %c-1_i32_119 : i32 to vector<1x128xi32>
    %374 = arith.addi %249, %373 : vector<1x128xi32>
    %c8_i32_120 = arith.constant 8 : i32
    %375 = vector.broadcast %c8_i32_120 : i32 to vector<1x128xi32>
    %376 = arith.cmpi slt, %374, %375 : vector<1x128xi32>
    %377 = arith.andi %372, %376 : vector<1x128xi1>
    %378 = arith.extui %377 : vector<1x128xi1> to vector<1x128xi32>
    %379 = arith.sitofp %378 : vector<1x128xi32> to vector<1x128xf32>
    %c1_i32_121 = arith.constant 1 : i32
    %380 = vector.broadcast %c1_i32_121 : i32 to vector<1x128xi32>
    %381 = arith.addi %253, %380 : vector<1x128xi32>
    %c0_i32_122 = arith.constant 0 : i32
    %382 = vector.broadcast %c0_i32_122 : i32 to vector<1x128xi32>
    %383 = arith.cmpi sge, %381, %382 : vector<1x128xi32>
    %c1_i32_123 = arith.constant 1 : i32
    %384 = vector.broadcast %c1_i32_123 : i32 to vector<1x128xi32>
    %385 = arith.addi %253, %384 : vector<1x128xi32>
    %c8_i32_124 = arith.constant 8 : i32
    %386 = vector.broadcast %c8_i32_124 : i32 to vector<1x128xi32>
    %387 = arith.cmpi slt, %385, %386 : vector<1x128xi32>
    %388 = arith.andi %383, %387 : vector<1x128xi1>
    %c0_i32_125 = arith.constant 0 : i32
    %389 = vector.broadcast %c0_i32_125 : i32 to vector<1x128xi32>
    %390 = arith.addi %249, %389 : vector<1x128xi32>
    %c0_i32_126 = arith.constant 0 : i32
    %391 = vector.broadcast %c0_i32_126 : i32 to vector<1x128xi32>
    %392 = arith.cmpi sge, %390, %391 : vector<1x128xi32>
    %393 = arith.andi %388, %392 : vector<1x128xi1>
    %c0_i32_127 = arith.constant 0 : i32
    %394 = vector.broadcast %c0_i32_127 : i32 to vector<1x128xi32>
    %395 = arith.addi %249, %394 : vector<1x128xi32>
    %c8_i32_128 = arith.constant 8 : i32
    %396 = vector.broadcast %c8_i32_128 : i32 to vector<1x128xi32>
    %397 = arith.cmpi slt, %395, %396 : vector<1x128xi32>
    %398 = arith.andi %393, %397 : vector<1x128xi1>
    %399 = arith.extui %398 : vector<1x128xi1> to vector<1x128xi32>
    %400 = arith.sitofp %399 : vector<1x128xi32> to vector<1x128xf32>
    %c1_i32_129 = arith.constant 1 : i32
    %401 = vector.broadcast %c1_i32_129 : i32 to vector<1x128xi32>
    %402 = arith.addi %253, %401 : vector<1x128xi32>
    %c0_i32_130 = arith.constant 0 : i32
    %403 = vector.broadcast %c0_i32_130 : i32 to vector<1x128xi32>
    %404 = arith.cmpi sge, %402, %403 : vector<1x128xi32>
    %c1_i32_131 = arith.constant 1 : i32
    %405 = vector.broadcast %c1_i32_131 : i32 to vector<1x128xi32>
    %406 = arith.addi %253, %405 : vector<1x128xi32>
    %c8_i32_132 = arith.constant 8 : i32
    %407 = vector.broadcast %c8_i32_132 : i32 to vector<1x128xi32>
    %408 = arith.cmpi slt, %406, %407 : vector<1x128xi32>
    %409 = arith.andi %404, %408 : vector<1x128xi1>
    %c1_i32_133 = arith.constant 1 : i32
    %410 = vector.broadcast %c1_i32_133 : i32 to vector<1x128xi32>
    %411 = arith.addi %249, %410 : vector<1x128xi32>
    %c0_i32_134 = arith.constant 0 : i32
    %412 = vector.broadcast %c0_i32_134 : i32 to vector<1x128xi32>
    %413 = arith.cmpi sge, %411, %412 : vector<1x128xi32>
    %414 = arith.andi %409, %413 : vector<1x128xi1>
    %c1_i32_135 = arith.constant 1 : i32
    %415 = vector.broadcast %c1_i32_135 : i32 to vector<1x128xi32>
    %416 = arith.addi %249, %415 : vector<1x128xi32>
    %c8_i32_136 = arith.constant 8 : i32
    %417 = vector.broadcast %c8_i32_136 : i32 to vector<1x128xi32>
    %418 = arith.cmpi slt, %416, %417 : vector<1x128xi32>
    %419 = arith.andi %414, %418 : vector<1x128xi1>
    %420 = arith.extui %419 : vector<1x128xi1> to vector<1x128xi32>
    %421 = arith.sitofp %420 : vector<1x128xi32> to vector<1x128xf32>
    %cst_137 = arith.constant 0.000000e+00 : f32
    %422 = vector.broadcast %cst_137 : f32 to vector<8x9xf32>
    %423 = tpu.concatenate %422, %246, %422 in 1 : vector<8x9xf32>, vector<8x128xf32>, vector<8x9xf32> -> vector<8x146xf32>
    %424 = vector.extract_strided_slice %423 {offsets = [0, 0], sizes = [8, 128], strides = [1, 1]} : vector<8x146xf32> to vector<8x128xf32>
    %425 = vector.broadcast %274 : vector<1x128xf32> to vector<8x128xf32>
    %426 = arith.mulf %424, %425 : vector<8x128xf32>
    %427 = vector.extract_strided_slice %423 {offsets = [0, 1], sizes = [8, 128], strides = [1, 1]} : vector<8x146xf32> to vector<8x128xf32>
    %428 = vector.broadcast %295 : vector<1x128xf32> to vector<8x128xf32>
    %429 = arith.mulf %427, %428 : vector<8x128xf32>
    %430 = vector.extract_strided_slice %423 {offsets = [0, 2], sizes = [8, 128], strides = [1, 1]} : vector<8x146xf32> to vector<8x128xf32>
    %431 = vector.broadcast %316 : vector<1x128xf32> to vector<8x128xf32>
    %432 = arith.mulf %430, %431 : vector<8x128xf32>
    %433 = vector.extract_strided_slice %423 {offsets = [0, 8], sizes = [8, 128], strides = [1, 1]} : vector<8x146xf32> to vector<8x128xf32>
    %434 = vector.broadcast %337 : vector<1x128xf32> to vector<8x128xf32>
    %435 = arith.mulf %433, %434 : vector<8x128xf32>
    %436 = vector.extract_strided_slice %423 {offsets = [0, 10], sizes = [8, 128], strides = [1, 1]} : vector<8x146xf32> to vector<8x128xf32>
    %437 = vector.broadcast %358 : vector<1x128xf32> to vector<8x128xf32>
    %438 = arith.mulf %436, %437 : vector<8x128xf32>
    %439 = vector.extract_strided_slice %423 {offsets = [0, 16], sizes = [8, 128], strides = [1, 1]} : vector<8x146xf32> to vector<8x128xf32>
    %440 = vector.broadcast %379 : vector<1x128xf32> to vector<8x128xf32>
    %441 = arith.mulf %439, %440 : vector<8x128xf32>
    %442 = vector.extract_strided_slice %423 {offsets = [0, 17], sizes = [8, 128], strides = [1, 1]} : vector<8x146xf32> to vector<8x128xf32>
    %443 = vector.broadcast %400 : vector<1x128xf32> to vector<8x128xf32>
    %444 = arith.mulf %442, %443 : vector<8x128xf32>
    %445 = vector.extract_strided_slice %423 {offsets = [0, 18], sizes = [8, 128], strides = [1, 1]} : vector<8x146xf32> to vector<8x128xf32>
    %446 = vector.broadcast %421 : vector<1x128xf32> to vector<8x128xf32>
    %447 = arith.mulf %445, %446 : vector<8x128xf32>
    %448 = tpu.concatenate %426, %429, %432, %435, %246, %438, %441, %444, %447 in 0 : vector<8x128xf32>, vector<8x128xf32>, vector<8x128xf32>, vector<8x128xf32>, vector<8x128xf32>, vector<8x128xf32>, vector<8x128xf32>, vector<8x128xf32>, vector<8x128xf32> -> vector<72x128xf32>
    %c0_138 = arith.constant 0 : index
    %c0_139 = arith.constant 0 : index
    %449 = vector.load %arg5[%c0_138, %c0_139] : memref<8x72xf32, #tpu.memory_space<vmem>>, vector<8x72xf32>
    %cst_140 = arith.constant dense<0.000000e+00> : vector<8x128xf32>
    %450 = tpu.matmul %449, %448, %cst_140 {dimension_numbers = #tpu.dot_dimension_numbers<[1], [0], [0], [1], [0, 0, 1, 1], [], []>} : vector<8x72xf32>, vector<72x128xf32>, vector<8x128xf32> -> vector<8x128xf32>
    %c0_141 = arith.constant 0 : index
    %c0_142 = arith.constant 0 : index
    %451 = vector.load %arg6[%c0_141, %c0_142] : memref<8x1xf32, #tpu.memory_space<vmem>>, vector<8x1xf32>
    %452 = vector.broadcast %451 : vector<8x1xf32> to vector<8x128xf32>
    %453 = arith.addf %450, %452 : vector<8x128xf32>
    %cst_143 = arith.constant 0.000000e+00 : f32
    %454 = vector.broadcast %cst_143 : f32 to vector<8x128xf32>
    %455 = arith.maximumf %453, %454 : vector<8x128xf32>
    %cst_144 = arith.constant 0.000000e+00 : f32
    %456 = vector.broadcast %cst_144 : f32 to vector<8x9xf32>
    %457 = tpu.concatenate %456, %455, %456 in 1 : vector<8x9xf32>, vector<8x128xf32>, vector<8x9xf32> -> vector<8x146xf32>
    %458 = vector.extract_strided_slice %457 {offsets = [0, 0], sizes = [8, 128], strides = [1, 1]} : vector<8x146xf32> to vector<8x128xf32>
    %459 = vector.broadcast %274 : vector<1x128xf32> to vector<8x128xf32>
    %460 = arith.mulf %458, %459 : vector<8x128xf32>
    %461 = vector.extract_strided_slice %457 {offsets = [0, 1], sizes = [8, 128], strides = [1, 1]} : vector<8x146xf32> to vector<8x128xf32>
    %462 = vector.broadcast %295 : vector<1x128xf32> to vector<8x128xf32>
    %463 = arith.mulf %461, %462 : vector<8x128xf32>
    %464 = vector.extract_strided_slice %457 {offsets = [0, 2], sizes = [8, 128], strides = [1, 1]} : vector<8x146xf32> to vector<8x128xf32>
    %465 = vector.broadcast %316 : vector<1x128xf32> to vector<8x128xf32>
    %466 = arith.mulf %464, %465 : vector<8x128xf32>
    %467 = vector.extract_strided_slice %457 {offsets = [0, 8], sizes = [8, 128], strides = [1, 1]} : vector<8x146xf32> to vector<8x128xf32>
    %468 = vector.broadcast %337 : vector<1x128xf32> to vector<8x128xf32>
    %469 = arith.mulf %467, %468 : vector<8x128xf32>
    %470 = vector.extract_strided_slice %457 {offsets = [0, 10], sizes = [8, 128], strides = [1, 1]} : vector<8x146xf32> to vector<8x128xf32>
    %471 = vector.broadcast %358 : vector<1x128xf32> to vector<8x128xf32>
    %472 = arith.mulf %470, %471 : vector<8x128xf32>
    %473 = vector.extract_strided_slice %457 {offsets = [0, 16], sizes = [8, 128], strides = [1, 1]} : vector<8x146xf32> to vector<8x128xf32>
    %474 = vector.broadcast %379 : vector<1x128xf32> to vector<8x128xf32>
    %475 = arith.mulf %473, %474 : vector<8x128xf32>
    %476 = vector.extract_strided_slice %457 {offsets = [0, 17], sizes = [8, 128], strides = [1, 1]} : vector<8x146xf32> to vector<8x128xf32>
    %477 = vector.broadcast %400 : vector<1x128xf32> to vector<8x128xf32>
    %478 = arith.mulf %476, %477 : vector<8x128xf32>
    %479 = vector.extract_strided_slice %457 {offsets = [0, 18], sizes = [8, 128], strides = [1, 1]} : vector<8x146xf32> to vector<8x128xf32>
    %480 = vector.broadcast %421 : vector<1x128xf32> to vector<8x128xf32>
    %481 = arith.mulf %479, %480 : vector<8x128xf32>
    %482 = tpu.concatenate %460, %463, %466, %469, %455, %472, %475, %478, %481 in 0 : vector<8x128xf32>, vector<8x128xf32>, vector<8x128xf32>, vector<8x128xf32>, vector<8x128xf32>, vector<8x128xf32>, vector<8x128xf32>, vector<8x128xf32>, vector<8x128xf32> -> vector<72x128xf32>
    %c0_145 = arith.constant 0 : index
    %c0_146 = arith.constant 0 : index
    %483 = vector.load %arg7[%c0_145, %c0_146] : memref<8x72xf32, #tpu.memory_space<vmem>>, vector<8x72xf32>
    %cst_147 = arith.constant dense<0.000000e+00> : vector<8x128xf32>
    %484 = tpu.matmul %483, %482, %cst_147 {dimension_numbers = #tpu.dot_dimension_numbers<[1], [0], [0], [1], [0, 0, 1, 1], [], []>} : vector<8x72xf32>, vector<72x128xf32>, vector<8x128xf32> -> vector<8x128xf32>
    %c0_148 = arith.constant 0 : index
    %c0_149 = arith.constant 0 : index
    %485 = vector.load %arg8[%c0_148, %c0_149] : memref<8x1xf32, #tpu.memory_space<vmem>>, vector<8x1xf32>
    %486 = vector.broadcast %485 : vector<8x1xf32> to vector<8x128xf32>
    %487 = arith.addf %484, %486 : vector<8x128xf32>
    %cst_150 = arith.constant 0.000000e+00 : f32
    %488 = vector.broadcast %cst_150 : f32 to vector<8x128xf32>
    %489 = arith.maximumf %487, %488 : vector<8x128xf32>
    %490 = arith.addf %246, %489 : vector<8x128xf32>
    %cst_151 = arith.constant 0.000000e+00 : f32
    %491 = vector.broadcast %cst_151 : f32 to vector<8x9xf32>
    %492 = tpu.concatenate %491, %490, %491 in 1 : vector<8x9xf32>, vector<8x128xf32>, vector<8x9xf32> -> vector<8x146xf32>
    %493 = vector.extract_strided_slice %492 {offsets = [0, 0], sizes = [8, 128], strides = [1, 1]} : vector<8x146xf32> to vector<8x128xf32>
    %494 = vector.broadcast %274 : vector<1x128xf32> to vector<8x128xf32>
    %495 = arith.mulf %493, %494 : vector<8x128xf32>
    %496 = vector.extract_strided_slice %492 {offsets = [0, 1], sizes = [8, 128], strides = [1, 1]} : vector<8x146xf32> to vector<8x128xf32>
    %497 = vector.broadcast %295 : vector<1x128xf32> to vector<8x128xf32>
    %498 = arith.mulf %496, %497 : vector<8x128xf32>
    %499 = vector.extract_strided_slice %492 {offsets = [0, 2], sizes = [8, 128], strides = [1, 1]} : vector<8x146xf32> to vector<8x128xf32>
    %500 = vector.broadcast %316 : vector<1x128xf32> to vector<8x128xf32>
    %501 = arith.mulf %499, %500 : vector<8x128xf32>
    %502 = vector.extract_strided_slice %492 {offsets = [0, 8], sizes = [8, 128], strides = [1, 1]} : vector<8x146xf32> to vector<8x128xf32>
    %503 = vector.broadcast %337 : vector<1x128xf32> to vector<8x128xf32>
    %504 = arith.mulf %502, %503 : vector<8x128xf32>
    %505 = vector.extract_strided_slice %492 {offsets = [0, 10], sizes = [8, 128], strides = [1, 1]} : vector<8x146xf32> to vector<8x128xf32>
    %506 = vector.broadcast %358 : vector<1x128xf32> to vector<8x128xf32>
    %507 = arith.mulf %505, %506 : vector<8x128xf32>
    %508 = vector.extract_strided_slice %492 {offsets = [0, 16], sizes = [8, 128], strides = [1, 1]} : vector<8x146xf32> to vector<8x128xf32>
    %509 = vector.broadcast %379 : vector<1x128xf32> to vector<8x128xf32>
    %510 = arith.mulf %508, %509 : vector<8x128xf32>
    %511 = vector.extract_strided_slice %492 {offsets = [0, 17], sizes = [8, 128], strides = [1, 1]} : vector<8x146xf32> to vector<8x128xf32>
    %512 = vector.broadcast %400 : vector<1x128xf32> to vector<8x128xf32>
    %513 = arith.mulf %511, %512 : vector<8x128xf32>
    %514 = vector.extract_strided_slice %492 {offsets = [0, 18], sizes = [8, 128], strides = [1, 1]} : vector<8x146xf32> to vector<8x128xf32>
    %515 = vector.broadcast %421 : vector<1x128xf32> to vector<8x128xf32>
    %516 = arith.mulf %514, %515 : vector<8x128xf32>
    %517 = tpu.concatenate %495, %498, %501, %504, %490, %507, %510, %513, %516 in 0 : vector<8x128xf32>, vector<8x128xf32>, vector<8x128xf32>, vector<8x128xf32>, vector<8x128xf32>, vector<8x128xf32>, vector<8x128xf32>, vector<8x128xf32>, vector<8x128xf32> -> vector<72x128xf32>
    %c0_152 = arith.constant 0 : index
    %c0_153 = arith.constant 0 : index
    %518 = vector.load %arg9[%c0_152, %c0_153] : memref<8x72xf32, #tpu.memory_space<vmem>>, vector<8x72xf32>
    %cst_154 = arith.constant dense<0.000000e+00> : vector<8x128xf32>
    %519 = tpu.matmul %518, %517, %cst_154 {dimension_numbers = #tpu.dot_dimension_numbers<[1], [0], [0], [1], [0, 0, 1, 1], [], []>} : vector<8x72xf32>, vector<72x128xf32>, vector<8x128xf32> -> vector<8x128xf32>
    %c0_155 = arith.constant 0 : index
    %c0_156 = arith.constant 0 : index
    %520 = vector.load %arg10[%c0_155, %c0_156] : memref<8x1xf32, #tpu.memory_space<vmem>>, vector<8x1xf32>
    %521 = vector.broadcast %520 : vector<8x1xf32> to vector<8x128xf32>
    %522 = arith.addf %519, %521 : vector<8x128xf32>
    %cst_157 = arith.constant 0.000000e+00 : f32
    %523 = vector.broadcast %cst_157 : f32 to vector<8x128xf32>
    %524 = arith.maximumf %522, %523 : vector<8x128xf32>
    %cst_158 = arith.constant 0.000000e+00 : f32
    %525 = vector.broadcast %cst_158 : f32 to vector<8x9xf32>
    %526 = tpu.concatenate %525, %524, %525 in 1 : vector<8x9xf32>, vector<8x128xf32>, vector<8x9xf32> -> vector<8x146xf32>
    %527 = vector.extract_strided_slice %526 {offsets = [0, 0], sizes = [8, 128], strides = [1, 1]} : vector<8x146xf32> to vector<8x128xf32>
    %528 = vector.broadcast %274 : vector<1x128xf32> to vector<8x128xf32>
    %529 = arith.mulf %527, %528 : vector<8x128xf32>
    %530 = arith.maximumf %524, %529 : vector<8x128xf32>
    %531 = vector.extract_strided_slice %526 {offsets = [0, 1], sizes = [8, 128], strides = [1, 1]} : vector<8x146xf32> to vector<8x128xf32>
    %532 = vector.broadcast %295 : vector<1x128xf32> to vector<8x128xf32>
    %533 = arith.mulf %531, %532 : vector<8x128xf32>
    %534 = arith.maximumf %530, %533 : vector<8x128xf32>
    %535 = vector.extract_strided_slice %526 {offsets = [0, 2], sizes = [8, 128], strides = [1, 1]} : vector<8x146xf32> to vector<8x128xf32>
    %536 = vector.broadcast %316 : vector<1x128xf32> to vector<8x128xf32>
    %537 = arith.mulf %535, %536 : vector<8x128xf32>
    %538 = arith.maximumf %534, %537 : vector<8x128xf32>
    %539 = vector.extract_strided_slice %526 {offsets = [0, 8], sizes = [8, 128], strides = [1, 1]} : vector<8x146xf32> to vector<8x128xf32>
    %540 = vector.broadcast %337 : vector<1x128xf32> to vector<8x128xf32>
    %541 = arith.mulf %539, %540 : vector<8x128xf32>
    %542 = arith.maximumf %538, %541 : vector<8x128xf32>
    %543 = vector.extract_strided_slice %526 {offsets = [0, 10], sizes = [8, 128], strides = [1, 1]} : vector<8x146xf32> to vector<8x128xf32>
    %544 = vector.broadcast %358 : vector<1x128xf32> to vector<8x128xf32>
    %545 = arith.mulf %543, %544 : vector<8x128xf32>
    %546 = arith.maximumf %542, %545 : vector<8x128xf32>
    %547 = vector.extract_strided_slice %526 {offsets = [0, 16], sizes = [8, 128], strides = [1, 1]} : vector<8x146xf32> to vector<8x128xf32>
    %548 = vector.broadcast %379 : vector<1x128xf32> to vector<8x128xf32>
    %549 = arith.mulf %547, %548 : vector<8x128xf32>
    %550 = arith.maximumf %546, %549 : vector<8x128xf32>
    %551 = vector.extract_strided_slice %526 {offsets = [0, 17], sizes = [8, 128], strides = [1, 1]} : vector<8x146xf32> to vector<8x128xf32>
    %552 = vector.broadcast %400 : vector<1x128xf32> to vector<8x128xf32>
    %553 = arith.mulf %551, %552 : vector<8x128xf32>
    %554 = arith.maximumf %550, %553 : vector<8x128xf32>
    %555 = vector.extract_strided_slice %526 {offsets = [0, 18], sizes = [8, 128], strides = [1, 1]} : vector<8x146xf32> to vector<8x128xf32>
    %556 = vector.broadcast %421 : vector<1x128xf32> to vector<8x128xf32>
    %557 = arith.mulf %555, %556 : vector<8x128xf32>
    %558 = arith.maximumf %554, %557 : vector<8x128xf32>
    %c0_159 = arith.constant 0 : index
    %c0_160 = arith.constant 0 : index
    %559 = vector.load %arg11[%c0_159, %c0_160] : memref<128x32xf32, #tpu.memory_space<vmem>>, vector<128x32xf32>
    %cst_161 = arith.constant dense<0.000000e+00> : vector<8x32xf32>
    %560 = tpu.matmul %558, %559, %cst_161 {dimension_numbers = #tpu.dot_dimension_numbers<[1], [0], [0], [1], [0, 0, 1, 1], [], []>} : vector<8x128xf32>, vector<128x32xf32>, vector<8x32xf32> -> vector<8x32xf32>
    %561 = tpu.iota {dimensions = array<i32: 1>} : vector<1x32xi32>
    %c3_i32_162 = arith.constant 3 : i32
    %562 = vector.broadcast %c3_i32_162 : i32 to vector<1x32xi32>
    %563 = arith.andi %561, %562 : vector<1x32xi32>
    %c2_i32 = arith.constant 2 : i32
    %564 = vector.broadcast %c2_i32 : i32 to vector<1x32xi32>
    %565 = arith.shrsi %561, %564 : vector<1x32xi32>
    %c3_i32_163 = arith.constant 3 : i32
    %566 = vector.broadcast %c3_i32_163 : i32 to vector<1x32xi32>
    %567 = arith.andi %565, %566 : vector<1x32xi32>
    %c-1_i32_164 = arith.constant -1 : i32
    %568 = vector.broadcast %c-1_i32_164 : i32 to vector<1x32xi32>
    %569 = arith.addi %567, %568 : vector<1x32xi32>
    %c0_i32_165 = arith.constant 0 : i32
    %570 = vector.broadcast %c0_i32_165 : i32 to vector<1x32xi32>
    %571 = arith.cmpi sge, %569, %570 : vector<1x32xi32>
    %c-1_i32_166 = arith.constant -1 : i32
    %572 = vector.broadcast %c-1_i32_166 : i32 to vector<1x32xi32>
    %573 = arith.addi %567, %572 : vector<1x32xi32>
    %c4_i32_167 = arith.constant 4 : i32
    %574 = vector.broadcast %c4_i32_167 : i32 to vector<1x32xi32>
    %575 = arith.cmpi slt, %573, %574 : vector<1x32xi32>
    %576 = arith.andi %571, %575 : vector<1x32xi1>
    %c-1_i32_168 = arith.constant -1 : i32
    %577 = vector.broadcast %c-1_i32_168 : i32 to vector<1x32xi32>
    %578 = arith.addi %563, %577 : vector<1x32xi32>
    %c0_i32_169 = arith.constant 0 : i32
    %579 = vector.broadcast %c0_i32_169 : i32 to vector<1x32xi32>
    %580 = arith.cmpi sge, %578, %579 : vector<1x32xi32>
    %581 = arith.andi %576, %580 : vector<1x32xi1>
    %c-1_i32_170 = arith.constant -1 : i32
    %582 = vector.broadcast %c-1_i32_170 : i32 to vector<1x32xi32>
    %583 = arith.addi %563, %582 : vector<1x32xi32>
    %c4_i32_171 = arith.constant 4 : i32
    %584 = vector.broadcast %c4_i32_171 : i32 to vector<1x32xi32>
    %585 = arith.cmpi slt, %583, %584 : vector<1x32xi32>
    %586 = arith.andi %581, %585 : vector<1x32xi1>
    %587 = arith.extui %586 : vector<1x32xi1> to vector<1x32xi32>
    %588 = arith.sitofp %587 : vector<1x32xi32> to vector<1x32xf32>
    %c-1_i32_172 = arith.constant -1 : i32
    %589 = vector.broadcast %c-1_i32_172 : i32 to vector<1x32xi32>
    %590 = arith.addi %567, %589 : vector<1x32xi32>
    %c0_i32_173 = arith.constant 0 : i32
    %591 = vector.broadcast %c0_i32_173 : i32 to vector<1x32xi32>
    %592 = arith.cmpi sge, %590, %591 : vector<1x32xi32>
    %c-1_i32_174 = arith.constant -1 : i32
    %593 = vector.broadcast %c-1_i32_174 : i32 to vector<1x32xi32>
    %594 = arith.addi %567, %593 : vector<1x32xi32>
    %c4_i32_175 = arith.constant 4 : i32
    %595 = vector.broadcast %c4_i32_175 : i32 to vector<1x32xi32>
    %596 = arith.cmpi slt, %594, %595 : vector<1x32xi32>
    %597 = arith.andi %592, %596 : vector<1x32xi1>
    %c0_i32_176 = arith.constant 0 : i32
    %598 = vector.broadcast %c0_i32_176 : i32 to vector<1x32xi32>
    %599 = arith.addi %563, %598 : vector<1x32xi32>
    %c0_i32_177 = arith.constant 0 : i32
    %600 = vector.broadcast %c0_i32_177 : i32 to vector<1x32xi32>
    %601 = arith.cmpi sge, %599, %600 : vector<1x32xi32>
    %602 = arith.andi %597, %601 : vector<1x32xi1>
    %c0_i32_178 = arith.constant 0 : i32
    %603 = vector.broadcast %c0_i32_178 : i32 to vector<1x32xi32>
    %604 = arith.addi %563, %603 : vector<1x32xi32>
    %c4_i32_179 = arith.constant 4 : i32
    %605 = vector.broadcast %c4_i32_179 : i32 to vector<1x32xi32>
    %606 = arith.cmpi slt, %604, %605 : vector<1x32xi32>
    %607 = arith.andi %602, %606 : vector<1x32xi1>
    %608 = arith.extui %607 : vector<1x32xi1> to vector<1x32xi32>
    %609 = arith.sitofp %608 : vector<1x32xi32> to vector<1x32xf32>
    %c-1_i32_180 = arith.constant -1 : i32
    %610 = vector.broadcast %c-1_i32_180 : i32 to vector<1x32xi32>
    %611 = arith.addi %567, %610 : vector<1x32xi32>
    %c0_i32_181 = arith.constant 0 : i32
    %612 = vector.broadcast %c0_i32_181 : i32 to vector<1x32xi32>
    %613 = arith.cmpi sge, %611, %612 : vector<1x32xi32>
    %c-1_i32_182 = arith.constant -1 : i32
    %614 = vector.broadcast %c-1_i32_182 : i32 to vector<1x32xi32>
    %615 = arith.addi %567, %614 : vector<1x32xi32>
    %c4_i32_183 = arith.constant 4 : i32
    %616 = vector.broadcast %c4_i32_183 : i32 to vector<1x32xi32>
    %617 = arith.cmpi slt, %615, %616 : vector<1x32xi32>
    %618 = arith.andi %613, %617 : vector<1x32xi1>
    %c1_i32_184 = arith.constant 1 : i32
    %619 = vector.broadcast %c1_i32_184 : i32 to vector<1x32xi32>
    %620 = arith.addi %563, %619 : vector<1x32xi32>
    %c0_i32_185 = arith.constant 0 : i32
    %621 = vector.broadcast %c0_i32_185 : i32 to vector<1x32xi32>
    %622 = arith.cmpi sge, %620, %621 : vector<1x32xi32>
    %623 = arith.andi %618, %622 : vector<1x32xi1>
    %c1_i32_186 = arith.constant 1 : i32
    %624 = vector.broadcast %c1_i32_186 : i32 to vector<1x32xi32>
    %625 = arith.addi %563, %624 : vector<1x32xi32>
    %c4_i32_187 = arith.constant 4 : i32
    %626 = vector.broadcast %c4_i32_187 : i32 to vector<1x32xi32>
    %627 = arith.cmpi slt, %625, %626 : vector<1x32xi32>
    %628 = arith.andi %623, %627 : vector<1x32xi1>
    %629 = arith.extui %628 : vector<1x32xi1> to vector<1x32xi32>
    %630 = arith.sitofp %629 : vector<1x32xi32> to vector<1x32xf32>
    %c0_i32_188 = arith.constant 0 : i32
    %631 = vector.broadcast %c0_i32_188 : i32 to vector<1x32xi32>
    %632 = arith.addi %567, %631 : vector<1x32xi32>
    %c0_i32_189 = arith.constant 0 : i32
    %633 = vector.broadcast %c0_i32_189 : i32 to vector<1x32xi32>
    %634 = arith.cmpi sge, %632, %633 : vector<1x32xi32>
    %c0_i32_190 = arith.constant 0 : i32
    %635 = vector.broadcast %c0_i32_190 : i32 to vector<1x32xi32>
    %636 = arith.addi %567, %635 : vector<1x32xi32>
    %c4_i32_191 = arith.constant 4 : i32
    %637 = vector.broadcast %c4_i32_191 : i32 to vector<1x32xi32>
    %638 = arith.cmpi slt, %636, %637 : vector<1x32xi32>
    %639 = arith.andi %634, %638 : vector<1x32xi1>
    %c-1_i32_192 = arith.constant -1 : i32
    %640 = vector.broadcast %c-1_i32_192 : i32 to vector<1x32xi32>
    %641 = arith.addi %563, %640 : vector<1x32xi32>
    %c0_i32_193 = arith.constant 0 : i32
    %642 = vector.broadcast %c0_i32_193 : i32 to vector<1x32xi32>
    %643 = arith.cmpi sge, %641, %642 : vector<1x32xi32>
    %644 = arith.andi %639, %643 : vector<1x32xi1>
    %c-1_i32_194 = arith.constant -1 : i32
    %645 = vector.broadcast %c-1_i32_194 : i32 to vector<1x32xi32>
    %646 = arith.addi %563, %645 : vector<1x32xi32>
    %c4_i32_195 = arith.constant 4 : i32
    %647 = vector.broadcast %c4_i32_195 : i32 to vector<1x32xi32>
    %648 = arith.cmpi slt, %646, %647 : vector<1x32xi32>
    %649 = arith.andi %644, %648 : vector<1x32xi1>
    %650 = arith.extui %649 : vector<1x32xi1> to vector<1x32xi32>
    %651 = arith.sitofp %650 : vector<1x32xi32> to vector<1x32xf32>
    %c0_i32_196 = arith.constant 0 : i32
    %652 = vector.broadcast %c0_i32_196 : i32 to vector<1x32xi32>
    %653 = arith.addi %567, %652 : vector<1x32xi32>
    %c0_i32_197 = arith.constant 0 : i32
    %654 = vector.broadcast %c0_i32_197 : i32 to vector<1x32xi32>
    %655 = arith.cmpi sge, %653, %654 : vector<1x32xi32>
    %c0_i32_198 = arith.constant 0 : i32
    %656 = vector.broadcast %c0_i32_198 : i32 to vector<1x32xi32>
    %657 = arith.addi %567, %656 : vector<1x32xi32>
    %c4_i32_199 = arith.constant 4 : i32
    %658 = vector.broadcast %c4_i32_199 : i32 to vector<1x32xi32>
    %659 = arith.cmpi slt, %657, %658 : vector<1x32xi32>
    %660 = arith.andi %655, %659 : vector<1x32xi1>
    %c1_i32_200 = arith.constant 1 : i32
    %661 = vector.broadcast %c1_i32_200 : i32 to vector<1x32xi32>
    %662 = arith.addi %563, %661 : vector<1x32xi32>
    %c0_i32_201 = arith.constant 0 : i32
    %663 = vector.broadcast %c0_i32_201 : i32 to vector<1x32xi32>
    %664 = arith.cmpi sge, %662, %663 : vector<1x32xi32>
    %665 = arith.andi %660, %664 : vector<1x32xi1>
    %c1_i32_202 = arith.constant 1 : i32
    %666 = vector.broadcast %c1_i32_202 : i32 to vector<1x32xi32>
    %667 = arith.addi %563, %666 : vector<1x32xi32>
    %c4_i32_203 = arith.constant 4 : i32
    %668 = vector.broadcast %c4_i32_203 : i32 to vector<1x32xi32>
    %669 = arith.cmpi slt, %667, %668 : vector<1x32xi32>
    %670 = arith.andi %665, %669 : vector<1x32xi1>
    %671 = arith.extui %670 : vector<1x32xi1> to vector<1x32xi32>
    %672 = arith.sitofp %671 : vector<1x32xi32> to vector<1x32xf32>
    %c1_i32_204 = arith.constant 1 : i32
    %673 = vector.broadcast %c1_i32_204 : i32 to vector<1x32xi32>
    %674 = arith.addi %567, %673 : vector<1x32xi32>
    %c0_i32_205 = arith.constant 0 : i32
    %675 = vector.broadcast %c0_i32_205 : i32 to vector<1x32xi32>
    %676 = arith.cmpi sge, %674, %675 : vector<1x32xi32>
    %c1_i32_206 = arith.constant 1 : i32
    %677 = vector.broadcast %c1_i32_206 : i32 to vector<1x32xi32>
    %678 = arith.addi %567, %677 : vector<1x32xi32>
    %c4_i32_207 = arith.constant 4 : i32
    %679 = vector.broadcast %c4_i32_207 : i32 to vector<1x32xi32>
    %680 = arith.cmpi slt, %678, %679 : vector<1x32xi32>
    %681 = arith.andi %676, %680 : vector<1x32xi1>
    %c-1_i32_208 = arith.constant -1 : i32
    %682 = vector.broadcast %c-1_i32_208 : i32 to vector<1x32xi32>
    %683 = arith.addi %563, %682 : vector<1x32xi32>
    %c0_i32_209 = arith.constant 0 : i32
    %684 = vector.broadcast %c0_i32_209 : i32 to vector<1x32xi32>
    %685 = arith.cmpi sge, %683, %684 : vector<1x32xi32>
    %686 = arith.andi %681, %685 : vector<1x32xi1>
    %c-1_i32_210 = arith.constant -1 : i32
    %687 = vector.broadcast %c-1_i32_210 : i32 to vector<1x32xi32>
    %688 = arith.addi %563, %687 : vector<1x32xi32>
    %c4_i32_211 = arith.constant 4 : i32
    %689 = vector.broadcast %c4_i32_211 : i32 to vector<1x32xi32>
    %690 = arith.cmpi slt, %688, %689 : vector<1x32xi32>
    %691 = arith.andi %686, %690 : vector<1x32xi1>
    %692 = arith.extui %691 : vector<1x32xi1> to vector<1x32xi32>
    %693 = arith.sitofp %692 : vector<1x32xi32> to vector<1x32xf32>
    %c1_i32_212 = arith.constant 1 : i32
    %694 = vector.broadcast %c1_i32_212 : i32 to vector<1x32xi32>
    %695 = arith.addi %567, %694 : vector<1x32xi32>
    %c0_i32_213 = arith.constant 0 : i32
    %696 = vector.broadcast %c0_i32_213 : i32 to vector<1x32xi32>
    %697 = arith.cmpi sge, %695, %696 : vector<1x32xi32>
    %c1_i32_214 = arith.constant 1 : i32
    %698 = vector.broadcast %c1_i32_214 : i32 to vector<1x32xi32>
    %699 = arith.addi %567, %698 : vector<1x32xi32>
    %c4_i32_215 = arith.constant 4 : i32
    %700 = vector.broadcast %c4_i32_215 : i32 to vector<1x32xi32>
    %701 = arith.cmpi slt, %699, %700 : vector<1x32xi32>
    %702 = arith.andi %697, %701 : vector<1x32xi1>
    %c0_i32_216 = arith.constant 0 : i32
    %703 = vector.broadcast %c0_i32_216 : i32 to vector<1x32xi32>
    %704 = arith.addi %563, %703 : vector<1x32xi32>
    %c0_i32_217 = arith.constant 0 : i32
    %705 = vector.broadcast %c0_i32_217 : i32 to vector<1x32xi32>
    %706 = arith.cmpi sge, %704, %705 : vector<1x32xi32>
    %707 = arith.andi %702, %706 : vector<1x32xi1>
    %c0_i32_218 = arith.constant 0 : i32
    %708 = vector.broadcast %c0_i32_218 : i32 to vector<1x32xi32>
    %709 = arith.addi %563, %708 : vector<1x32xi32>
    %c4_i32_219 = arith.constant 4 : i32
    %710 = vector.broadcast %c4_i32_219 : i32 to vector<1x32xi32>
    %711 = arith.cmpi slt, %709, %710 : vector<1x32xi32>
    %712 = arith.andi %707, %711 : vector<1x32xi1>
    %713 = arith.extui %712 : vector<1x32xi1> to vector<1x32xi32>
    %714 = arith.sitofp %713 : vector<1x32xi32> to vector<1x32xf32>
    %c1_i32_220 = arith.constant 1 : i32
    %715 = vector.broadcast %c1_i32_220 : i32 to vector<1x32xi32>
    %716 = arith.addi %567, %715 : vector<1x32xi32>
    %c0_i32_221 = arith.constant 0 : i32
    %717 = vector.broadcast %c0_i32_221 : i32 to vector<1x32xi32>
    %718 = arith.cmpi sge, %716, %717 : vector<1x32xi32>
    %c1_i32_222 = arith.constant 1 : i32
    %719 = vector.broadcast %c1_i32_222 : i32 to vector<1x32xi32>
    %720 = arith.addi %567, %719 : vector<1x32xi32>
    %c4_i32_223 = arith.constant 4 : i32
    %721 = vector.broadcast %c4_i32_223 : i32 to vector<1x32xi32>
    %722 = arith.cmpi slt, %720, %721 : vector<1x32xi32>
    %723 = arith.andi %718, %722 : vector<1x32xi1>
    %c1_i32_224 = arith.constant 1 : i32
    %724 = vector.broadcast %c1_i32_224 : i32 to vector<1x32xi32>
    %725 = arith.addi %563, %724 : vector<1x32xi32>
    %c0_i32_225 = arith.constant 0 : i32
    %726 = vector.broadcast %c0_i32_225 : i32 to vector<1x32xi32>
    %727 = arith.cmpi sge, %725, %726 : vector<1x32xi32>
    %728 = arith.andi %723, %727 : vector<1x32xi1>
    %c1_i32_226 = arith.constant 1 : i32
    %729 = vector.broadcast %c1_i32_226 : i32 to vector<1x32xi32>
    %730 = arith.addi %563, %729 : vector<1x32xi32>
    %c4_i32_227 = arith.constant 4 : i32
    %731 = vector.broadcast %c4_i32_227 : i32 to vector<1x32xi32>
    %732 = arith.cmpi slt, %730, %731 : vector<1x32xi32>
    %733 = arith.andi %728, %732 : vector<1x32xi1>
    %734 = arith.extui %733 : vector<1x32xi1> to vector<1x32xi32>
    %735 = arith.sitofp %734 : vector<1x32xi32> to vector<1x32xf32>
    %cst_228 = arith.constant 0.000000e+00 : f32
    %736 = vector.broadcast %cst_228 : f32 to vector<8x5xf32>
    %737 = tpu.concatenate %736, %560, %736 in 1 : vector<8x5xf32>, vector<8x32xf32>, vector<8x5xf32> -> vector<8x42xf32>
    %738 = vector.extract_strided_slice %737 {offsets = [0, 0], sizes = [8, 32], strides = [1, 1]} : vector<8x42xf32> to vector<8x32xf32>
    %739 = vector.broadcast %588 : vector<1x32xf32> to vector<8x32xf32>
    %740 = arith.mulf %738, %739 : vector<8x32xf32>
    %741 = vector.extract_strided_slice %737 {offsets = [0, 1], sizes = [8, 32], strides = [1, 1]} : vector<8x42xf32> to vector<8x32xf32>
    %742 = vector.broadcast %609 : vector<1x32xf32> to vector<8x32xf32>
    %743 = arith.mulf %741, %742 : vector<8x32xf32>
    %744 = vector.extract_strided_slice %737 {offsets = [0, 2], sizes = [8, 32], strides = [1, 1]} : vector<8x42xf32> to vector<8x32xf32>
    %745 = vector.broadcast %630 : vector<1x32xf32> to vector<8x32xf32>
    %746 = arith.mulf %744, %745 : vector<8x32xf32>
    %747 = vector.extract_strided_slice %737 {offsets = [0, 4], sizes = [8, 32], strides = [1, 1]} : vector<8x42xf32> to vector<8x32xf32>
    %748 = vector.broadcast %651 : vector<1x32xf32> to vector<8x32xf32>
    %749 = arith.mulf %747, %748 : vector<8x32xf32>
    %750 = vector.extract_strided_slice %737 {offsets = [0, 6], sizes = [8, 32], strides = [1, 1]} : vector<8x42xf32> to vector<8x32xf32>
    %751 = vector.broadcast %672 : vector<1x32xf32> to vector<8x32xf32>
    %752 = arith.mulf %750, %751 : vector<8x32xf32>
    %753 = vector.extract_strided_slice %737 {offsets = [0, 8], sizes = [8, 32], strides = [1, 1]} : vector<8x42xf32> to vector<8x32xf32>
    %754 = vector.broadcast %693 : vector<1x32xf32> to vector<8x32xf32>
    %755 = arith.mulf %753, %754 : vector<8x32xf32>
    %756 = vector.extract_strided_slice %737 {offsets = [0, 9], sizes = [8, 32], strides = [1, 1]} : vector<8x42xf32> to vector<8x32xf32>
    %757 = vector.broadcast %714 : vector<1x32xf32> to vector<8x32xf32>
    %758 = arith.mulf %756, %757 : vector<8x32xf32>
    %759 = vector.extract_strided_slice %737 {offsets = [0, 10], sizes = [8, 32], strides = [1, 1]} : vector<8x42xf32> to vector<8x32xf32>
    %760 = vector.broadcast %735 : vector<1x32xf32> to vector<8x32xf32>
    %761 = arith.mulf %759, %760 : vector<8x32xf32>
    %762 = tpu.concatenate %740, %743, %746, %749, %560, %752, %755, %758, %761 in 0 : vector<8x32xf32>, vector<8x32xf32>, vector<8x32xf32>, vector<8x32xf32>, vector<8x32xf32>, vector<8x32xf32>, vector<8x32xf32>, vector<8x32xf32>, vector<8x32xf32> -> vector<72x32xf32>
    %c0_229 = arith.constant 0 : index
    %c0_230 = arith.constant 0 : index
    %763 = vector.load %arg12[%c0_229, %c0_230] : memref<8x72xf32, #tpu.memory_space<vmem>>, vector<8x72xf32>
    %cst_231 = arith.constant dense<0.000000e+00> : vector<8x32xf32>
    %764 = tpu.matmul %763, %762, %cst_231 {dimension_numbers = #tpu.dot_dimension_numbers<[1], [0], [0], [1], [0, 0, 1, 1], [], []>} : vector<8x72xf32>, vector<72x32xf32>, vector<8x32xf32> -> vector<8x32xf32>
    %c0_232 = arith.constant 0 : index
    %c0_233 = arith.constant 0 : index
    %765 = vector.load %arg13[%c0_232, %c0_233] : memref<8x1xf32, #tpu.memory_space<vmem>>, vector<8x1xf32>
    %766 = vector.broadcast %765 : vector<8x1xf32> to vector<8x32xf32>
    %767 = arith.addf %764, %766 : vector<8x32xf32>
    %cst_234 = arith.constant 0.000000e+00 : f32
    %768 = vector.broadcast %cst_234 : f32 to vector<8x32xf32>
    %769 = arith.maximumf %767, %768 : vector<8x32xf32>
    %cst_235 = arith.constant 0.000000e+00 : f32
    %770 = vector.broadcast %cst_235 : f32 to vector<8x5xf32>
    %771 = tpu.concatenate %770, %769, %770 in 1 : vector<8x5xf32>, vector<8x32xf32>, vector<8x5xf32> -> vector<8x42xf32>
    %772 = vector.extract_strided_slice %771 {offsets = [0, 0], sizes = [8, 32], strides = [1, 1]} : vector<8x42xf32> to vector<8x32xf32>
    %773 = vector.broadcast %588 : vector<1x32xf32> to vector<8x32xf32>
    %774 = arith.mulf %772, %773 : vector<8x32xf32>
    %775 = vector.extract_strided_slice %771 {offsets = [0, 1], sizes = [8, 32], strides = [1, 1]} : vector<8x42xf32> to vector<8x32xf32>
    %776 = vector.broadcast %609 : vector<1x32xf32> to vector<8x32xf32>
    %777 = arith.mulf %775, %776 : vector<8x32xf32>
    %778 = vector.extract_strided_slice %771 {offsets = [0, 2], sizes = [8, 32], strides = [1, 1]} : vector<8x42xf32> to vector<8x32xf32>
    %779 = vector.broadcast %630 : vector<1x32xf32> to vector<8x32xf32>
    %780 = arith.mulf %778, %779 : vector<8x32xf32>
    %781 = vector.extract_strided_slice %771 {offsets = [0, 4], sizes = [8, 32], strides = [1, 1]} : vector<8x42xf32> to vector<8x32xf32>
    %782 = vector.broadcast %651 : vector<1x32xf32> to vector<8x32xf32>
    %783 = arith.mulf %781, %782 : vector<8x32xf32>
    %784 = vector.extract_strided_slice %771 {offsets = [0, 6], sizes = [8, 32], strides = [1, 1]} : vector<8x42xf32> to vector<8x32xf32>
    %785 = vector.broadcast %672 : vector<1x32xf32> to vector<8x32xf32>
    %786 = arith.mulf %784, %785 : vector<8x32xf32>
    %787 = vector.extract_strided_slice %771 {offsets = [0, 8], sizes = [8, 32], strides = [1, 1]} : vector<8x42xf32> to vector<8x32xf32>
    %788 = vector.broadcast %693 : vector<1x32xf32> to vector<8x32xf32>
    %789 = arith.mulf %787, %788 : vector<8x32xf32>
    %790 = vector.extract_strided_slice %771 {offsets = [0, 9], sizes = [8, 32], strides = [1, 1]} : vector<8x42xf32> to vector<8x32xf32>
    %791 = vector.broadcast %714 : vector<1x32xf32> to vector<8x32xf32>
    %792 = arith.mulf %790, %791 : vector<8x32xf32>
    %793 = vector.extract_strided_slice %771 {offsets = [0, 10], sizes = [8, 32], strides = [1, 1]} : vector<8x42xf32> to vector<8x32xf32>
    %794 = vector.broadcast %735 : vector<1x32xf32> to vector<8x32xf32>
    %795 = arith.mulf %793, %794 : vector<8x32xf32>
    %796 = tpu.concatenate %774, %777, %780, %783, %769, %786, %789, %792, %795 in 0 : vector<8x32xf32>, vector<8x32xf32>, vector<8x32xf32>, vector<8x32xf32>, vector<8x32xf32>, vector<8x32xf32>, vector<8x32xf32>, vector<8x32xf32>, vector<8x32xf32> -> vector<72x32xf32>
    %c0_236 = arith.constant 0 : index
    %c0_237 = arith.constant 0 : index
    %797 = vector.load %arg14[%c0_236, %c0_237] : memref<8x72xf32, #tpu.memory_space<vmem>>, vector<8x72xf32>
    %cst_238 = arith.constant dense<0.000000e+00> : vector<8x32xf32>
    %798 = tpu.matmul %797, %796, %cst_238 {dimension_numbers = #tpu.dot_dimension_numbers<[1], [0], [0], [1], [0, 0, 1, 1], [], []>} : vector<8x72xf32>, vector<72x32xf32>, vector<8x32xf32> -> vector<8x32xf32>
    %c0_239 = arith.constant 0 : index
    %c0_240 = arith.constant 0 : index
    %799 = vector.load %arg15[%c0_239, %c0_240] : memref<8x1xf32, #tpu.memory_space<vmem>>, vector<8x1xf32>
    %800 = vector.broadcast %799 : vector<8x1xf32> to vector<8x32xf32>
    %801 = arith.addf %798, %800 : vector<8x32xf32>
    %cst_241 = arith.constant 0.000000e+00 : f32
    %802 = vector.broadcast %cst_241 : f32 to vector<8x32xf32>
    %803 = arith.maximumf %801, %802 : vector<8x32xf32>
    %804 = arith.addf %560, %803 : vector<8x32xf32>
    %805 = vector.extract_strided_slice %804 {offsets = [0, 0], sizes = [1, 32], strides = [1, 1]} : vector<8x32xf32> to vector<1x32xf32>
    %806 = vector.extract_strided_slice %804 {offsets = [1, 0], sizes = [1, 32], strides = [1, 1]} : vector<8x32xf32> to vector<1x32xf32>
    %807 = vector.extract_strided_slice %804 {offsets = [2, 0], sizes = [1, 32], strides = [1, 1]} : vector<8x32xf32> to vector<1x32xf32>
    %808 = vector.extract_strided_slice %804 {offsets = [3, 0], sizes = [1, 32], strides = [1, 1]} : vector<8x32xf32> to vector<1x32xf32>
    %809 = vector.extract_strided_slice %804 {offsets = [4, 0], sizes = [1, 32], strides = [1, 1]} : vector<8x32xf32> to vector<1x32xf32>
    %810 = vector.extract_strided_slice %804 {offsets = [5, 0], sizes = [1, 32], strides = [1, 1]} : vector<8x32xf32> to vector<1x32xf32>
    %811 = vector.extract_strided_slice %804 {offsets = [6, 0], sizes = [1, 32], strides = [1, 1]} : vector<8x32xf32> to vector<1x32xf32>
    %812 = vector.extract_strided_slice %804 {offsets = [7, 0], sizes = [1, 32], strides = [1, 1]} : vector<8x32xf32> to vector<1x32xf32>
    %813 = tpu.concatenate %805, %806, %807, %808, %809, %810, %811, %812 in 1 : vector<1x32xf32>, vector<1x32xf32>, vector<1x32xf32>, vector<1x32xf32>, vector<1x32xf32>, vector<1x32xf32>, vector<1x32xf32>, vector<1x32xf32> -> vector<1x256xf32>
    %cst_242 = arith.constant 0.000000e+00 : f32
    %814 = vector.broadcast %cst_242 : f32 to vector<1x256xf32>
    %815 = arith.maximumf %813, %814 : vector<1x256xf32>
    %c0_243 = arith.constant 0 : index
    %c0_244 = arith.constant 0 : index
    %816 = vector.load %arg16[%c0_243, %c0_244] : memref<256x64xf32, #tpu.memory_space<vmem>>, vector<256x64xf32>
    %cst_245 = arith.constant dense<0.000000e+00> : vector<1x64xf32>
    %817 = tpu.matmul %815, %816, %cst_245 {dimension_numbers = #tpu.dot_dimension_numbers<[1], [0], [0], [1], [0, 0, 1, 1], [], []>} : vector<1x256xf32>, vector<256x64xf32>, vector<1x64xf32> -> vector<1x64xf32>
    %c0_246 = arith.constant 0 : index
    %c0_247 = arith.constant 0 : index
    %818 = vector.load %arg17[%c0_246, %c0_247] : memref<1x64xf32, #tpu.memory_space<vmem>>, vector<1x64xf32>
    %819 = arith.addf %817, %818 : vector<1x64xf32>
    %cst_248 = arith.constant 0.000000e+00 : f32
    %820 = vector.broadcast %cst_248 : f32 to vector<1x64xf32>
    %821 = arith.maximumf %819, %820 : vector<1x64xf32>
    %c0_249 = arith.constant 0 : index
    %c0_250 = arith.constant 0 : index
    %822 = vector.load %arg18[%c0_249, %c0_250] : memref<64x64xf32, #tpu.memory_space<vmem>>, vector<64x64xf32>
    %cst_251 = arith.constant dense<0.000000e+00> : vector<1x64xf32>
    %823 = tpu.matmul %821, %822, %cst_251 {dimension_numbers = #tpu.dot_dimension_numbers<[1], [0], [0], [1], [0, 0, 1, 1], [], []>} : vector<1x64xf32>, vector<64x64xf32>, vector<1x64xf32> -> vector<1x64xf32>
    %c0_252 = arith.constant 0 : index
    %c0_253 = arith.constant 0 : index
    %824 = vector.load %arg19[%c0_252, %c0_253] : memref<1x64xf32, #tpu.memory_space<vmem>>, vector<1x64xf32>
    %825 = arith.addf %823, %824 : vector<1x64xf32>
    %cst_254 = arith.constant 0.000000e+00 : f32
    %826 = vector.broadcast %cst_254 : f32 to vector<1x64xf32>
    %827 = arith.maximumf %825, %826 : vector<1x64xf32>
    %c0_255 = arith.constant 0 : index
    %c0_256 = arith.constant 0 : index
    %c0_257 = arith.constant 0 : index
    %828 = vector.load %arg20[%c0_255, %c0_256, %c0_257] : memref<1x1x64xf32, #tpu.memory_space<vmem>>, vector<1x1x64xf32>
    %829 = vector.shape_cast %828 : vector<1x1x64xf32> to vector<1x64xf32>
    %830 = vector.shape_cast %827 : vector<1x64xf32> to vector<1x1x64xf32>
    tpu.vector_store %arg20[%c0_255, %c0_256, %c0_257], %830 {strides = array<i32>} : memref<1x1x64xf32, #tpu.memory_space<vmem>>, vector<1x1x64xf32>,
    return
  }
  func.func @transform_0(%arg0: i32) -> (i32, i32, i32) {
    %c0_i32 = arith.constant 0 : i32
    %c0_i32_0 = arith.constant 0 : i32
    %c0_i32_1 = arith.constant 0 : i32
    return %arg0, %c0_i32, %c0_i32_0 : i32, i32, i32
  }
  func.func @transform_1(%arg0: i32) -> (i32, i32) {
    %c0_i32 = arith.constant 0 : i32
    %c0_i32_0 = arith.constant 0 : i32
    %c0_i32_1 = arith.constant 0 : i32
    return %c0_i32, %c0_i32_0 : i32, i32
  }
  func.func @transform_2(%arg0: i32) -> (i32, i32) {
    %c0_i32 = arith.constant 0 : i32
    %c0_i32_0 = arith.constant 0 : i32
    %c0_i32_1 = arith.constant 0 : i32
    return %c0_i32, %c0_i32_0 : i32, i32
  }
  func.func @transform_3(%arg0: i32) -> (i32, i32) {
    %c0_i32 = arith.constant 0 : i32
    %c0_i32_0 = arith.constant 0 : i32
    %c0_i32_1 = arith.constant 0 : i32
    return %c0_i32, %c0_i32_0 : i32, i32
  }
  func.func @transform_4(%arg0: i32) -> (i32, i32) {
    %c0_i32 = arith.constant 0 : i32
    %c0_i32_0 = arith.constant 0 : i32
    %c0_i32_1 = arith.constant 0 : i32
    return %c0_i32, %c0_i32_0 : i32, i32
  }
  func.func @transform_5(%arg0: i32) -> (i32, i32) {
    %c0_i32 = arith.constant 0 : i32
    %c0_i32_0 = arith.constant 0 : i32
    %c0_i32_1 = arith.constant 0 : i32
    return %c0_i32, %c0_i32_0 : i32, i32
  }
  func.func @transform_6(%arg0: i32) -> (i32, i32) {
    %c0_i32 = arith.constant 0 : i32
    %c0_i32_0 = arith.constant 0 : i32
    %c0_i32_1 = arith.constant 0 : i32
    return %c0_i32, %c0_i32_0 : i32, i32
  }
  func.func @transform_7(%arg0: i32) -> (i32, i32) {
    %c0_i32 = arith.constant 0 : i32
    %c0_i32_0 = arith.constant 0 : i32
    %c0_i32_1 = arith.constant 0 : i32
    return %c0_i32, %c0_i32_0 : i32, i32
  }
  func.func @transform_8(%arg0: i32) -> (i32, i32) {
    %c0_i32 = arith.constant 0 : i32
    %c0_i32_0 = arith.constant 0 : i32
    %c0_i32_1 = arith.constant 0 : i32
    return %c0_i32, %c0_i32_0 : i32, i32
  }
  func.func @transform_9(%arg0: i32) -> (i32, i32) {
    %c0_i32 = arith.constant 0 : i32
    %c0_i32_0 = arith.constant 0 : i32
    %c0_i32_1 = arith.constant 0 : i32
    return %c0_i32, %c0_i32_0 : i32, i32
  }
  func.func @transform_10(%arg0: i32) -> (i32, i32) {
    %c0_i32 = arith.constant 0 : i32
    %c0_i32_0 = arith.constant 0 : i32
    %c0_i32_1 = arith.constant 0 : i32
    return %c0_i32, %c0_i32_0 : i32, i32
  }
  func.func @transform_11(%arg0: i32) -> (i32, i32) {
    %c0_i32 = arith.constant 0 : i32
    %c0_i32_0 = arith.constant 0 : i32
    %c0_i32_1 = arith.constant 0 : i32
    return %c0_i32, %c0_i32_0 : i32, i32
  }
  func.func @transform_12(%arg0: i32) -> (i32, i32) {
    %c0_i32 = arith.constant 0 : i32
    %c0_i32_0 = arith.constant 0 : i32
    %c0_i32_1 = arith.constant 0 : i32
    return %c0_i32, %c0_i32_0 : i32, i32
  }
  func.func @transform_13(%arg0: i32) -> (i32, i32) {
    %c0_i32 = arith.constant 0 : i32
    %c0_i32_0 = arith.constant 0 : i32
    %c0_i32_1 = arith.constant 0 : i32
    return %c0_i32, %c0_i32_0 : i32, i32
  }
  func.func @transform_14(%arg0: i32) -> (i32, i32) {
    %c0_i32 = arith.constant 0 : i32
    %c0_i32_0 = arith.constant 0 : i32
    %c0_i32_1 = arith.constant 0 : i32
    return %c0_i32, %c0_i32_0 : i32, i32
  }
  func.func @transform_15(%arg0: i32) -> (i32, i32) {
    %c0_i32 = arith.constant 0 : i32
    %c0_i32_0 = arith.constant 0 : i32
    %c0_i32_1 = arith.constant 0 : i32
    return %c0_i32, %c0_i32_0 : i32, i32
  }
  func.func @transform_16(%arg0: i32) -> (i32, i32) {
    %c0_i32 = arith.constant 0 : i32
    %c0_i32_0 = arith.constant 0 : i32
    %c0_i32_1 = arith.constant 0 : i32
    return %c0_i32, %c0_i32_0 : i32, i32
  }
  func.func @transform_17(%arg0: i32) -> (i32, i32) {
    %c0_i32 = arith.constant 0 : i32
    %c0_i32_0 = arith.constant 0 : i32
    %c0_i32_1 = arith.constant 0 : i32
    return %c0_i32, %c0_i32_0 : i32, i32
  }
  func.func @transform_18(%arg0: i32) -> (i32, i32) {
    %c0_i32 = arith.constant 0 : i32
    %c0_i32_0 = arith.constant 0 : i32
    %c0_i32_1 = arith.constant 0 : i32
    return %c0_i32, %c0_i32_0 : i32, i32
  }
  func.func @transform_19(%arg0: i32) -> (i32, i32, i32) {
    %c0_i32 = arith.constant 0 : i32
    %c0_i32_0 = arith.constant 0 : i32
    %c0_i32_1 = arith.constant 0 : i32
    return %arg0, %c0_i32, %c0_i32_0 : i32, i32, i32
  }
}

</mosaic_0001>

<bundles_post_ra>
// kernel: img_obs_process.1
= control target key start
LH: loop header
LB: loop body
LE: loop exit
PB: predicated region body
PF: predicated region fallthrough
CT: control target
= control target key end

     0   :  { %s5934_s0 = inlined_call_operand.vmem [shape: f32[2,8,512], index: 0, kind: input, shape index: {}]   ;;  %s5935_s1 = inlined_call_operand.vmem [shape: f32[8,72], index: 1, kind: input, shape index: {}]   ;;  %s5936_s2 = inlined_call_operand.vmem [shape: f32[8,1], index: 2, kind: input, shape index: {}]   ;;  %s5937_s3 = inlined_call_operand.vmem [shape: f32[512,128], index: 3, kind: input, shape index: {}]   ;;  %s5938_s4 = inlined_call_operand.vmem [shape: f32[8,72], index: 4, kind: input, shape index: {}]   ;;  %s5939_s5 = inlined_call_operand.vmem [shape: f32[8,1], index: 5, kind: input, shape index: {}]   ;;  %s5940_s6 = inlined_call_operand.vmem [shape: f32[8,72], index: 6, kind: input, shape index: {}]   ;;  %s5941_s7 = inlined_call_operand.vmem [shape: f32[8,1], index: 7, kind: input, shape index: {}]   ;;  %s5942_s8 = inlined_call_operand.vmem [shape: f32[8,72], index: 8, kind: input, shape index: {}]   ;;  %s5943_s9 = inlined_call_operand.vmem [shape: f32[8,1], index: 9, kind: input, shape index: {}]   ;;  %s5944_s10 = inlined_call_operand.vmem [shape: f32[128,32], index: 10, kind: input, shape index: {}]   ;;  %s5945_s11 = inlined_call_operand.vmem [shape: f32[8,72], index: 11, kind: input, shape index: {}]   ;;  %s5946_s12 = inlined_call_operand.vmem [shape: f32[8,1], index: 12, kind: input, shape index: {}]   ;;  %s5947_s13 = inlined_call_operand.vmem [shape: f32[8,72], index: 13, kind: input, shape index: {}]   ;;  %s5948_s14 = inlined_call_operand.vmem [shape: f32[8,1], index: 14, kind: input, shape index: {}]   ;;  %s5949_s15 = inlined_call_operand.vmem [shape: f32[256,64], index: 15, kind: input, shape index: {}]   ;;  %s5950_s16 = inlined_call_operand.vmem [shape: f32[1,64], index: 16, kind: input, shape index: {}]   ;;  %s5951_s17 = inlined_call_operand.vmem [shape: f32[64,64], index: 17, kind: input, shape index: {}]   ;;  %s5952_s18 = inlined_call_operand.vmem [shape: f32[1,64], index: 18, kind: input, shape index: {}]   ;;  %s5953_s19 = inlined_call_operand.vmem [shape: f32[2,1,64], index: 19, kind: output, shape index: {}]  }
   0x1   :  { %6013 = sst [smem:[#allocation16_spill]] %s5934_s0  ;;  %s4303_s0 = smov 0  }
   0x2   :  { %6014 = sst [smem:[#allocation17_spill]] %s5935_s1 }
   0x3   :  { %6015 = sst [smem:[#allocation18_spill]] %s5936_s2 }
   0x4   :  { %6016 = sst [smem:[#allocation19_spill]] %s5937_s3 }
   0x5   :  { %6017 = sst [smem:[#allocation20_spill]] %s5950_s16 }
   0x6   :  { %6018 = sst [smem:[#allocation21_spill]] %s5952_s18 }
   0x7   :  { %6019 = sst [smem:[#allocation22_spill]] %s5953_s19 }
   0x8 LB: > { %6020 = sst [smem:[#allocation2_spill]] %s4169_s0  ;;  %s3151_s30 = sadd.s32 4294967295, %s4169_s0   ;;  %s4169_s0 = sphi %s4303_s0, %s29_s0  }
   0x9   : > { %p3155_p0 = scmp.ge.s32.totalorder %s4169_s0, 1  ;;  %p537_p1 = scmp.lt.s32.totalorder %s4169_s0, 3 }
   0xb   : > { %p538_p2 = pnand %p3155_p0, %p537_p1 }
   0xd   : > { %541 = sbr.rel (%p538_p2) target bundleno = 4434 (0x1152), region = 96 }
  0x14   : > { %p591_p3 = scmp.lt.s32.totalorder %s3151_s30, 1  ;;  %v603_v0 = vlaneseq  ;;  %v5972_v1 = vmov 0.0   ;;  %s6023_s22 = sld [smem:[#allocation16_spill]] }
  0x15   : > { %1276 = vmatprep.mubr.f32.mxu0 %v5972_v1  ;;  %1347 = vmatprep.mubr.f32.mxu1 %v5972_v1  ;;  %s5997_s23 = smov 17   ;;  %s5982_s24 = smov 16  }
  0x16   : > { %s6138_s30 = smov (!%p591_p3, %s3151_s30), 1  ;;  %v4315_v2 = vand.u32 127, %v603_v0  ;;  %s5983_s25 = smov 1  }
  0x17   : > { %6021 = sst [smem:[#allocation3_spill]] %s6138_s30  ;;  %s3216_s20 = sshll.u32 %s6138_s30, 5 }
  0x18   : > { %6022 = vst [vmem:[#allocation4_spill] sm:$0xff] %v4315_v2  ;;  %v606_v3 = vadd.s32 256, %v4315_v2  ;;  %v607_v4 = vadd.s32 384, %v4315_v2  ;;  %v4321_v5 = vadd.s32 128, %v4315_v2  ;;  %v612_v6 = vshra.s32 %v4315_v2, 4  ;;  %s5964_s3 = smov 2  }
  0x19   : > { %v608_v12 = vand.u32 15, %v4315_v2  ;;  %s5966_s26 = smov 18   ;;  %s5963_s27 = smov 32  }
  0x1a   : > { %s595_s2 = scalar_lea.vmem %s6023_s22, %s3216_s20  ;;  %v610_v9 = vand.u32 15, %v606_v3  ;;  %v611_v10 = vand.u32 15, %v607_v4  ;;  %v614_v11 = vshra.s32 %v606_v3, 4  ;;  %v615_v13 = vshra.s32 %v607_v4, 4  ;;  %s4178_s28 = smov 33  }
  0x1b   : > { %v4327_v7 = vld [vmem:[%s595_s2] sm:$0xff]  ;;  %v4329_v8 = vld [vmem:[%s595_s2 + $0x10] sm:$0xff]  ;;  %v609_v14 = vand.u32 15, %v4321_v5  ;;  %v613_v15 = vshra.s32 %v4321_v5, 4  ;;  %v4338_v16 = vld [vmem:[%s595_s2 + $0x8] sm:$0xff]  ;;  %v4348_v21 = vand.u32 15, %v612_v6 }
  0x1c   : > { %828 = vrot.lane.b32.xlu0 %v4327_v7, %s5997_s23  ;;  %832 = vrot.lane.b32.xlu1 %v4329_v8, %s5997_s23  ;;  %v4340_v17 = vld [vmem:[%s595_s2 + $0x18] sm:$0xff]  ;;  %v4342_v18 = vand.u32 15, %v614_v11  ;;  %v4344_v19 = vadd.s32 4294967295, %v610_v9  ;;  %v4346_v20 = vadd.s32 4294967295, %v611_v10  ;;  %v4350_v22 = vand.u32 15, %v615_v13  ;;  %s4179_s29 = smov 34  }
  0x1d   : > { %v4352_v23 = vand.u32 15, %v613_v15  ;;  %v4357_v24 = vadd.s32 4294967295, %v608_v12  ;;  %v4370_v26 = vadd.s32 4294967295, %v609_v14  ;;  %vm716_vm8 = vcmp.ge.s32.totalorder %v4348_v21, 0  ;;  %s5991_s20 = smov 112   ;;  %s5995_s21 = smov 127  }
  0x1e   : > { %vm5957_vm0 = vcmp.ge.s32.totalorder %v4344_v19, 0  ;;  %vm718_vm1 = vcmp.ge.s32.totalorder %v4342_v18, 0  ;;  %vm722_vm2 = vcmp.lt.s32.totalorder %v4342_v18, 16  ;;  %vm5956_vm3 = vcmp.ge.s32.totalorder %v4346_v20, 0  ;;  %s5993_s1 = smov 110   ;;  %s5998_s22 = smov 126  }
  0x1f   : > { %vm719_vm4 = vcmp.ge.s32.totalorder %v4350_v22, 0  ;;  %vm723_vm5 = vcmp.lt.s32.totalorder %v4350_v22, 16  ;;  %vm4366_vm6 = vmand %vm718_vm1, %vm722_vm2  ;;  %vm720_vm9 = vcmp.lt.s32.totalorder %v4348_v21, 16  ;;  %v622_v28 = vadd.s32 4294967295, %v4342_v18  ;;  %s5987_s2 = smov 96   ;;  %s6087_s16 = smov 126  }
  0x20   : > { %830 = vrot.lane.b32.xlu0 %v4338_v16, %s5997_s23  ;;  %834 = vrot.lane.b32.xlu1 %v4340_v17, %s5997_s23  ;;  %vm4372_vm7 = vmand %vm719_vm4, %vm723_vm5  ;;  %vm717_vm11 = vcmp.ge.s32.totalorder %v4352_v23, 0  ;;  %vm721_vm12 = vcmp.lt.s32.totalorder %v4352_v23, 16  ;;  %v623_v29 = vadd.s32 4294967295, %v4350_v22  ;;  %vm5955_vm14 = vcmp.ge.s32.totalorder %v4357_v24, 0  ;;  %s6109_s0 = smov 16   ;;  %s6111_s19 = smov 2  }
  0x21   : > { %vm730_vm10 = vmand %vm4366_vm6, %vm5957_vm0  ;;  %v620_v31 = vadd.s32 4294967295, %v4348_v21  ;;  %vm5958_vm15 = vcmp.ge.s32.totalorder %v4370_v26, 0  ;;  %v621_v34 = vadd.s32 4294967295, %v4352_v23  ;;  %vm626_vm4 = vcmp.ge.s32.totalorder %v622_v28, 0  ;;  %s4193_s18 = smov 118   ;;  %s6004_s30 = smov 111  }
  0x22   : > { %vm731_vm13 = vmand %vm4372_vm7, %vm5956_vm3  ;;  %v3172_v30 = vsel %vm730_vm10, 1.0, %v5972_v1  ;;  %vm630_vm5 = vcmp.lt.s32.totalorder %v622_v28, 16  ;;  %v4404_v37 = vadd.s32 1, %v610_v9  ;;  %v4410_v38 = vadd.s32 1, %v611_v10 }
  0x23   : > { %v3173_v32 = vsel %vm731_vm13, 1.0, %v5972_v1  ;;  %vm4395_vm1 = vmand %vm716_vm8, %vm720_vm9  ;;  %vm627_vm8 = vcmp.ge.s32.totalorder %v623_v29, 0  ;;  %vm631_vm9 = vcmp.lt.s32.totalorder %v623_v29, 16  ;;  %vm628_vm13 = vcmp.lt.s32.totalorder %v620_v31, 16 }
  0x24   : > { %v3826_v35 = vpack.i.bf16 %v3173_v32, %v3172_v30  ;;  %vm4400_vm2 = vmand %vm717_vm11, %vm721_vm12  ;;  %vm624_vm12 = vcmp.ge.s32.totalorder %v620_v31, 0  ;;  %v4418_v40 = vadd.s32 1, %v608_v12  ;;  %vm625_vm3 = vcmp.ge.s32.totalorder %v621_v34, 0 }
  0x25   : > { %vm728_vm10 = vmand %vm4395_vm1, %vm5955_vm14  ;;  %vm629_vm0 = vcmp.lt.s32.totalorder %v621_v34, 16  ;;  %v4426_v43 = vadd.s32 1, %v609_v14  ;;  %v762_v55 = vadd.s32 1, %v4342_v18  ;;  %v763_v57 = vadd.s32 1, %v4350_v22 }
  0x26   : > { %3827 = vrot.lane.b32.xlu1 %v3826_v35, %s5982_s24  ;;  %vm729_vm11 = vmand %vm4400_vm2, %vm5958_vm15  ;;  %v3170_v39 = vsel %vm728_vm10, 1.0, %v5972_v1  ;;  %vm5962_vm10 = vcmp.lt.s32.totalorder %v4410_v38, 16  ;;  %v760_v61 = vadd.s32 1, %v4348_v21  ;;  %v761_v3 = vadd.s32 1, %v4352_v23 }
  0x27   : > { %v3171_v41 = vsel %vm729_vm11, 1.0, %v5972_v1  ;;  %vm4422_vm14 = vmand %vm626_vm4, %vm630_vm5  ;;  %vm5959_vm4 = vcmp.lt.s32.totalorder %v4404_v37, 16 }
  0x28   : > { %v3821_v44 = vpack.i.bf16 %v3171_v41, %v3170_v39  ;;  %vm4430_vm15 = vmand %vm627_vm8, %vm631_vm9  ;;  %v3164_v46 = vsel %vm4422_vm14, 1.0, %v5972_v1  ;;  %vm5961_vm9 = vcmp.lt.s32.totalorder %v4418_v40, 16 }
  0x29   : > { %v3165_v47 = vsel %vm4430_vm15, 1.0, %v5972_v1  ;;  %vm4441_vm5 = vmand %vm624_vm12, %vm628_vm13 }
  0x2a   : > { %3822 = vrot.lane.b32.xlu0 %v3821_v44, %s5982_s24  ;;  %v3836_v49 = vpack.i.bf16 %v3165_v47, %v3164_v46  ;;  %vm4447_vm8 = vmand %vm625_vm3, %vm629_vm0  ;;  %v3162_v51 = vsel %vm4441_vm5, 1.0, %v5972_v1  ;;  %vm5960_vm0 = vcmp.lt.s32.totalorder %v4426_v43, 16  ;;  %s6083_s24 = smov 110  }
  0x2b   : > { %v3163_v52 = vsel %vm4447_vm8, 1.0, %v5972_v1  ;;  %vm706_vm11 = vmand %vm4422_vm14, %vm5959_vm4 }
  0x2c   : > { %3837 = vrot.lane.b32.xlu1 %v3836_v49, %s5983_s25  ;;  %v3831_v53 = vpack.i.bf16 %v3163_v52, %v3162_v51  ;;  %vm707_vm3 = vmand %vm4430_vm15, %vm5962_vm10  ;;  %v3168_v54 = vsel %vm706_vm11, 1.0, %v5972_v1 }
  0x2d   : > { %v3169_v56 = vsel %vm707_vm3, 1.0, %v5972_v1  ;;  %vm704_vm12 = vmand %vm4441_vm5, %vm5961_vm9 }
  0x2e   : > { %3832 = vrot.lane.b32.xlu0 %v3831_v53, %s5983_s25  ;;  %v3851_v58 = vpack.i.bf16 %v3169_v56, %v3168_v54  ;;  %vm705_vm13 = vmand %vm4447_vm8, %vm5960_vm0  ;;  %v3166_v59 = vsel %vm704_vm12, 1.0, %v5972_v1  ;;  %vm766_vm12 = vcmp.ge.s32.totalorder %v762_v55, 0  ;;  %vm771_vm0 = vcmp.lt.s32.totalorder %v763_v57, 16  ;;  %s6084_s25 = smov 112  }
  0x2f   : > { %v3167_v60 = vsel %vm705_vm13, 1.0, %v5972_v1  ;;  %vm750_vm11 = vmand %vm4366_vm6, %vm5959_vm4  ;;  %vm770_vm13 = vcmp.lt.s32.totalorder %v762_v55, 16  ;;  %vm767_vm4 = vcmp.ge.s32.totalorder %v763_v57, 0 }
  0x30   : > { %3852 = vrot.lane.b32.xlu1 %v3851_v58, %s5964_s3  ;;  %v3841_v62 = vpack.i.bf16 %v3167_v60, %v3166_v59  ;;  %vm751_vm3 = vmand %vm4372_vm7, %vm5962_vm10  ;;  %v3176_v63 = vsel %vm750_vm11, 1.0, %v5972_v1  ;;  %vm6040_vm7 = vcmp.lt.s32.totalorder %v4426_v43, 16  ;;  %vm768_vm10 = vcmp.lt.s32.totalorder %v760_v61, 16 }
  0x31   : > { %v3177_v0 = vsel %vm751_vm3, 1.0, %v5972_v1  ;;  %vm748_vm6 = vmand %vm4395_vm1, %vm5961_vm9  ;;  %vm764_vm9 = vcmp.ge.s32.totalorder %v760_v61, 0 }
  0x32   : > { %3842 = vrot.lane.b32.xlu0 %v3841_v62, %s5964_s3  ;;  %v3856_v4 = vpack.i.bf16 %v3177_v0, %v3176_v63  ;;  %vm749_vm11 = vmand %vm4400_vm2, %vm6040_vm7  ;;  %v3174_v5 = vsel %vm748_vm6, 1.0, %v5972_v1  ;;  %vm6045_vm2 = vcmp.ge.s32.totalorder %v4344_v19, 0  ;;  %vm765_vm7 = vcmp.ge.s32.totalorder %v761_v3, 0  ;;  %s6003_s3 = smov 8  }
  0x33   : > { %v3175_v6 = vsel %vm749_vm11, 1.0, %v5972_v1  ;;  %vm4507_vm3 = vmand %vm766_vm12, %vm770_vm13  ;;  %vm769_vm12 = vcmp.lt.s32.totalorder %v761_v3, 16  ;;  %vm6046_vm13 = vcmp.ge.s32.totalorder %v4346_v20, 0 }
  0x34   : > { %3857 = vrot.lane.b32.xlu1 %v3856_v4, %s5966_s26  ;;  %v3846_v10 = vpack.i.bf16 %v3175_v6, %v3174_v5  ;;  %vm4512_vm1 = vmand %vm767_vm4, %vm771_vm0  ;;  %v3184_v15 = vsel %vm4507_vm3, 1.0, %v5972_v1 }
  0x35   : > { %vm778_vm6 = vmand %vm4507_vm3, %vm6045_vm2  ;;  %v3185_v18 = vsel %vm4512_vm1, 1.0, %v5972_v1  ;;  %vm6051_vm2 = vcmp.ge.s32.totalorder %v4357_v24, 0 }
  0x36   : > { %3847 = vrot.lane.b32.xlu0 %v3846_v10, %s5966_s26  ;;  %vm779_vm11 = vmand %vm4512_vm1, %vm6046_vm13  ;;  %v3180_v12 = vsel %vm778_vm6, 1.0, %v5972_v1  ;;  %v3876_v25 = vpack.i.bf16 %v3185_v18, %v3184_v15  ;;  %vm6054_vm13 = vcmp.lt.s32.totalorder %v4410_v38, 16  ;;  %s6075_s26 = sld [smem:[#allocation18_spill]] }
  0x37   : > { %v3181_v13 = vsel %vm779_vm11, 1.0, %v5972_v1  ;;  %vm4527_vm4 = vmand %vm764_vm9, %vm768_vm10  ;;  %vm6052_vm9 = vcmp.ge.s32.totalorder %v4370_v26, 0 }
  0x38   : > { %v3866_v21 = vpack.i.bf16 %v3181_v13, %v3180_v12  ;;  %vm4537_vm0 = vmand %vm765_vm7, %vm769_vm12  ;;  %v3182_v28 = vsel %vm4527_vm4, 1.0, %v5972_v1  ;;  %vm6053_vm7 = vcmp.lt.s32.totalorder %v4404_v37, 16 }
  0x39   : > { %vm776_vm10 = vmand %vm4527_vm4, %vm6051_vm2  ;;  %v3183_v29 = vsel %vm4537_vm0, 1.0, %v5972_v1  ;;  %vm6055_vm2 = vcmp.lt.s32.totalorder %v4418_v40, 16 }
  0x3a   : > { %3867 = vrot.lane.b32.xlu1 %v3866_v21, %s5963_s27  ;;  %vm777_vm6 = vmand %vm4537_vm0, %vm6052_vm9  ;;  %v3178_v23 = vsel %vm776_vm10, 1.0, %v5972_v1  ;;  %v3871_v33 = vpack.i.bf16 %v3183_v29, %v3182_v28 }
  0x3b   : > { %v3179_v27 = vsel %vm777_vm6, 1.0, %v5972_v1  ;;  %vm814_vm12 = vmand %vm4507_vm3, %vm6053_vm7  ;;  %vm6056_vm3 = vcmp.lt.s32.totalorder %v4426_v43, 16  ;;  %vm6059_vm6 = vcmp.ge.s32.totalorder %v4346_v20, 0 }
  0x3c   : > { %v3861_v30 = vpack.i.bf16 %v3179_v27, %v3178_v23  ;;  %vm815_vm11 = vmand %vm4512_vm1, %vm6054_vm13  ;;  %v3188_v31 = vsel %vm814_vm12, 1.0, %v5972_v1  ;;  %vm941_vm13 = vcmask 146432  }
  0x3d   : > { %v3189_v32 = vsel %vm815_vm11, 1.0, %v5972_v1  ;;  %vm812_vm10 = vmand %vm4527_vm4, %vm6055_vm2  ;;  %vm863_vm11 = vcmask 7168   ;;  %vm993_vm2 = vcmask 269312  }
  0x3e   : > { %3862 = vrot.lane.b32.xlu0 %v3861_v30, %s5963_s27  ;;  %3877 = vrot.lane.b32.xlu1 %v3876_v25, %s4178_s28  ;;  %v3886_v34 = vpack.i.bf16 %v3189_v32, %v3188_v31  ;;  %vm813_vm1 = vmand %vm4537_vm0, %vm6056_vm3  ;;  %v3186_v35 = vsel %vm812_vm10, 1.0, %v5972_v1  ;;  %vm6062_vm0 = vcmp.ge.s32.totalorder %v4357_v24, 0  ;;  %vm889_vm10 = vcmask 15360   ;;  %s6080_s27 = sld [smem:[#allocation17_spill]] }
  0x3f   : > { %v3187_v36 = vsel %vm813_vm1, 1.0, %v5972_v1  ;;  %vm4583_vm4 = vmand %vm4447_vm8, %vm6052_vm9  ;;  %vm6065_vm8 = vcmp.ge.s32.totalorder %v4344_v19, 0  ;;  %vm6009_vm3 = vcmask 261120   ;;  %vm1019_vm1 = vcmask 277504  }
  0x40   : > { %vm4591_vm7 = vmand %vm4430_vm15, %vm6059_vm6  ;;  %v3881_v39 = vpack.i.bf16 %v3187_v36, %v3186_v35  ;;  %vm1048_vm9 = vcmask 1039360   ;;  %vm1072_vm6 = vcmask 1031168  }
  0x41   : > { %vm4599_vm12 = vmand %vm4441_vm5, %vm6062_vm0  ;;  %vm836_vm5 = vcmask 138240   ;;  %vm1168_vm0 = vcmask 777216  }
  0x42   : > { %3872 = vrot.lane.b32.xlu0 %v3871_v33, %s4178_s28  ;;  %3887 = vrot.lane.b32.xlu1 %v3886_v34, %s4179_s29  ;;  %vm4607_vm15 = vmand %vm4422_vm14, %vm6065_vm8  ;;  %vm915_vm14 = vcmask 130048   ;;  %s5989_s28 = smov 95   ;;  %vm1192_vm8 = vcmask 769024  }
  0x43   : > { %v4878_v38 = vsel %vm4607_vm15, 1.0, %v5972_v1  ;;  %vm6010_vm15 = vcmask 588800  }
  0x44   : > { %6079 = vst [vmem:[#allocation15_spill] sm:$0xff] %v4878_v38 }
  0x46   : > { %3882 = vrot.lane.b32.xlu0 %v3881_v39, %s4179_s29  ;;  %s5985_s29 = smov 94  }
  0x8e   : > { %v833_v24 = vpop.permute.xlu1 %832  ;;  %v829_v40 = vpop.permute.xlu0 %828 }
  0x8f   : > { %v4614_v47 = vsel %vm836_vm5, 0.0, %v829_v40 }
  0x92   : > { %v835_v41 = vpop.permute.xlu1 %834  ;;  %v831_v43 = vpop.permute.xlu0 %830 }
  0x93   : > { %v4652_v4 = vsel %vm836_vm5, %v829_v40, %v831_v43  ;;  %v4655_v5 = vsel %vm836_vm5, %v831_v43, %v833_v24  ;;  %v4658_v6 = vsel %vm836_vm5, %v833_v24, %v835_v41  ;;  %v4662_v9 = vsel %vm836_vm5, %v835_v41, 0.0 }
  0x94   : > { %v849_v20 = vmul.f32 %v4878_v38, %v4655_v5 }
  0x98   : > { %v3828_v44 = vpop.permute.xlu1 %3827 }
  0x99   : > { %v3829_v54 = vunpack.i.l.bf16 %v3828_v44  ;;  %v4635_v58 = vunpack.i.h.bf16 %v3828_v44 }
  0x9b   : > { %v4670_v12 = vsel %vm915_vm14, %v3829_v54, %v4635_v58  ;;  %v928_v29 = vmul.f32 %v4635_v58, %v4662_v9 }
  0x9c   : > { %v3823_v45 = vpop.permute.xlu0 %3822  ;;  %v927_v28 = vmul.f32 %v4670_v12, %v4658_v6 }
  0x9d   : > { %v4611_v46 = vunpack.i.l.bf16 %v3823_v45  ;;  %v3825_v55 = vunpack.i.h.bf16 %v3823_v45 }
  0x9e   : > { %v4616_v19 = vpop.permute.xlu1 %3837  ;;  %v3896_v41 = vpack.i.bf16 %v928_v29, %v927_v28 }
  0x9f   : > { %v924_v42 = vmul.f32 %v4611_v46, %v4614_v47  ;;  %v4646_v0 = vsel %vm915_vm14, %v4611_v46, %v3825_v55  ;;  %v4649_v3 = vsel %vm915_vm14, %v3825_v55, %v3829_v54  ;;  %v4665_v10 = vunpack.i.h.bf16 %v4616_v19 }
  0xa0   : > { %v4620_v48 = vpop.permute.xlu0 %3832  ;;  %v3839_v11 = vunpack.i.l.bf16 %v4616_v19  ;;  %v925_v14 = vmul.f32 %v4646_v0, %v4652_v4  ;;  %v926_v15 = vmul.f32 %v4649_v3, %v4655_v5 }
  0xa1   : > { %v4623_v49 = vunpack.i.l.bf16 %v4620_v48  ;;  %1086 = vrot.lane.b32.xlu0 %v924_v42, %s5991_s20  ;;  %v3835_v30 = vunpack.i.h.bf16 %v4620_v48  ;;  %v876_v19 = vmul.f32 %v4665_v10, %v4662_v9 }
  0xa2   : > { %v4626_v50 = vpop.permute.xlu1 %3852  ;;  %v4700_v31 = vsel %vm863_vm11, %v3839_v11, %v4665_v10  ;;  %v3891_v33 = vpack.i.bf16 %v926_v15, %v925_v14 }
  0xa3   : > { %v872_v51 = vmul.f32 %v4623_v49, %v4614_v47  ;;  %v4718_v43 = vsel %vm863_vm11, %v4623_v49, %v3835_v30  ;;  %v4721_v44 = vsel %vm863_vm11, %v3835_v30, %v3839_v11  ;;  %v875_v45 = vmul.f32 %v4700_v31, %v4658_v6 }
  0xa4   : > { %v4630_v52 = vpop.permute.xlu0 %3842  ;;  %v3854_v54 = vunpack.i.l.bf16 %v4626_v50 }
  0xa5   : > { %1038 = vrot.lane.b32.xlu0 %v872_v51, %s5995_s21  ;;  %v4638_v59 = vunpack.i.l.bf16 %v4630_v52  ;;  %v3845_v42 = vunpack.i.h.bf16 %v4630_v52  ;;  %v4742_v52 = vunpack.i.h.bf16 %v4626_v50  ;;  %v3916_v11 = vpack.i.bf16 %v876_v19, %v875_v45 }
  0xa6   : > { %v3858_v53 = vpop.permute.xlu1 %3857 }
  0xa7   : > { %v3859_v61 = vunpack.i.l.bf16 %v3858_v53  ;;  %v898_v13 = vmul.f32 %v4638_v59, %v4614_v47  ;;  %v4678_v18 = vunpack.i.h.bf16 %v3858_v53  ;;  %v4764_v29 = vsel %vm889_vm10, %v3845_v42, %v3854_v54 }
  0xa8   : > { %v3848_v56 = vpop.permute.xlu0 %3847 }
  0xa9   : > { %v4633_v57 = vunpack.i.l.bf16 %v3848_v56  ;;  %v3850_v62 = vunpack.i.h.bf16 %v3848_v56  ;;  %v4712_v24 = vsel %vm941_vm13, %v3859_v61, %v4678_v18  ;;  %v954_v51 = vmul.f32 %v4678_v18, %v4662_v9 }
  0xaa   : > { %v953_v48 = vmul.f32 %v4712_v24, %v4658_v6 }
  0xab   : > { %v950_v60 = vmul.f32 %v4633_v57, %v4614_v47  ;;  %v4684_v22 = vsel %vm941_vm13, %v4633_v57, %v3850_v62  ;;  %v4687_v23 = vsel %vm941_vm13, %v3850_v62, %v3859_v61  ;;  %v873_v61 = vmul.f32 %v4718_v43, %v4652_v4 }
  0xac   : > { %v4642_v63 = vpop.permute.xlu1 %3867  ;;  %v951_v34 = vmul.f32 %v4684_v22, %v4652_v4  ;;  %v952_v35 = vmul.f32 %v4687_v23, %v4655_v5  ;;  %v874_v62 = vmul.f32 %v4721_v44, %v4655_v5 }
  0xad   : > { %1110 = vrot.lane.b32.xlu1 %v950_v60, %s5993_s1  ;;  %v3869_v45 = vunpack.i.l.bf16 %v4642_v63 }
  0xae   : > { %v3901_v53 = vpack.i.bf16 %v952_v35, %v951_v34  ;;  %v3911_v30 = vpack.i.bf16 %v874_v62, %v873_v61 }
  0xb0   : > { %v4680_v21 = vpop.permute.xlu0 %3862  ;;  %v3878_v27 = vpop.permute.xlu1 %3877 }
  0xb1   : > { %v4690_v25 = vunpack.i.l.bf16 %v4680_v21  ;;  %1062 = vrot.lane.b32.xlu1 %v898_v13, %s5998_s22  ;;  %v4708_v36 = vunpack.i.h.bf16 %v3878_v27  ;;  %v3879_v39 = vunpack.i.l.bf16 %v3878_v27  ;;  %v3906_v13 = vpack.i.bf16 %v954_v51, %v953_v48 }
  0xb2   : > { %v4754_v27 = vsel %vm889_vm10, %v4638_v59, %v3845_v42  ;;  %v3865_v19 = vunpack.i.h.bf16 %v4680_v21  ;;  %v902_v48 = vmul.f32 %v4742_v52, %v4662_v9 }
  0xb3   : > { %v976_v32 = vmul.f32 %v4690_v25, %v4614_v47  ;;  %6068 = vst [vmem:[#allocation5_spill] sm:$0xff] %v4708_v36  ;;  %v4737_v60 = vsel %vm993_vm2, %v3879_v39, %v4708_v36  ;;  %v1006_v15 = vmul.f32 %v4708_v36, %v4662_v9 }
  0xb4   : > { %v3873_v40 = vpop.permute.xlu0 %3872  ;;  %v1005_v14 = vmul.f32 %v4737_v60, %v4658_v6 }
  0xb5   : > { %1134 = vrot.lane.b32.xlu0 %v976_v32, %s5987_s2  ;;  %3892 = vrot.lane.b32.xlu1 %v3891_v33, %s5991_s20  ;;  %v3875_v55 = vunpack.i.h.bf16 %v3873_v40  ;;  %v4733_v56 = vunpack.i.l.bf16 %v3873_v40  ;;  %v4770_v32 = vsel %vm889_vm10, %v3854_v54, %v4742_v52  ;;  %v899_v33 = vmul.f32 %v4754_v27, %v4652_v4 }
  0xb6   : > { %v900_v40 = vmul.f32 %v4764_v29, %v4655_v5  ;;  %v901_v42 = vmul.f32 %v4770_v32, %v4658_v6  ;;  %v4793_v54 = vsel %vm6009_vm3, %v4690_v25, %v3865_v19 }
  0xb7   : > { %v4758_v50 = vsel %vm993_vm2, %v4733_v56, %v3875_v55  ;;  %v4761_v28 = vsel %vm993_vm2, %v3875_v55, %v3879_v39  ;;  %v3926_v39 = vpack.i.bf16 %v1006_v15, %v1005_v14  ;;  %v3888_v55 = vpop.permute.xlu1 %3887  ;;  %v1002_v15 = vmul.f32 %v4733_v56, %v4614_v47 }
  0xb8   : > { %6069 = vst [vmem:[#allocation6_spill] sm:$0xff] %v4758_v50  ;;  %v1003_v34 = vmul.f32 %v4758_v50, %v4652_v4  ;;  %v1004_v35 = vmul.f32 %v4761_v28, %v4655_v5  ;;  %v3883_v61 = vpop.permute.xlu0 %3882  ;;  %v3936_v62 = vpack.i.bf16 %v902_v48, %v901_v42 }
  0xb9   : > { %3897 = vrot.lane.b32.xlu0 %v3896_v41, %s5991_s20  ;;  %3902 = vrot.lane.b32.xlu1 %v3901_v53, %s5993_s1  ;;  %v4781_v41 = vunpack.i.h.bf16 %v4642_v63  ;;  %v3931_v53 = vpack.i.bf16 %v900_v40, %v899_v33  ;;  %v4796_v63 = vsel %vm6009_vm3, %v3865_v19, %v3869_v45  ;;  %v3889_v33 = vunpack.i.l.bf16 %v3888_v55  ;;  %s6085_s20 = smov 95  }
  0xba   : > { %v3921_v51 = vpack.i.bf16 %v1004_v35, %v1003_v34  ;;  %v978_v14 = vmul.f32 %v4796_v63, %v4655_v5  ;;  %v3885_v34 = vunpack.i.h.bf16 %v3883_v61  ;;  %v4814_v35 = vunpack.i.l.bf16 %v3883_v61 }
  0xbb   : > { %v4800_v21 = vsel %vm6009_vm3, %v3869_v45, %v4781_v41  ;;  %v4818_v45 = vunpack.i.h.bf16 %v3888_v55  ;;  %v4186_v55 = vmov 0  }
  0xbc   : > { %6070 = vst [vmem:[#allocation7_spill] sm:$0xff] %v4814_v35  ;;  %v4821_v19 = vsel %vm1019_vm1, %v4814_v35, %v3885_v34  ;;  %v4823_v42 = vsel %vm1019_vm1, %v3885_v34, %v3889_v33  ;;  %3951 = vset.pattern.permute.xlu1 %v4186_v55  ;;  %4147 = vset.pattern.permute.xlu0 %v4186_v55 }
  0xbd   : > { %3907 = vrot.lane.b32.xlu0 %v3906_v13, %s5993_s1  ;;  %3917 = vrot.lane.b32.xlu1 %v3916_v11, %s5995_s21  ;;  %v980_v11 = vmul.f32 %v4781_v41, %v4662_v9  ;;  %v977_v13 = vmul.f32 %v4793_v54, %v4652_v4  ;;  %6071 = vst [vmem:[#allocation8_spill] sm:$0xff] %v4818_v45  ;;  %6072 = vst [vmem:[#allocation9_spill] sm:$0xff] %v4821_v19  ;;  %s6002_s1 = smov 10  }
  0xbe   : > { %6073 = vst [vmem:[#allocation10_spill] sm:$0xff] %v4823_v42  ;;  %v1029_v48 = vmul.f32 %v4821_v19, %v4652_v4 }
  0xc1   : > { %3912 = vrot.lane.b32.xlu0 %v3911_v30, %s5995_s21  ;;  %3927 = vrot.lane.b32.xlu1 %v3926_v39, %s5989_s28  ;;  %v979_v30 = vmul.f32 %v4800_v21, %v4658_v6  ;;  %v3941_v39 = vpack.i.bf16 %v978_v14, %v977_v13  ;;  %v1028_v13 = vmul.f32 %v4814_v35, %v4614_v47  ;;  %s6086_s21 = smov 96  }
  0xc3   : > { %v3946_v40 = vpack.i.bf16 %v980_v11, %v979_v30  ;;  %v1202_v11 = vld [vmem:[%s6075_s26] sm:$0xff]  ;;  %s6102_s26 = smov 1  }
  0xc5   : > { %3922 = vrot.lane.b32.xlu0 %v3921_v51, %s5989_s28  ;;  %3932 = vrot.lane.b32.xlu1 %v3931_v53, %s5998_s22  ;;  %v1030_v51 = vmul.f32 %v4823_v42, %v4655_v5  ;;  %v4832_v53 = vsel %vm1019_vm1, %v3889_v33, %v4818_v45 }
  0xc6   : > { %6074 = vst [vmem:[#allocation11_spill] sm:$0xff] %v4832_v53  ;;  %v1031_v61 = vmul.f32 %v4832_v53, %v4658_v6 }
  0xc9   : > { %3937 = vrot.lane.b32.xlu0 %v3936_v62, %s5998_s22  ;;  %1158 = vrot.lane.b32.xlu1 %v1002_v15, %s5989_s28  ;;  %v1032_v62 = vmul.f32 %v4818_v45, %v4662_v9  ;;  %s6005_s28 = smov 120  }
  0xcd   : > { %3942 = vrot.lane.b32.xlu0 %v3941_v39, %s5987_s2  ;;  %3947 = vrot.lane.b32.xlu1 %v3946_v40, %s5987_s2  ;;  %s6095_s2 = smov 94  }
  0xd1   : > { %1184 = vrot.lane.b32.xlu0 %v1029_v48, %s5985_s29  ;;  %1186 = vrot.lane.b32.xlu1 %v1030_v51, %s5985_s29  ;;  %v4861_v48 = vsel %vm4591_vm7, 1.0, %v5972_v1  ;;  %vm1120_vm7 = vcmask 900096  }
  0xd2   : > { %6076 = vst [vmem:[#allocation12_spill] sm:$0xff] %v4861_v48  ;;  %v850_v35 = vmul.f32 %v4861_v48, %v4658_v6 }
  0xd5   : > { %1188 = vrot.lane.b32.xlu0 %v1031_v61, %s5985_s29  ;;  %1190 = vrot.lane.b32.xlu1 %v1032_v62, %s5985_s29  ;;  %v4868_v61 = vsel %vm4599_vm12, 1.0, %v5972_v1  ;;  %vm6008_vm12 = vcmask 785408  }
  0xd6   : > { %6077 = vst [vmem:[#allocation13_spill] sm:$0xff] %v4868_v61  ;;  %v847_v26 = vmul.f32 %v4868_v61, %v4614_v47 }
  0xd9   : > { %1182 = vrot.lane.b32.xlu0 %v1028_v13, %s5985_s29  ;;  %1205 = vperm.xlu1 %3951, %v1202_v11   ;;  %v4873_v13 = vsel %vm4583_vm4, 1.0, %v5972_v1  ;;  %vm1096_vm4 = vcmask 916480   ;;  %s6124_s29 = smov 9  }
  0xda   : > { %6078 = vst [vmem:[#allocation14_spill] sm:$0xff] %v4873_v13  ;;  %v848_v37 = vmul.f32 %v4873_v13, %v4652_v4 }
 0x113   : > { %v1087_v14 = vpop.permute.xlu0 %1086 }
 0x117   : > { %v1039_v30 = vpop.permute.xlu0 %1038 }
 0x11f   : > { %v4848_v15 = vpop.permute.xlu1 %1110 }
 0x123   : > { %v1063_v33 = vpop.permute.xlu1 %1062 }
 0x127   : > { %v4850_v9 = vpop.permute.xlu0 %1134  ;;  %v4852_v34 = vpop.permute.xlu1 %3892 }
 0x128   : > { %v3895_v6 = vunpack.i.h.bf16 %v4852_v34 }
 0x12b   : > { %v4854_v39 = vpop.permute.xlu0 %3897  ;;  %v4856_v40 = vpop.permute.xlu1 %3902 }
 0x12c   : > { %v3905_v47 = vunpack.i.h.bf16 %v4856_v40  ;;  %v3904_v61 = vunpack.i.l.bf16 %v4856_v40  ;;  %v3900_v4 = vunpack.i.h.bf16 %v4854_v39 }
 0x12f   : > { %v4863_v51 = vpop.permute.xlu0 %3907  ;;  %v3918_v55 = vpop.permute.xlu1 %3917 }
 0x130   : > { %v3920_v62 = vunpack.i.h.bf16 %v3918_v55  ;;  %v3919_v11 = vunpack.i.l.bf16 %v3918_v55 }
 0x132   : > { %v1052_v19 = vsel %vm1048_vm9, %v3919_v11, %v3920_v62  ;;  %v3894_v62 = vunpack.i.l.bf16 %v4852_v34 }
 0x133   : > { %v3913_v2 = vpop.permute.xlu0 %3912  ;;  %v4885_v55 = vpop.permute.xlu1 %3927  ;;  %v3573_v42 = vpack.c.bf16 %v1052_v19, %v850_v35 }
 0x134   : > { %v3915_v1 = vunpack.i.h.bf16 %v3913_v2  ;;  %v3914_v45 = vunpack.i.l.bf16 %v3913_v2  ;;  %v3899_v2 = vunpack.i.l.bf16 %v4854_v39  ;;  %v1097_v40 = vsel %vm1096_vm4, %v1087_v14, %v3894_v62 }
 0x135   : > { %3574 = vmatprep.subr.bf16.mxu1 %v3573_v42  ;;  %v1098_v42 = vsel %vm1096_vm4, %v3894_v62, %v3895_v6 }
 0x136   : > { %v1050_v35 = vsel %vm1048_vm9, %v3914_v45, %v3915_v1  ;;  %v1049_v5 = vsel %vm1048_vm9, %v1039_v30, %v3914_v45  ;;  %v1051_v19 = vsel %vm1048_vm9, %v3915_v1, %v3919_v11  ;;  %v1122_v45 = vsel %vm1120_vm7, %v3904_v61, %v3905_v47 }
 0x137   : > { %v4900_v13 = vpop.permute.xlu0 %3922  ;;  %v3557_v38 = vpack.c.bf16 %v1050_v35, %v848_v37  ;;  %v3559_v48 = vpack.c.bf16 %v1049_v5, %v847_v26  ;;  %v3575_v34 = vpack.c.bf16 %v1051_v19, %v849_v20  ;;  %v3933_v53 = vpop.permute.xlu1 %3932  ;;  %v3910_v1 = vunpack.i.h.bf16 %v4863_v51 }
 0x138   : > { %v3935_v50 = vunpack.i.h.bf16 %v3933_v53  ;;  %v3934_v36 = vunpack.i.l.bf16 %v3933_v53  ;;  %v3909_v30 = vunpack.i.l.bf16 %v4863_v51  ;;  %v1100_v37 = vsel %vm1096_vm4, %v3899_v2, %v3900_v4 }
 0x139   : > { %3558 = vmatprep.subr.bf16.mxu0 %v3557_v38  ;;  %3576 = vmatpush1.bf16.msra.mxu1 %v3575_v34  ;;  %v3565_v62 = vpack.c.bf16 %v1122_v45, %v4338_v16  ;;  %v1121_v5 = vsel %vm1120_vm7, %v4848_v15, %v3904_v61  ;;  %v3924_v51 = vunpack.i.l.bf16 %v4900_v13  ;;  %v1099_v34 = vsel %vm1096_vm4, %v3895_v6, %v3899_v2 }
 0x13a   : > { %3560 = vmatpush1.bf16.msra.mxu0 %v3559_v48  ;;  %v1074_v39 = vsel %vm1072_vm6, %v3934_v36, %v3935_v50  ;;  %v1073_v11 = vsel %vm1072_vm6, %v1063_v33, %v3934_v36  ;;  %v3925_v48 = vunpack.i.h.bf16 %v4900_v13  ;;  %v3930_v36 = vunpack.i.h.bf16 %v4885_v55 }
 0x13b   : > { %v3938_v26 = vpop.permute.xlu0 %3937  ;;  %v1159_v53 = vpop.permute.xlu1 %1158  ;;  %v3561_v38 = vpack.c.bf16 %v1098_v42, %v1074_v39  ;;  %v3563_v20 = vpack.c.bf16 %v1097_v40, %v1073_v11  ;;  %v3929_v33 = vunpack.i.l.bf16 %v4885_v55  ;;  %v1124_v16 = vsel %vm1120_vm7, %v3909_v30, %v3910_v1 }
 0x13c   : > { %v3940_v35 = vunpack.i.h.bf16 %v3938_v26  ;;  %v3939_v14 = vunpack.i.l.bf16 %v3938_v26  ;;  %v3567_v13 = vpack.c.bf16 %v1121_v5, %v4327_v7  ;;  %v3581_v26 = vpack.c.bf16 %v1124_v16, %v4340_v17 }
 0x13d   : > { %3562 = vmatprep.subr.bf16.mxu0 %v3561_v38  ;;  %v1170_v6 = vsel %vm1168_vm0, %v3924_v51, %v3925_v48  ;;  %v1172_v2 = vsel %vm1168_vm0, %v3929_v33, %v3930_v36 }
 0x13e   : > { %v1076_v19 = vsel %vm1072_vm6, %v3939_v14, %v3940_v35  ;;  %3564 = vmatpush1.bf16.msra.mxu0 %v3563_v20  ;;  %v1075_v4 = vsel %vm1072_vm6, %v3935_v50, %v3939_v14  ;;  %v1123_v50 = vsel %vm1120_vm7, %v3905_v47, %v3909_v30 }
 0x13f   : > { %v3943_v42 = vpop.permute.xlu0 %3942  ;;  %v3577_v15 = vpack.c.bf16 %v1100_v37, %v1076_v19  ;;  %v3579_v61 = vpack.c.bf16 %v1099_v34, %v1075_v4  ;;  %v3948_v40 = vpop.permute.xlu1 %3947  ;;  %3566 = vmatprep.subr.bf16.mxu0 %v3565_v62  ;;  %v1169_v37 = vsel %vm1168_vm0, %v1159_v53, %v3924_v51  ;;  %v3583_v62 = vpack.c.bf16 %v1123_v50, %v4329_v8  ;;  %v1201_v8 = vld [vmem:[%s6080_s27] sm:$0xff]  ;;  %s6081_s27 = sld [smem:[#allocation19_spill]] }
 0x140   : > { %v3945_v45 = vunpack.i.h.bf16 %v3943_v42  ;;  %v3944_v55 = vunpack.i.l.bf16 %v3943_v42  ;;  %v3950_v39 = vunpack.i.h.bf16 %v3948_v40  ;;  %v3949_v11 = vunpack.i.l.bf16 %v3948_v40 }
 0x141   : > { %3578 = vmatprep.subr.bf16.mxu1 %v3577_v15 }
 0x142   : > { %v1145_v1 = vsel %vm6008_vm12, %v4850_v9, %v3944_v55  ;;  %3580 = vmatpush1.bf16.msra.mxu1 %v3579_v61  ;;  %3568 = vmatpush1.bf16.msra.mxu0 %v3567_v13  ;;  %v1146_v7 = vsel %vm6008_vm12, %v3944_v55, %v3945_v45  ;;  %v1148_v38 = vsel %vm6008_vm12, %v3949_v11, %v3950_v39 }
 0x143   : > { %v1185_v20 = vpop.permute.xlu0 %1184  ;;  %3582 = vmatprep.subr.bf16.mxu1 %v3581_v26  ;;  %v1187_v17 = vpop.permute.xlu1 %1186  ;;  %v3569_v47 = vpack.c.bf16 %v1170_v6, %v1146_v7  ;;  %v3585_v30 = vpack.c.bf16 %v1172_v2, %v1148_v38  ;;  %v1147_v35 = vsel %vm6008_vm12, %v3945_v45, %v3949_v11  ;;  %v3571_v14 = vpack.c.bf16 %v1169_v37, %v1145_v1 }
 0x144   : > { %v1171_v9 = vsel %vm1168_vm0, %v3925_v48, %v3929_v33  ;;  %v1194_v36 = vsel %vm1192_vm8, %v1185_v20, %v1187_v17 }
 0x145   : > { %3570 = vmatprep.subr.bf16.mxu0 %v3569_v47  ;;  %v3587_v5 = vpack.c.bf16 %v1171_v9, %v1147_v35  ;;  %v1660_v6 = vld [vmem:[%s6081_s27 + $0x180] sm:$0xff]  ;;  %v1661_v2 = vld [vmem:[%s6081_s27 + $0x188] sm:$0xff] }
 0x146   : > { %3584 = vmatpush1.bf16.msra.mxu1 %v3583_v62  ;;  %3572 = vmatpush1.bf16.msra.mxu0 %v3571_v14  ;;  %v1628_v1 = vld [vmem:[%s6081_s27 + $0x80] sm:$0xff]  ;;  %v3621_v7 = vpack.c.bf16 %v1661_v2, %v1660_v6  ;;  %v1629_v38 = vld [vmem:[%s6081_s27 + $0x88] sm:$0xff]  ;;  %v1647_v6 = vld [vmem:[%s6081_s27 + $0x118] sm:$0xff] }
 0x147   : > { %v1189_v19 = vpop.permute.xlu0 %1188  ;;  %3586 = vmatprep.subr.bf16.mxu1 %v3585_v30  ;;  %v1191_v53 = vpop.permute.xlu1 %1190  ;;  %1228 = vmatprep.subr.mxu0 %v1194_v36  ;;  %v1644_v37 = vld [vmem:[%s6081_s27 + $0x100] sm:$0xff]  ;;  %v3589_v47 = vpack.c.bf16 %v1629_v38, %v1628_v1  ;;  %v1615_v2 = vld [vmem:[%s6081_s27 + $0x18] sm:$0xff]  ;;  %v1665_v38 = vld [vmem:[%s6081_s27 + $0x1a8] sm:$0xff] }
 0x148   : > { %v1196_v51 = vsel %vm1192_vm8, %v1189_v19, %v1191_v53  ;;  %v1195_v33 = vsel %vm1192_vm8, %v1187_v17, %v1189_v19 }
 0x14a   : > { %3588 = vmatpush1.bf16.msra.mxu1 %v3587_v5 }
 0x14b   : > { %v1183_v4 = vpop.permute.xlu0 %1182  ;;  %1299 = vmatprep.subr.mxu1 %v1196_v51 }
 0x14c   : > { %v1193_v48 = vsel %vm1192_vm8, %v1183_v4, %v1185_v20  ;;  %v1645_v20 = vld [vmem:[%s6081_s27 + $0x108] sm:$0xff] }
 0x14d   : > { %1229 = vmatpush1.msra.mxu0 %v1193_v48  ;;  %v3623_v30 = vpack.c.bf16 %v1645_v20, %v1644_v37 }
 0x14e   : > { %1300 = vmatpush1.msra.mxu1 %v1195_v33  ;;  %3190 = vmatmul.mubr.msk.f32.vlgmr.msra.gmra.mrb[0].mxu0 %vm6010_vm15, %v1201_v8 }
 0x14f   : > { %3191 = vmatmul.mubr.msk.f32.vlgmr.msra.gmra.mrb[0].mxu1 %vm6010_vm15, %v1201_v8  ;;  %3622 = vmatprep.subr.bf16.mxu1 %v3621_v7  ;;  %v1664_v7 = vld [vmem:[%s6081_s27 + $0x1a0] sm:$0xff] }
 0x150   : > { %3590 = vmatprep.subr.bf16.mxu0 %v3589_v47  ;;  %3624 = vmatpush3.bf16.msra.mxu1 %v3623_v30 }
 0x158   : > { %v1206_v34 = vpop.permute.xlu1 %1205 }
 0x221   : > { %v1278_v16 = vpop.f32.mrb[0].mxu0 }
 0x222   : > { %v4943_v42 = vadd.f32 %v1278_v16, %v1206_v34  ;;  %v1349_v15 = vpop.f32.mrb[0].mxu1  ;;  %v1280_v61 = vpop.f32.mrb[1].mxu0 }
 0x223   : > { %v4945_v40 = vadd.f32 %v1280_v61, %v1206_v34  ;;  %v1351_v13 = vpop.f32.mrb[1].mxu1  ;;  %v4948_v55 = vadd.f32 %v1349_v15, %v1206_v34  ;;  %v1631_v61 = vld [vmem:[%s6081_s27 + $0x98] sm:$0xff] }
 0x224   : > { %v1354_v45 = vmax.f32 %v4943_v42, 0.0  ;;  %v4951_v11 = vadd.f32 %v1351_v13, %v1206_v34  ;;  %v1646_v13 = vld [vmem:[%s6081_s27 + $0x110] sm:$0xff] }
 0x225   : > { %v1355_v39 = vmax.f32 %v4945_v40, 0.0  ;;  %v1356_v26 = vmax.f32 %v4948_v55, 0.0 }
 0x226   : > { %1362 = vrot.lane.b32.xlu0 %v1354_v45, %s5997_s23  ;;  %v1357_v50 = vmax.f32 %v4951_v11, 0.0 }
 0x227   : > { %1364 = vrot.lane.b32.xlu1 %v1355_v39, %s5997_s23 }
 0x22a   : > { %1366 = vrot.lane.b32.xlu0 %v1356_v26, %s5997_s23 }
 0x22b   : > { %1368 = vrot.lane.b32.xlu1 %v1357_v50, %s5997_s23  ;;  %s6082_s23 = smov 127  }
 0x298   : > { %v1363_v17 = vpop.permute.xlu0 %1362 }
 0x299   : > { %v4986_v35 = vsel %vm836_vm5, 0.0, %v1363_v17  ;;  %v1365_v14 = vpop.permute.xlu1 %1364 }
 0x29a   : > { %v1420_v62 = vmul.f32 %v4638_v59, %v4986_v35  ;;  %v1388_v9 = vmul.f32 %v4623_v49, %v4986_v35  ;;  %v1484_v19 = vmul.f32 %v4633_v57, %v4986_v35  ;;  %v1452_v53 = vmul.f32 %v4611_v46, %v4986_v35 }
 0x29b   : > { %v5010_v4 = vsel %vm836_vm5, %v1363_v17, %v1365_v14  ;;  %v1548_v57 = vmul.f32 %v4733_v56, %v4986_v35  ;;  %v1516_v46 = vmul.f32 %v4690_v25, %v4986_v35  ;;  %v1612_v25 = vld [vmem:[%s6081_s27] sm:$0xff] }
 0x29c   : > { %1430 = vrot.lane.b32.xlu1 %v1420_v62, %s5998_s22  ;;  %1398 = vrot.lane.b32.xlu0 %v1388_v9, %s6082_s23  ;;  %v1367_v5 = vpop.permute.xlu0 %1366  ;;  %v1389_v34 = vmul.f32 %v5010_v4, %v4718_v43  ;;  %v1662_v43 = vld [vmem:[%s6081_s27 + $0x190] sm:$0xff]  ;;  %v3627_v9 = vpack.c.bf16 %v1647_v6, %v1646_v13  ;;  %s6007_s22 = smov 9  }
 0x29d   : > { %v1369_v36 = vpop.permute.xlu1 %1368  ;;  %v4999_v51 = vsel %vm836_vm5, %v1365_v14, %v1367_v5 }
 0x29e   : > { %v5002_v59 = vsel %vm836_vm5, %v1367_v5, %v1369_v36  ;;  %v5005_v49 = vsel %vm836_vm5, %v1369_v36, 0.0  ;;  %v1390_v33 = vmul.f32 %v4999_v51, %v4721_v44  ;;  %v1422_v56 = vmul.f32 %v4999_v51, %v4764_v29  ;;  %v1613_v44 = vld [vmem:[%s6081_s27 + $0x8] sm:$0xff]  ;;  %v1663_v29 = vld [vmem:[%s6081_s27 + $0x198] sm:$0xff]  ;;  %v1632_v5 = vld [vmem:[%s6081_s27 + $0xa0] sm:$0xff] }
 0x29f   : > { %v1391_v8 = vmul.f32 %v5002_v59, %v4700_v31  ;;  %v1392_v48 = vmul.f32 %v4665_v10, %v5005_v49  ;;  %v1423_v10 = vmul.f32 %v5002_v59, %v4770_v32  ;;  %v1424_v31 = vmul.f32 %v4742_v52, %v5005_v49  ;;  %v1630_v52 = vld [vmem:[%s6081_s27 + $0x90] sm:$0xff]  ;;  %v1633_v36 = vld [vmem:[%s6081_s27 + $0xa8] sm:$0xff] }
 0x2a0   : > { %1494 = vrot.lane.b32.xlu1 %v1484_v19, %s6083_s24  ;;  %1462 = vrot.lane.b32.xlu0 %v1452_v53, %s6084_s25  ;;  %v3952_v15 = vpack.i.bf16 %v1390_v33, %v1389_v34  ;;  %v1421_v32 = vmul.f32 %v5010_v4, %v4754_v27  ;;  %v1614_v27 = vld [vmem:[%s6081_s27 + $0x10] sm:$0xff]  ;;  %v1455_v20 = vmul.f32 %v5002_v59, %v4670_v12  ;;  %v1648_v12 = vld [vmem:[%s6081_s27 + $0x120] sm:$0xff] }
 0x2a1   : > { %v3957_v16 = vpack.i.bf16 %v1392_v48, %v1391_v8  ;;  %v3967_v37 = vpack.i.bf16 %v1424_v31, %v1423_v10  ;;  %v1456_v17 = vmul.f32 %v4635_v58, %v5005_v49  ;;  %v3591_v47 = vpack.c.bf16 %v1613_v44, %v1612_v25  ;;  %v1616_v53 = vld [vmem:[%s6081_s27 + $0x20] sm:$0xff]  ;;  %v1666_v8 = vld [vmem:[%s6081_s27 + $0x1b0] sm:$0xff]  ;;  %v1667_v48 = vld [vmem:[%s6081_s27 + $0x1b8] sm:$0xff] }
 0x2a2   : > { %v3962_v1 = vpack.i.bf16 %v1422_v56, %v1421_v32  ;;  %v1454_v30 = vmul.f32 %v4999_v51, %v4649_v3  ;;  %v3625_v14 = vpack.c.bf16 %v1663_v29, %v1662_v43  ;;  %v3593_v62 = vpack.c.bf16 %v1631_v61, %v1630_v52  ;;  %v1649_v3 = vld [vmem:[%s6081_s27 + $0x128] sm:$0xff]  ;;  %v1634_v44 = vld [vmem:[%s6081_s27 + $0xb0] sm:$0xff]  ;;  %v1668_v52 = vld [vmem:[%s6081_s27 + $0x1c0] sm:$0xff] }
 0x2a3   : > { %3592 = vmatpush3.bf16.msra.mxu0 %v3591_v47  ;;  %v3595_v58 = vpack.c.bf16 %v1615_v2, %v1614_v27  ;;  %v3629_v19 = vpack.c.bf16 %v1665_v38, %v1664_v7  ;;  %v1486_v33 = vmul.f32 %v4999_v51, %v4687_v23  ;;  %v1487_v34 = vmul.f32 %v5002_v59, %v4712_v24  ;;  %v1635_v23 = vld [vmem:[%s6081_s27 + $0xb8] sm:$0xff]  ;;  %v1650_v24 = vld [vmem:[%s6081_s27 + $0x130] sm:$0xff]  ;;  %v1669_v61 = vld [vmem:[%s6081_s27 + $0x1c8] sm:$0xff] }
 0x2a4   : > { %1558 = vrot.lane.b32.xlu1 %v1548_v57, %s6085_s20  ;;  %1526 = vrot.lane.b32.xlu0 %v1516_v46, %s6086_s21  ;;  %v1617_v57 = vld [vmem:[%s6081_s27 + $0x28] sm:$0xff]  ;;  %v1453_v46 = vmul.f32 %v5010_v4, %v4646_v0  ;;  %v3597_v56 = vpack.c.bf16 %v1633_v36, %v1632_v5  ;;  %v3977_v25 = vpack.i.bf16 %v1456_v17, %v1455_v20  ;;  %v1636_v38 = vld [vmem:[%s6081_s27 + $0xc0] sm:$0xff] }
 0x2a5   : > { %3626 = vmatprep.subr.bf16.mxu1 %v3625_v14  ;;  %3594 = vmatprep.subr.bf16.mxu0 %v3593_v62  ;;  %v1488_v0 = vmul.f32 %v4678_v18, %v5005_v49  ;;  %v3631_v31 = vpack.c.bf16 %v1649_v3, %v1648_v12  ;;  %v3599_v43 = vpack.c.bf16 %v1617_v57, %v1616_v53  ;;  %v1651_v18 = vld [vmem:[%s6081_s27 + $0x138] sm:$0xff]  ;;  %v1620_v17 = vld [vmem:[%s6081_s27 + $0x40] sm:$0xff]  ;;  %v1621_v47 = vld [vmem:[%s6081_s27 + $0x48] sm:$0xff] }
 0x2a6   : > { %v3972_v10 = vpack.i.bf16 %v1454_v30, %v1453_v46  ;;  %3628 = vmatpush3.bf16.msra.mxu1 %v3627_v9  ;;  %v3633_v29 = vpack.c.bf16 %v1667_v48, %v1666_v8  ;;  %v1485_v32 = vmul.f32 %v5010_v4, %v4684_v22  ;;  %v1519_v13 = vmul.f32 %v5002_v59, %v4800_v21  ;;  %v1637_v21 = vld [vmem:[%s6081_s27 + $0xc8] sm:$0xff]  ;;  %v1670_v14 = vld [vmem:[%s6081_s27 + $0x1d0] sm:$0xff]  ;;  %v1671_v62 = vld [vmem:[%s6081_s27 + $0x1d8] sm:$0xff] }
 0x2a7   : > { %3596 = vmatpush3.bf16.msra.mxu0 %v3595_v58  ;;  %3630 = vmatprep.subr.bf16.mxu1 %v3629_v19  ;;  %v1520_v6 = vmul.f32 %v4781_v41, %v5005_v49  ;;  %v3601_v27 = vpack.c.bf16 %v1635_v23, %v1634_v44  ;;  %v1518_v22 = vmul.f32 %v4999_v51, %v4796_v63  ;;  %v1652_v41 = vld [vmem:[%s6081_s27 + $0x140] sm:$0xff]  ;;  %v1653_v63 = vld [vmem:[%s6081_s27 + $0x148] sm:$0xff]  ;;  %v1638_v53 = vld [vmem:[%s6081_s27 + $0xd0] sm:$0xff] }
 0x2a8   : > { %3958 = vrot.lane.b32.xlu1 %v3957_v16, %s6082_s23  ;;  %3953 = vrot.lane.b32.xlu0 %v3952_v15, %s6082_s23  ;;  %v1618_v16 = vld [vmem:[%s6081_s27 + $0x30] sm:$0xff]  ;;  %v1619_v15 = vld [vmem:[%s6081_s27 + $0x38] sm:$0xff]  ;;  %v3982_v2 = vpack.i.bf16 %v1486_v33, %v1485_v32  ;;  %v3635_v7 = vpack.c.bf16 %v1651_v18, %v1650_v24  ;;  %v3637_v20 = vpack.c.bf16 %v1669_v61, %v1668_v52  ;;  %v6091_v23 = vld [vmem:[#allocation8_spill] sm:$0xff] }
 0x2a9   : > { %3598 = vmatprep.subr.bf16.mxu0 %v3597_v56  ;;  %v1517_v30 = vmul.f32 %v5010_v4, %v4793_v54  ;;  %v3997_v9 = vpack.i.bf16 %v1520_v6, %v1519_v13  ;;  %v1550_v5 = vmul.f32 %v4999_v51, %v4761_v28  ;;  %v3605_v36 = vpack.c.bf16 %v1637_v21, %v1636_v38  ;;  %v6088_v54 = vld [vmem:[#allocation5_spill] sm:$0xff]  ;;  %v1639_v57 = vld [vmem:[%s6081_s27 + $0xd8] sm:$0xff]  ;;  %v1654_v28 = vld [vmem:[%s6081_s27 + $0x150] sm:$0xff] }
 0x2aa   : > { %3632 = vmatpush3.bf16.msra.mxu1 %v3631_v31  ;;  %v1551_v58 = vmul.f32 %v5002_v59, %v4737_v60  ;;  %v1552_v19 = vmul.f32 %v6088_v54, %v5005_v49  ;;  %v3639_v3 = vpack.c.bf16 %v1653_v63, %v1652_v41  ;;  %v6089_v46 = vld [vmem:[#allocation6_spill] sm:$0xff]  ;;  %v3607_v8 = vpack.c.bf16 %v1621_v47, %v1620_v17  ;;  %v1655_v33 = vld [vmem:[%s6081_s27 + $0x158] sm:$0xff]  ;;  %v1641_v18 = vld [vmem:[%s6081_s27 + $0xe8] sm:$0xff] }
 0x2ab   : > { %3600 = vmatpush3.bf16.msra.mxu0 %v3599_v43  ;;  %3634 = vmatprep.subr.bf16.mxu1 %v3633_v29  ;;  %v3992_v12 = vpack.i.bf16 %v1518_v22, %v1517_v30  ;;  %v1549_v60 = vmul.f32 %v5010_v4, %v6089_v46  ;;  %v3641_v48 = vpack.c.bf16 %v1671_v62, %v1670_v14  ;;  %v1623_v56 = vld [vmem:[%s6081_s27 + $0x58] sm:$0xff]  ;;  %v1640_v29 = vld [vmem:[%s6081_s27 + $0xe0] sm:$0xff]  ;;  %v1657_v61 = vld [vmem:[%s6081_s27 + $0x168] sm:$0xff] }
 0x2ac   : > { %3963 = vrot.lane.b32.xlu1 %v3962_v1, %s6087_s16  ;;  %3968 = vrot.lane.b32.xlu0 %v3967_v37, %s6087_s16  ;;  %v3987_v1 = vpack.i.bf16 %v1488_v0, %v1487_v34  ;;  %v3603_v37 = vpack.c.bf16 %v1619_v15, %v1618_v16  ;;  %v1622_v34 = vld [vmem:[%s6081_s27 + $0x50] sm:$0xff]  ;;  %v6090_v31 = vld [vmem:[#allocation11_spill] sm:$0xff]  ;;  %v1584_v24 = vmul.f32 %v6091_v23, %v5005_v49  ;;  %v1656_v49 = vld [vmem:[%s6081_s27 + $0x160] sm:$0xff] }
 0x2ad   : > { %3602 = vmatprep.subr.bf16.mxu0 %v3601_v27  ;;  %v4002_v0 = vpack.i.bf16 %v1550_v5, %v1549_v60  ;;  %v1583_v44 = vmul.f32 %v5002_v59, %v6090_v31  ;;  %v3609_v43 = vpack.c.bf16 %v1639_v57, %v1638_v53  ;;  %v4007_v16 = vpack.i.bf16 %v1552_v19, %v1551_v58  ;;  %v6092_v15 = vld [vmem:[#allocation10_spill] sm:$0xff]  ;;  %v1624_v13 = vld [vmem:[%s6081_s27 + $0x60] sm:$0xff]  ;;  %v1625_v22 = vld [vmem:[%s6081_s27 + $0x68] sm:$0xff] }
 0x2ae   : > { %3636 = vmatpush3.bf16.msra.mxu1 %v3635_v7  ;;  %v1582_v32 = vmul.f32 %v4999_v51, %v6092_v15  ;;  %v3643_v52 = vpack.c.bf16 %v1655_v33, %v1654_v28  ;;  %v6093_v6 = vld [vmem:[#allocation4_spill] sm:$0xff]  ;;  %v1674_v7 = vld [vmem:[%s6081_s27 + $0x1f0] sm:$0xff]  ;;  %v1675_v38 = vld [vmem:[%s6081_s27 + $0x1f8] sm:$0xff]  ;;  %v3613_v47 = vpack.c.bf16 %v1641_v18, %v1640_v29  ;;  %v3647_v62 = vpack.c.bf16 %v1657_v61, %v1656_v49 }
 0x2af   : > { %3604 = vmatpush3.bf16.msra.mxu0 %v3603_v37  ;;  %3638 = vmatprep.subr.bf16.mxu1 %v3637_v20  ;;  %v1817_v27 = vshra.s32 %v6093_v6, 3  ;;  %v1816_v21 = vand.u32 7, %v6093_v6  ;;  %v6094_v41 = vld [vmem:[#allocation9_spill] sm:$0xff]  ;;  %v1642_v20 = vld [vmem:[%s6081_s27 + $0xf0] sm:$0xff]  ;;  %v1643_v63 = vld [vmem:[%s6081_s27 + $0xf8] sm:$0xff]  ;;  %v4017_v30 = vpack.i.bf16 %v1584_v24, %v1583_v44  ;;  %v3615_v5 = vpack.c.bf16 %v1625_v22, %v1624_v13 }
 0x2b0   : > { %3978 = vrot.lane.b32.xlu1 %v3977_v25, %s6084_s25  ;;  %3973 = vrot.lane.b32.xlu0 %v3972_v10, %s6084_s25  ;;  %v1672_v25 = vld [vmem:[%s6081_s27 + $0x1e0] sm:$0xff]  ;;  %v1673_v10 = vld [vmem:[%s6081_s27 + $0x1e8] sm:$0xff]  ;;  %v1581_v37 = vmul.f32 %v5010_v4, %v6094_v41  ;;  %v6096_v57 = vld [vmem:[#allocation7_spill] sm:$0xff]  ;;  %v6101_v33 = vmov 0.0  }
 0x2b1   : > { %3606 = vmatprep.subr.bf16.mxu0 %v3605_v36  ;;  %v5250_v17 = vand.u32 7, %v1817_v27  ;;  %v3649_v36 = vpack.c.bf16 %v1675_v38, %v1674_v7  ;;  %v1658_v58 = vld [vmem:[%s6081_s27 + $0x170] sm:$0xff]  ;;  %v1659_v54 = vld [vmem:[%s6081_s27 + $0x178] sm:$0xff]  ;;  %v5261_v19 = vadd.s32 4294967295, %v1816_v21  ;;  %v1580_v28 = vmul.f32 %v6096_v57, %v4986_v35  ;;  %v6103_v29 = vld [vmem:[#allocation12_spill] sm:$0xff] }
 0x2b2   : > { %3640 = vmatpush3.bf16.msra.mxu1 %v3639_v3  ;;  %v4012_v14 = vpack.i.bf16 %v1582_v32, %v1581_v37  ;;  %v1626_v3 = vld [vmem:[%s6081_s27 + $0x70] sm:$0xff]  ;;  %v1627_v53 = vld [vmem:[%s6081_s27 + $0x78] sm:$0xff]  ;;  %v3651_v46 = vpack.c.bf16 %v1659_v54, %v1658_v58  ;;  %v1383_v18 = vmul.f32 %v6103_v29, %v5002_v59 }
 0x2b3   : > { %3608 = vmatpush3.bf16.msra.mxu0 %v3607_v8  ;;  %3642 = vmatprep.subr.bf16.mxu1 %v3641_v48  ;;  %vm1843_vm13 = vcmp.ge.s32.totalorder %v5250_v17, 0  ;;  %vm1844_vm11 = vcmp.lt.s32.totalorder %v5250_v17, 8  ;;  %v3619_v8 = vpack.c.bf16 %v1627_v53, %v1626_v3  ;;  %vm1824_vm10 = vcmp.ge.s32.totalorder %v5261_v19, 0  ;;  %v6105_v32 = vld [vmem:[#allocation15_spill] sm:$0xff]  ;;  %v6106_v7 = vld [vmem:[#allocation14_spill] sm:$0xff] }
 0x2b4   : > { %3983 = vrot.lane.b32.xlu1 %v3982_v2, %s6083_s24  ;;  %3988 = vrot.lane.b32.xlu0 %v3987_v1, %s6083_s24  ;;  %v3611_v2 = vpack.c.bf16 %v1623_v56, %v1622_v34  ;;  %v3645_v1 = vpack.c.bf16 %v1673_v10, %v1672_v25  ;;  %vm5280_vm1 = vmand %vm1843_vm13, %vm1844_vm11  ;;  %v1387_v22 = vmax.f32 %v1357_v50, %v1383_v18 }
 0x2b5   : > { %3610 = vmatprep.subr.bf16.mxu0 %v3609_v43  ;;  %v1381_v38 = vmul.f32 %v6106_v7, %v5010_v4 }
 0x2b6   : > { %3644 = vmatpush3.bf16.msra.mxu1 %v3643_v52  ;;  %v1382_v52 = vmul.f32 %v6105_v32, %v4999_v51 }
 0x2b7   : > { %3612 = vmatpush3.bf16.msra.mxu0 %v3611_v2  ;;  %3646 = vmatprep.subr.bf16.mxu1 %v3645_v1  ;;  %v1385_v55 = vmax.f32 %v1355_v39, %v1381_v38 }
 0x2b8   : > { %3998 = vrot.lane.b32.xlu1 %v3997_v9, %s6086_s21  ;;  %3993 = vrot.lane.b32.xlu0 %v3992_v12, %s6086_s21  ;;  %v1819_v9 = vadd.s32 4294967295, %v5250_v17  ;;  %v3617_v12 = vpack.c.bf16 %v1643_v63, %v1642_v20 }
 0x2b9   : > { %3614 = vmatprep.subr.bf16.mxu0 %v3613_v47 }
 0x2ba   : > { %vm1820_vm5 = vcmp.ge.s32.totalorder %v1819_v9, 0  ;;  %vm1821_vm14 = vcmp.lt.s32.totalorder %v1819_v9, 8  ;;  %3648 = vmatpush3.bf16.msra.mxu1 %v3647_v62 }
 0x2bb   : > { %vm5275_vm2 = vmand %vm1820_vm5, %vm1821_vm14  ;;  %3616 = vmatpush3.bf16.msra.mxu0 %v3615_v5  ;;  %3650 = vmatprep.subr.bf16.mxu1 %v3649_v36 }
 0x2bc   : > { %4003 = vrot.lane.b32.xlu1 %v4002_v0, %s6085_s20  ;;  %4008 = vrot.lane.b32.xlu0 %v4007_v16, %s6085_s20  ;;  %v3193_v34 = vsel %vm5275_vm2, 1.0, %v6101_v33  ;;  %vm1846_vm5 = vmand %vm5280_vm1, %vm1824_vm10  ;;  %v6104_v16 = vld [vmem:[#allocation13_spill] sm:$0xff]  ;;  %s6110_s20 = smov 18  }
 0x2bd   : > { %3618 = vmatprep.subr.bf16.mxu0 %v3617_v12  ;;  %v3195_v56 = vsel %vm1846_vm5, 1.0, %v6101_v33  ;;  %v1380_v15 = vmul.f32 %v6104_v16, %v4986_v35  ;;  %v1386_v35 = vmax.f32 %v1356_v26, %v1382_v52 }
 0x2be   : > { %3652 = vmatpush3.bf16.msra.mxu1 %v3651_v46 }
 0x2bf   : > { %3620 = vmatpush3.bf16.msra.mxu0 %v3619_v8  ;;  %v1384_v59 = vmax.f32 %v1354_v45, %v1380_v15 }
 0x2c0   : > { %4018 = vrot.lane.b32.xlu1 %v4017_v30, %s6095_s2  ;;  %4013 = vrot.lane.b32.xlu0 %v4012_v14, %s6095_s2 }
 0x2c4   : > { %1590 = vrot.lane.b32.xlu0 %v1580_v28, %s6095_s2  ;;  %s6112_s2 = smov 17  }
 0x2c8   : > { %1879 = vrot.lane.b32.xlu0 %v3193_v34, %s6102_s26 }
 0x2cc   : > { %1891 = vrot.lane.b32.xlu0 %v3195_v56, %s6003_s3  ;;  %s6127_s3 = smov 32  }
 0x30e   : > { %v1431_v25 = vpop.permute.xlu1 %1430  ;;  %v1399_v10 = vpop.permute.xlu0 %1398 }
 0x312   : > { %v5295_v0 = vpop.permute.xlu1 %1494  ;;  %v1463_v31 = vpop.permute.xlu0 %1462 }
 0x316   : > { %v5297_v44 = vpop.permute.xlu1 %1558  ;;  %v5299_v23 = vpop.permute.xlu0 %1526 }
 0x31a   : > { %v3959_v24 = vpop.permute.xlu1 %3958  ;;  %v3954_v43 = vpop.permute.xlu0 %3953 }
 0x31b   : > { %v3961_v49 = vunpack.i.h.bf16 %v3959_v24  ;;  %v3960_v61 = vunpack.i.l.bf16 %v3959_v24  ;;  %v3956_v13 = vunpack.i.h.bf16 %v3954_v43  ;;  %v3955_v27 = vunpack.i.l.bf16 %v3954_v43 }
 0x31d   : > { %v1411_v51 = vsel %vm1048_vm9, %v3960_v61, %v3961_v49  ;;  %v1410_v41 = vsel %vm1048_vm9, %v3956_v13, %v3960_v61  ;;  %v1408_v37 = vsel %vm1048_vm9, %v1399_v10, %v3955_v27  ;;  %v1409_v20 = vsel %vm1048_vm9, %v3955_v27, %v3956_v13 }
 0x31e   : > { %v3964_v2 = vpop.permute.xlu1 %3963  ;;  %v3969_v1 = vpop.permute.xlu0 %3968  ;;  %v1419_v26 = vmax.f32 %v1387_v22, %v1411_v51  ;;  %v1418_v9 = vmax.f32 %v1386_v35, %v1410_v41  ;;  %v1416_v5 = vmax.f32 %v1384_v59, %v1408_v37  ;;  %v1417_v58 = vmax.f32 %v1385_v55, %v1409_v20 }
 0x31f   : > { %v3966_v50 = vunpack.i.h.bf16 %v3964_v2  ;;  %v3965_v47 = vunpack.i.l.bf16 %v3964_v2  ;;  %v3971_v30 = vunpack.i.h.bf16 %v3969_v1  ;;  %v3970_v4 = vunpack.i.l.bf16 %v3969_v1 }
 0x321   : > { %v1440_v54 = vsel %vm1072_vm6, %v1431_v25, %v3965_v47  ;;  %v1441_v3 = vsel %vm1072_vm6, %v3965_v47, %v3966_v50  ;;  %v1443_v53 = vsel %vm1072_vm6, %v3970_v4, %v3971_v30  ;;  %v1442_v57 = vsel %vm1072_vm6, %v3966_v50, %v3970_v4 }
 0x322   : > { %v3979_v63 = vpop.permute.xlu1 %3978  ;;  %v3974_v11 = vpop.permute.xlu0 %3973  ;;  %v1448_v10 = vmax.f32 %v1416_v5, %v1440_v54  ;;  %v1449_v24 = vmax.f32 %v1417_v58, %v1441_v3  ;;  %v1451_v43 = vmax.f32 %v1419_v26, %v1443_v53  ;;  %v1450_v49 = vmax.f32 %v1418_v9, %v1442_v57 }
 0x323   : > { %v3981_v14 = vunpack.i.h.bf16 %v3979_v63  ;;  %v3980_v42 = vunpack.i.l.bf16 %v3979_v63  ;;  %v3976_v45 = vunpack.i.h.bf16 %v3974_v11  ;;  %v3975_v62 = vunpack.i.l.bf16 %v3974_v11 }
 0x325   : > { %v1475_v28 = vsel %vm1096_vm4, %v3980_v42, %v3981_v14  ;;  %v1472_v46 = vsel %vm1096_vm4, %v1463_v31, %v3975_v62  ;;  %v1473_v40 = vsel %vm1096_vm4, %v3975_v62, %v3976_v45  ;;  %v1474_v25 = vsel %vm1096_vm4, %v3976_v45, %v3980_v42 }
 0x326   : > { %v3984_v36 = vpop.permute.xlu1 %3983  ;;  %v3989_v12 = vpop.permute.xlu0 %3988  ;;  %v1483_v61 = vmax.f32 %v1451_v43, %v1475_v28  ;;  %v1480_v31 = vmax.f32 %v1448_v10, %v1472_v46  ;;  %v1481_v13 = vmax.f32 %v1449_v24, %v1473_v40  ;;  %v1482_v7 = vmax.f32 %v1450_v49, %v1474_v25 }
 0x327   : > { %v3986_v39 = vunpack.i.h.bf16 %v3984_v36  ;;  %v3985_v8 = vunpack.i.l.bf16 %v3984_v36  ;;  %v3991_v34 = vunpack.i.h.bf16 %v3989_v12  ;;  %v3990_v56 = vunpack.i.l.bf16 %v3989_v12 }
 0x328   : > { %v1854_v25 = vadd.s32 1, %v5250_v17 }
 0x329   : > { %v1504_v27 = vsel %vm1120_vm7, %v5295_v0, %v3985_v8  ;;  %v1505_v2 = vsel %vm1120_vm7, %v3985_v8, %v3986_v39  ;;  %v1506_v1 = vsel %vm1120_vm7, %v3986_v39, %v3990_v56  ;;  %v1507_v22 = vsel %vm1120_vm7, %v3990_v56, %v3991_v34 }
 0x32a   : > { %v3999_v29 = vpop.permute.xlu1 %3998  ;;  %v3994_v18 = vpop.permute.xlu0 %3993  ;;  %v1512_v0 = vmax.f32 %v1480_v31, %v1504_v27  ;;  %v1513_v50 = vmax.f32 %v1481_v13, %v1505_v2  ;;  %v1514_v47 = vmax.f32 %v1482_v7, %v1506_v1  ;;  %v1515_v30 = vmax.f32 %v1483_v61, %v1507_v22 }
 0x32b   : > { %v4001_v16 = vunpack.i.h.bf16 %v3999_v29  ;;  %v4000_v15 = vunpack.i.l.bf16 %v3999_v29  ;;  %v3996_v32 = vunpack.i.h.bf16 %v3994_v18  ;;  %v3995_v52 = vunpack.i.l.bf16 %v3994_v18 }
 0x32c   : > { %vm1856_vm14 = vcmp.lt.s32.totalorder %v1854_v25, 8  ;;  %v1836_v29 = vadd.s32 1, %v1816_v21 }
 0x32d   : > { %v1539_v38 = vsel %vm6008_vm12, %v4000_v15, %v4001_v16  ;;  %v1538_v59 = vsel %vm6008_vm12, %v3996_v32, %v4000_v15  ;;  %v1537_v35 = vsel %vm6008_vm12, %v3995_v52, %v3996_v32  ;;  %v1536_v4 = vsel %vm6008_vm12, %v5299_v23, %v3995_v52 }
 0x32e   : > { %v4004_v51 = vpop.permute.xlu1 %4003  ;;  %v4009_v41 = vpop.permute.xlu0 %4008  ;;  %v1547_v62 = vmax.f32 %v1515_v30, %v1539_v38  ;;  %v1545_v55 = vmax.f32 %v1513_v50, %v1537_v35  ;;  %v1546_v26 = vmax.f32 %v1514_v47, %v1538_v59  ;;  %v1544_v23 = vmax.f32 %v1512_v0, %v1536_v4 }
 0x32f   : > { %v4006_v37 = vunpack.i.h.bf16 %v4004_v51  ;;  %v4005_v20 = vunpack.i.l.bf16 %v4004_v51  ;;  %v4011_v63 = vunpack.i.h.bf16 %v4009_v41  ;;  %v4010_v11 = vunpack.i.l.bf16 %v4009_v41 }
 0x330   : > { %vm1839_vm11 = vcmp.lt.s32.totalorder %v1836_v29, 8  ;;  %v4191_v59 = vmov 0.0|0.0  }
 0x331   : > { %v1569_v14 = vsel %vm1168_vm0, %v4005_v20, %v4006_v37  ;;  %v1570_v42 = vsel %vm1168_vm0, %v4006_v37, %v4010_v11  ;;  %v1571_v45 = vsel %vm1168_vm0, %v4010_v11, %v4011_v63  ;;  %v1568_v36 = vsel %vm1168_vm0, %v5297_v44, %v4005_v20  ;;  %3653 = vmatprep.subr.bf16.mxu0 %v4191_v59 }
 0x332   : > { %v4019_v9 = vpop.permute.xlu1 %4018  ;;  %v4014_v5 = vpop.permute.xlu0 %4013  ;;  %v1578_v53 = vmax.f32 %v1546_v26, %v1570_v42  ;;  %v1577_v57 = vmax.f32 %v1545_v55, %v1569_v14  ;;  %v1579_v28 = vmax.f32 %v1547_v62, %v1571_v45  ;;  %v1576_v56 = vmax.f32 %v1544_v23, %v1568_v36  ;;  %3665 = vmatprep.subr.bf16.mxu1 %v4191_v59 }
 0x333   : > { %v4021_v12 = vunpack.i.h.bf16 %v4019_v9  ;;  %v4020_v58 = vunpack.i.l.bf16 %v4019_v9  ;;  %v4016_v54 = vunpack.i.h.bf16 %v4014_v5  ;;  %v4015_v3 = vunpack.i.l.bf16 %v4014_v5 }
 0x334   : > { %vm1855_vm0 = vcmp.ge.s32.totalorder %v1854_v25, 0 }
 0x335   : > { %v1602_v46 = vsel %vm1192_vm8, %v4016_v54, %v4020_v58  ;;  %v1601_v40 = vsel %vm1192_vm8, %v4015_v3, %v4016_v54  ;;  %v1603_v39 = vsel %vm1192_vm8, %v4020_v58, %v4021_v12  ;;  %vm5351_vm13 = vmand %vm1855_vm0, %vm1856_vm14 }
 0x336   : > { %v1610_v8 = vmax.f32 %v1578_v53, %v1602_v46  ;;  %v1591_v34 = vpop.permute.xlu0 %1590  ;;  %v1609_v10 = vmax.f32 %v1577_v57, %v1601_v40  ;;  %v1611_v24 = vmax.f32 %v1579_v28, %v1603_v39  ;;  %vm1867_vm5 = vmand %vm5351_vm13, %vm1839_vm11  ;;  %v3198_v2 = vsel %vm5351_vm13, 1.0, %v6101_v33  ;;  %v1980_v53 = vld [vmem:[%s5939_s5] sm:$0xff] }
 0x337   : > { %v1600_v44 = vsel %vm1192_vm8, %v1591_v34, %v4015_v3  ;;  %vm1858_vm8 = vmand %vm5351_vm13, %vm1824_vm10  ;;  %v3199_v21 = vsel %vm1867_vm5, 1.0, %v6101_v33 }
 0x338   : > { %v1608_v43 = vmax.f32 %v1576_v56, %v1600_v44  ;;  %1740 = vmatprep.mubr.f32.mxu0 %v1609_v10  ;;  %1810 = vmatprep.mubr.f32.mxu1 %v1611_v24  ;;  %v3197_v16 = vsel %vm1858_vm8, 1.0, %v6101_v33  ;;  %vm1840_vm0 = vmand %vm5275_vm2, %vm1839_vm11  ;;  %vm1874_vm8 = vcmask 72704  }
 0x339   : > { %1811 = vmatmul.mubr.f32.vlgmr.msra.gmra.mrb[2].mxu1 %v1610_v8  ;;  %1903 = vrot.lane.b32.xlu0 %v3197_v16, %s6109_s0  ;;  %v3194_v13 = vsel %vm1840_vm0, 1.0, %v6101_v33  ;;  %vm1851_vm14 = vmand %vm5280_vm1, %vm1839_vm11  ;;  %vm6011_vm1 = vmmov 0   ;;  %vm1942_vm11 = vcmask 982016   ;;  %s4200_s0 = smov 122  }
 0x33a   : > { %1741 = vmatmul.mubr.f32.vlgmr.msra.gmra.mrb[2].mxu0 %v1608_v43  ;;  %v3196_v27 = vsel %vm1851_vm14, 1.0, %v6101_v33  ;;  %v5384_v1 = vpop.permute.xlu0 %1879  ;;  %3437 = vmatprep.mubr.msk.f32.mxu1 %vm6011_vm1, %v6101_v33  ;;  %vm1825_vm13 = vmand %vm5275_vm2, %vm1824_vm10  ;;  %vm1951_vm2 = vcmask 965632   ;;  %vm1968_vm10 = vcmask 908288  }
 0x33b   : > { %3416 = vmatprep.mubr.msk.f32.mxu0 %vm6011_vm1, %v6101_v33  ;;  %v5436_v23 = vsel %vm1825_vm13, 1.0, %v6101_v33 }
 0x33d   : > { %1915 = vrot.lane.b32.xlu0 %v3199_v21, %s6110_s20  ;;  %s4201_s20 = smov 119  }
 0x33e   : > { %v5386_v7 = vpop.permute.xlu0 %1891 }
 0x3ab   : > { %v5401_v50 = vpop.permute.xlu0 %1903 }
 0x3af   : > { %v5413_v5 = vpop.permute.xlu0 %1915 }
 0x40c   : > { %v3284_v17 = vpop.f32.mrb[2].mxu1 }
 0x40d   : > { %v3249_v15 = vpop.f32.mrb[2].mxu0  ;;  %v3285_v32 = vpop.f32.mrb[3].mxu1 }
 0x40e   : > { %v3286_v52 = vadd.f32 %v3285_v32, %v3284_v17  ;;  %v3250_v49 = vpop.f32.mrb[3].mxu0 }
 0x40f   : > { %v3251_v61 = vadd.f32 %v3250_v49, %v3249_v15 }
 0x411   : > { %v5366_v31 = vadd.f32 %v3286_v52, %v3251_v61 }
 0x413   : > { %1871 = vrot.lane.b32.xlu1 %v5366_v31, %s6007_s22 }
 0x417   : > { %1885 = vrot.lane.b32.xlu1 %v3194_v13, %s6111_s19 }
 0x41b   : > { %1897 = vrot.lane.b32.xlu1 %v3196_v27, %s6002_s1  ;;  %s4202_s1 = smov 64  }
 0x41f   : > { %1909 = vrot.lane.b32.xlu1 %v3198_v2, %s6112_s2  ;;  %s4198_s2 = smov 6  }
 0x485   : > { %v1872_v22 = vpop.permute.xlu1 %1871 }
 0x486   : > { %v1875_v48 = vsel %vm1874_vm8, 0.0, %v1872_v22  ;;  %v1876_v38 = vsel %vm1874_vm8, %v1872_v22, 0.0 }
 0x487   : > { %v1882_v35 = vmul.f32 %v5384_v1, %v1875_v48  ;;  %v1883_v51 = vmul.f32 %v5384_v1, %v1876_v38  ;;  %v1894_v20 = vmul.f32 %v5386_v7, %v1875_v48  ;;  %v1895_v63 = vmul.f32 %v5386_v7, %v1876_v38 }
 0x488   : > { %v1906_v14 = vmul.f32 %v5401_v50, %v1875_v48  ;;  %v1907_v42 = vmul.f32 %v5401_v50, %v1876_v38  ;;  %v1918_v54 = vmul.f32 %v5413_v5, %v1875_v48  ;;  %v1919_v3 = vmul.f32 %v5413_v5, %v1876_v38 }
 0x489   : > { %v5394_v41 = vpop.permute.xlu1 %1885  ;;  %v4022_v37 = vpack.i.bf16 %v1883_v51, %v1882_v35  ;;  %v4032_v4 = vpack.i.bf16 %v1895_v63, %v1894_v20  ;;  %v1877_v40 = vmul.f32 %v5436_v23, %v1875_v48  ;;  %v1979_v35 = vld [vmem:[%s5938_s4] sm:$0xff] }
 0x48a   : > { %v1888_v11 = vmul.f32 %v5394_v41, %v1875_v48  ;;  %v1889_v0 = vmul.f32 %v5394_v41, %v1876_v38  ;;  %v4042_v9 = vpack.i.bf16 %v1907_v42, %v1906_v14 }
 0x48b   : > { %4023 = vrot.lane.b32.xlu1 %v4022_v37, %s6082_s23 }
 0x48c   : > { %v4027_v47 = vpack.i.bf16 %v1889_v0, %v1888_v11 }
 0x48d   : > { %v5403_v30 = vpop.permute.xlu1 %1897 }
 0x48e   : > { %4028 = vrot.lane.b32.xlu0 %v4027_v47, %s6087_s16  ;;  %v1900_v45 = vmul.f32 %v5403_v30, %v1875_v48  ;;  %v1901_v62 = vmul.f32 %v5403_v30, %v1876_v38 }
 0x48f   : > { %4033 = vrot.lane.b32.xlu1 %v4032_v4, %s6005_s28 }
 0x490   : > { %v4037_v55 = vpack.i.bf16 %v1901_v62, %v1900_v45 }
 0x491   : > { %v5411_v26 = vpop.permute.xlu1 %1909 }
 0x492   : > { %4038 = vrot.lane.b32.xlu0 %v4037_v55, %s4193_s18  ;;  %v1912_v36 = vmul.f32 %v5411_v26, %v1875_v48  ;;  %v1913_v12 = vmul.f32 %v5411_v26, %v1876_v38 }
 0x493   : > { %4043 = vrot.lane.b32.xlu1 %v4042_v9, %s6084_s25 }
 0x494   : > { %v4047_v58 = vpack.i.bf16 %v1913_v12, %v1912_v36 }
 0x496   : > { %4048 = vrot.lane.b32.xlu0 %v4047_v58, %s6004_s30 }
 0x497   : > { %1973 = vrot.lane.b32.xlu1 %v1918_v54, %s6083_s24 }
 0x49a   : > { %1975 = vrot.lane.b32.xlu0 %v1919_v3, %s6083_s24 }
 0x49b   : > { %1983 = vperm.xlu1 %3951, %v1980_v53  }
 0x4fd   : > { %v4024_v57 = vpop.permute.xlu1 %4023 }
 0x4fe   : > { %v4026_v28 = vunpack.i.h.bf16 %v4024_v57  ;;  %v4025_v46 = vunpack.i.l.bf16 %v4024_v57 }
 0x500   : > { %v1926_v39 = vsel %vm1048_vm9, %v4025_v46, %v4026_v28  ;;  %v4029_v8 = vpop.permute.xlu0 %4028 }
 0x501   : > { %v3654_v34 = vpack.c.bf16 %v1926_v39, %v1877_v40  ;;  %v4031_v56 = vunpack.i.h.bf16 %v4029_v8  ;;  %v4030_v10 = vunpack.i.l.bf16 %v4029_v8  ;;  %v4034_v24 = vpop.permute.xlu1 %4033 }
 0x502   : > { %v4036_v19 = vunpack.i.h.bf16 %v4034_v24  ;;  %v4035_v44 = vunpack.i.l.bf16 %v4034_v24  ;;  %v2138_v24 = vld [vmem:[%s5941_s7] sm:$0xff] }
 0x503   : > { %v1934_v60 = vsel %vm1072_vm6, %v4030_v10, %v4031_v56  ;;  %3655 = vmatpush3.bf16.msra.mxu0 %v3654_v34 }
 0x504   : > { %v1943_v43 = vsel %vm1942_vm11, %v4035_v44, %v4036_v19  ;;  %v4039_v25 = vpop.permute.xlu0 %4038  ;;  %3656 = vmatprep.subr.bf16.mxu0 %v4191_v59 }
 0x505   : > { %v3657_v29 = vpack.c.bf16 %v1943_v43, %v1934_v60  ;;  %v4041_v18 = vunpack.i.h.bf16 %v4039_v25  ;;  %v4040_v16 = vunpack.i.l.bf16 %v4039_v25  ;;  %v4044_v21 = vpop.permute.xlu1 %4043 }
 0x506   : > { %v4046_v15 = vunpack.i.h.bf16 %v4044_v21  ;;  %v4045_v32 = vunpack.i.l.bf16 %v4044_v21 }
 0x507   : > { %v1952_v17 = vsel %vm1951_vm2, %v4040_v16, %v4041_v18  ;;  %3658 = vmatpush3.bf16.msra.mxu0 %v3657_v29 }
 0x508   : > { %v3660_v52 = vpack.c.bf16 %v1952_v17, %v5366_v31  ;;  %v4049_v49 = vpop.permute.xlu0 %4048  ;;  %3659 = vmatprep.subr.bf16.mxu0 %v4191_v59  ;;  %v1960_v27 = vsel %vm1096_vm4, %v4045_v32, %v4046_v15 }
 0x509   : > { %v4051_v61 = vunpack.i.h.bf16 %v4049_v49  ;;  %v4050_v13 = vunpack.i.l.bf16 %v4049_v49  ;;  %v1974_v38 = vpop.permute.xlu1 %1973 }
 0x50b   : > { %v1969_v2 = vsel %vm1968_vm10, %v4050_v13, %v4051_v61  ;;  %3661 = vmatpush3.bf16.msra.mxu0 %v3660_v52 }
 0x50c   : > { %v3663_v22 = vpack.c.bf16 %v1969_v2, %v1960_v27  ;;  %3662 = vmatprep.subr.bf16.mxu0 %v4191_v59  ;;  %v1976_v48 = vpop.permute.xlu0 %1975 }
 0x50d   : > { %v1977_v51 = vsel %vm1120_vm7, %v1974_v38, %v1976_v48 }
 0x50f   : > { %3664 = vmatpush3.bf16.msra.mxu0 %v3663_v22 }
 0x510   : > { %3414 = vmatprep.subr.mxu0 %v6101_v33 }
 0x513   : > { %3415 = vmatpush3.msra.mxu0 %v1977_v51 }
 0x514   : > { %3417 = vmatmul.mubr.msk.f32.vlgmr.msra.gmra.mrb[4].mxu0 %vm6010_vm15, %v1979_v35  ;;  %3677 = vmatprep.subr.bf16.mxu0 %v4191_v59 }
 0x515   : > { %3458 = vmatprep.mubr.msk.f32.mxu0 %vm6011_vm1, %v6101_v33 }
 0x51a   : > { %v1984_v37 = vpop.permute.xlu1 %1983 }
 0x5e7   : > { %v2055_v20 = vpop.f32.mrb[4].mxu0 }
 0x5e8   : > { %v5458_v63 = vadd.f32 %v2055_v20, %v1984_v37  ;;  %v3418_v11 = vpop.f32.mrb[5].mxu0 }
 0x5ea   : > { %v2059_v0 = vmax.f32 %v5458_v63, 0.0 }
 0x5ec   : > { %2061 = vrot.lane.b32.xlu0 %v2059_v0, %s6007_s22 }
 0x65e   : > { %v2062_v47 = vpop.permute.xlu0 %2061 }
 0x65f   : > { %v2064_v4 = vsel %vm1874_vm8, 0.0, %v2062_v47  ;;  %v2065_v14 = vsel %vm1874_vm8, %v2062_v47, 0.0 }
 0x660   : > { %v2069_v42 = vmul.f32 %v2064_v4, %v5394_v41  ;;  %v2070_v45 = vmul.f32 %v2065_v14, %v5394_v41  ;;  %v2067_v62 = vmul.f32 %v2064_v4, %v5384_v1  ;;  %v2068_v55 = vmul.f32 %v2065_v14, %v5384_v1 }
 0x661   : > { %v2073_v9 = vmul.f32 %v2064_v4, %v5403_v30  ;;  %v2074_v36 = vmul.f32 %v2065_v14, %v5403_v30  ;;  %v2071_v54 = vmul.f32 %v2064_v4, %v5386_v7  ;;  %v2072_v3 = vmul.f32 %v2065_v14, %v5386_v7 }
 0x662   : > { %v4057_v12 = vpack.i.bf16 %v2070_v45, %v2069_v42  ;;  %v4052_v58 = vpack.i.bf16 %v2068_v55, %v2067_v62  ;;  %v2077_v53 = vmul.f32 %v2064_v4, %v5411_v26  ;;  %v2078_v57 = vmul.f32 %v2065_v14, %v5411_v26  ;;  %v2137_v62 = vld [vmem:[%s5940_s6] sm:$0xff] }
 0x663   : > { %v4067_v28 = vpack.i.bf16 %v2074_v36, %v2073_v9  ;;  %v4062_v46 = vpack.i.bf16 %v2072_v3, %v2071_v54  ;;  %v2075_v40 = vmul.f32 %v2064_v4, %v5401_v50  ;;  %v2076_v39 = vmul.f32 %v2065_v14, %v5401_v50 }
 0x664   : > { %4058 = vrot.lane.b32.xlu0 %v4057_v12, %s6087_s16  ;;  %4053 = vrot.lane.b32.xlu1 %v4052_v58, %s6082_s23  ;;  %v4077_v8 = vpack.i.bf16 %v2078_v57, %v2077_v53  ;;  %v2080_v56 = vmul.f32 %v2065_v14, %v5413_v5  ;;  %v2079_v10 = vmul.f32 %v2064_v4, %v5413_v5 }
 0x665   : > { %v4072_v34 = vpack.i.bf16 %v2076_v39, %v2075_v40  ;;  %v2066_v25 = vmul.f32 %v5436_v23, %v2064_v4 }
 0x668   : > { %4068 = vrot.lane.b32.xlu0 %v4067_v28, %s4193_s18  ;;  %4063 = vrot.lane.b32.xlu1 %v4062_v46, %s6005_s28 }
 0x66c   : > { %4078 = vrot.lane.b32.xlu0 %v4077_v8, %s6004_s30  ;;  %4073 = vrot.lane.b32.xlu1 %v4072_v34, %s6084_s25 }
 0x670   : > { %2133 = vrot.lane.b32.xlu0 %v2080_v56, %s6083_s24  ;;  %2131 = vrot.lane.b32.xlu1 %v2079_v10, %s6083_s24 }
 0x674   : > { %2141 = vperm.xlu1 %3951, %v2138_v24  }
 0x6d6   : > { %v4059_v19 = vpop.permute.xlu0 %4058  ;;  %v4054_v44 = vpop.permute.xlu1 %4053 }
 0x6d7   : > { %v4056_v60 = vunpack.i.h.bf16 %v4054_v44  ;;  %v4055_v43 = vunpack.i.l.bf16 %v4054_v44  ;;  %v4061_v29 = vunpack.i.h.bf16 %v4059_v19  ;;  %v4060_v18 = vunpack.i.l.bf16 %v4059_v19 }
 0x6d9   : > { %v2087_v16 = vsel %vm1048_vm9, %v4055_v43, %v4056_v60  ;;  %v2095_v13 = vsel %vm1072_vm6, %v4060_v18, %v4061_v29 }
 0x6da   : > { %v3666_v21 = vpack.c.bf16 %v2087_v16, %v2066_v25  ;;  %v4069_v17 = vpop.permute.xlu0 %4068  ;;  %v4064_v15 = vpop.permute.xlu1 %4063 }
 0x6db   : > { %v4071_v32 = vunpack.i.h.bf16 %v4069_v17  ;;  %v4070_v52 = vunpack.i.l.bf16 %v4069_v17  ;;  %v4066_v49 = vunpack.i.h.bf16 %v4064_v15  ;;  %v4065_v61 = vunpack.i.l.bf16 %v4064_v15  ;;  %v2297_v17 = vld [vmem:[%s5943_s9] sm:$0xff] }
 0x6dc   : > { %3667 = vmatpush3.bf16.msra.mxu1 %v3666_v21 }
 0x6dd   : > { %v2103_v27 = vsel %vm1942_vm11, %v4065_v61, %v4066_v49  ;;  %3668 = vmatprep.subr.bf16.mxu1 %v4191_v59  ;;  %v2111_v2 = vsel %vm1951_vm2, %v4070_v52, %v4071_v32 }
 0x6de   : > { %v3669_v22 = vpack.c.bf16 %v2103_v27, %v2095_v13  ;;  %v4079_v48 = vpop.permute.xlu0 %4078  ;;  %v4074_v38 = vpop.permute.xlu1 %4073  ;;  %v3672_v11 = vpack.c.bf16 %v2111_v2, %v2059_v0 }
 0x6df   : > { %v4081_v35 = vunpack.i.h.bf16 %v4079_v48  ;;  %v4080_v51 = vunpack.i.l.bf16 %v4079_v48  ;;  %v4076_v37 = vunpack.i.h.bf16 %v4074_v38  ;;  %v4075_v20 = vunpack.i.l.bf16 %v4074_v38 }
 0x6e0   : > { %3670 = vmatpush3.bf16.msra.mxu1 %v3669_v22 }
 0x6e1   : > { %3671 = vmatprep.subr.bf16.mxu1 %v4191_v59  ;;  %v2127_v47 = vsel %vm1968_vm10, %v4080_v51, %v4081_v35  ;;  %v2119_v4 = vsel %vm1096_vm4, %v4075_v20, %v4076_v37 }
 0x6e2   : > { %v3675_v14 = vpack.c.bf16 %v2127_v47, %v2119_v4  ;;  %v2134_v42 = vpop.permute.xlu0 %2133  ;;  %v2132_v45 = vpop.permute.xlu1 %2131 }
 0x6e3   : > { %v2135_v63 = vsel %vm1120_vm7, %v2132_v45, %v2134_v42 }
 0x6e4   : > { %3673 = vmatpush3.bf16.msra.mxu1 %v3672_v11 }
 0x6e5   : > { %3674 = vmatprep.subr.bf16.mxu1 %v4191_v59 }
 0x6e8   : > { %3676 = vmatpush3.bf16.msra.mxu1 %v3675_v14 }
 0x6e9   : > { %3435 = vmatprep.subr.mxu1 %v6101_v33 }
 0x6ec   : > { %3436 = vmatpush3.msra.mxu1 %v2135_v63 }
 0x6ed   : > { %3438 = vmatmul.mubr.msk.f32.vlgmr.msra.gmra.mrb[4].mxu1 %vm6010_vm15, %v2137_v62  ;;  %3689 = vmatprep.subr.bf16.mxu1 %v4191_v59 }
 0x6ee   : > { %3493 = vmatprep.mubr.msk.f32.mxu1 %vm6011_vm1, %v6101_v33 }
 0x6f3   : > { %v2142_v0 = vpop.permute.xlu1 %2141 }
 0x7c0   : > { %v2213_v55 = vpop.f32.mrb[4].mxu1 }
 0x7c1   : > { %v2214_v9 = vadd.f32 %v2213_v55, %v2142_v0  ;;  %v3439_v36 = vpop.f32.mrb[5].mxu1 }
 0x7c3   : > { %v2217_v12 = vmax.f32 %v2214_v9, 0.0 }
 0x7c5   : > { %v5513_v58 = vadd.f32 %v2217_v12, %v5366_v31 }
 0x7c7   : > { %2220 = vrot.lane.b32.xlu0 %v5513_v58, %s6007_s22 }
 0x839   : > { %v2221_v54 = vpop.permute.xlu0 %2220 }
 0x83a   : > { %v2223_v3 = vsel %vm1874_vm8, 0.0, %v2221_v54  ;;  %v2224_v53 = vsel %vm1874_vm8, %v2221_v54, 0.0 }
 0x83b   : > { %v2228_v57 = vmul.f32 %v2223_v3, %v5394_v41  ;;  %v2229_v28 = vmul.f32 %v2224_v53, %v5394_v41  ;;  %v2226_v46 = vmul.f32 %v2223_v3, %v5384_v1  ;;  %v2227_v40 = vmul.f32 %v2224_v53, %v5384_v1 }
 0x83c   : > { %v2232_v39 = vmul.f32 %v2223_v3, %v5403_v30  ;;  %v2233_v31 = vmul.f32 %v2224_v53, %v5403_v30  ;;  %v2230_v56 = vmul.f32 %v2223_v3, %v5386_v7  ;;  %v2231_v10 = vmul.f32 %v2224_v53, %v5386_v7 }
 0x83d   : > { %v4087_v8 = vpack.i.bf16 %v2229_v28, %v2228_v57  ;;  %v4082_v34 = vpack.i.bf16 %v2227_v40, %v2226_v46  ;;  %v2236_v24 = vmul.f32 %v2223_v3, %v5411_v26  ;;  %v2237_v19 = vmul.f32 %v2224_v53, %v5411_v26  ;;  %v2296_v57 = vld [vmem:[%s5942_s8] sm:$0xff] }
 0x83e   : > { %v4097_v44 = vpack.i.bf16 %v2233_v31, %v2232_v39  ;;  %v4092_v60 = vpack.i.bf16 %v2231_v10, %v2230_v56  ;;  %v2234_v43 = vmul.f32 %v2223_v3, %v5401_v50  ;;  %v2235_v25 = vmul.f32 %v2224_v53, %v5401_v50  ;;  %v2464_v56 = vld [vmem:[%s5944_s10 + $0x10] sm:$0xff] }
 0x83f   : > { %4088 = vrot.lane.b32.xlu0 %v4087_v8, %s6087_s16  ;;  %4083 = vrot.lane.b32.xlu1 %v4082_v34, %s6082_s23  ;;  %v4107_v29 = vpack.i.bf16 %v2237_v19, %v2236_v24  ;;  %v2239_v16 = vmul.f32 %v2224_v53, %v5413_v5  ;;  %v2238_v21 = vmul.f32 %v2223_v3, %v5413_v5  ;;  %v2462_v8 = vld [vmem:[%s5944_s10] sm:$0xff]  ;;  %v2463_v34 = vld [vmem:[%s5944_s10 + $0x8] sm:$0xff] }
 0x840   : > { %v4102_v18 = vpack.i.bf16 %v2235_v25, %v2234_v43  ;;  %v2225_v61 = vmul.f32 %v5436_v23, %v2223_v3  ;;  %v3690_v10 = vpack.c.bf16 %v2463_v34, %v2462_v8  ;;  %v2465_v24 = vld [vmem:[%s5944_s10 + $0x18] sm:$0xff]  ;;  %v2468_v25 = vld [vmem:[%s5944_s10 + $0x30] sm:$0xff] }
 0x841   : > { %v3693_v19 = vpack.c.bf16 %v2465_v24, %v2464_v56 }
 0x842   : > { %3691 = vmatpush3.bf16.msra.mxu1 %v3690_v10 }
 0x843   : > { %4098 = vrot.lane.b32.xlu0 %v4097_v44, %s4193_s18  ;;  %4093 = vrot.lane.b32.xlu1 %v4092_v60, %s6005_s28  ;;  %v2466_v44 = vld [vmem:[%s5944_s10 + $0x20] sm:$0xff]  ;;  %v2467_v60 = vld [vmem:[%s5944_s10 + $0x28] sm:$0xff]  ;;  %s6113_s28 = smov 120  }
 0x844   : > { %3692 = vmatprep.subr.bf16.mxu1 %v4191_v59  ;;  %v3696_v43 = vpack.c.bf16 %v2467_v60, %v2466_v44 }
 0x846   : > { %3694 = vmatpush3.bf16.msra.mxu1 %v3693_v19 }
 0x847   : > { %4108 = vrot.lane.b32.xlu0 %v4107_v29, %s6004_s30  ;;  %4103 = vrot.lane.b32.xlu1 %v4102_v18, %s6084_s25  ;;  %v2469_v29 = vld [vmem:[%s5944_s10 + $0x38] sm:$0xff]  ;;  %s6114_s30 = smov 111  }
 0x848   : > { %3695 = vmatprep.subr.bf16.mxu1 %v4191_v59  ;;  %v3699_v18 = vpack.c.bf16 %v2469_v29, %v2468_v25 }
 0x84a   : > { %3697 = vmatpush3.bf16.msra.mxu1 %v3696_v43 }
 0x84b   : > { %2292 = vrot.lane.b32.xlu0 %v2239_v16, %s6083_s24  ;;  %2290 = vrot.lane.b32.xlu1 %v2238_v21, %s6083_s24  ;;  %v2470_v16 = vld [vmem:[%s5944_s10 + $0x40] sm:$0xff]  ;;  %v2471_v21 = vld [vmem:[%s5944_s10 + $0x48] sm:$0xff] }
 0x84c   : > { %3698 = vmatprep.subr.bf16.mxu1 %v4191_v59 }
 0x84e   : > { %3700 = vmatpush3.bf16.msra.mxu1 %v3699_v18 }
 0x84f   : > { %2300 = vperm.xlu1 %3951, %v2297_v17   ;;  %3701 = vmatprep.subr.bf16.mxu1 %v4191_v59  ;;  %v3702_v17 = vpack.c.bf16 %v2471_v21, %v2470_v16 }
 0x852   : > { %3703 = vmatpush3.bf16.msra.mxu1 %v3702_v17 }
 0x853   : > { %3704 = vmatprep.subr.bf16.mxu1 %v4191_v59 }
 0x8b1   : > { %v4089_v15 = vpop.permute.xlu0 %4088  ;;  %v4084_v32 = vpop.permute.xlu1 %4083 }
 0x8b2   : > { %v4086_v52 = vunpack.i.h.bf16 %v4084_v32  ;;  %v4085_v49 = vunpack.i.l.bf16 %v4084_v32  ;;  %v4091_v13 = vunpack.i.h.bf16 %v4089_v15  ;;  %v4090_v27 = vunpack.i.l.bf16 %v4089_v15  ;;  %v2472_v32 = vld [vmem:[%s5944_s10 + $0x50] sm:$0xff] }
 0x8b4   : > { %v2246_v2 = vsel %vm1048_vm9, %v4085_v49, %v4086_v52  ;;  %v2254_v11 = vsel %vm1072_vm6, %v4090_v27, %v4091_v13  ;;  %v2473_v52 = vld [vmem:[%s5944_s10 + $0x58] sm:$0xff] }
 0x8b5   : > { %v3678_v22 = vpack.c.bf16 %v2246_v2, %v2225_v61  ;;  %v4099_v48 = vpop.permute.xlu0 %4098  ;;  %v4094_v38 = vpop.permute.xlu1 %4093  ;;  %v3705_v13 = vpack.c.bf16 %v2473_v52, %v2472_v32 }
 0x8b6   : > { %v4101_v35 = vunpack.i.h.bf16 %v4099_v48  ;;  %v4100_v51 = vunpack.i.l.bf16 %v4099_v48  ;;  %v4096_v37 = vunpack.i.h.bf16 %v4094_v38  ;;  %v4095_v20 = vunpack.i.l.bf16 %v4094_v38 }
 0x8b7   : > { %3679 = vmatpush3.bf16.msra.mxu0 %v3678_v22  ;;  %3706 = vmatpush3.bf16.msra.mxu1 %v3705_v13 }
 0x8b8   : > { %v2262_v47 = vsel %vm1942_vm11, %v4095_v20, %v4096_v37  ;;  %3680 = vmatprep.subr.bf16.mxu0 %v4191_v59  ;;  %v2270_v4 = vsel %vm1951_vm2, %v4100_v51, %v4101_v35  ;;  %3707 = vmatprep.subr.bf16.mxu1 %v4191_v59 }
 0x8b9   : > { %v3681_v14 = vpack.c.bf16 %v2262_v47, %v2254_v11  ;;  %v4109_v42 = vpop.permute.xlu0 %4108  ;;  %v4104_v45 = vpop.permute.xlu1 %4103  ;;  %v3684_v9 = vpack.c.bf16 %v2270_v4, %v5513_v58 }
 0x8ba   : > { %v4111_v62 = vunpack.i.h.bf16 %v4109_v42  ;;  %v4110_v63 = vunpack.i.l.bf16 %v4109_v42  ;;  %v4106_v0 = vunpack.i.h.bf16 %v4104_v45  ;;  %v4105_v55 = vunpack.i.l.bf16 %v4104_v45 }
 0x8bb   : > { %3682 = vmatpush3.bf16.msra.mxu0 %v3681_v14 }
 0x8bc   : > { %3683 = vmatprep.subr.bf16.mxu0 %v4191_v59  ;;  %v2286_v36 = vsel %vm1968_vm10, %v4110_v63, %v4111_v62  ;;  %v2278_v12 = vsel %vm1096_vm4, %v4105_v55, %v4106_v0  ;;  %v2476_v62 = vld [vmem:[%s5944_s10 + $0x70] sm:$0xff]  ;;  %v2477_v63 = vld [vmem:[%s5944_s10 + $0x78] sm:$0xff]  ;;  %v2548_v55 = vand.u32 3, %v6093_v6 }
 0x8bd   : > { %v3687_v54 = vpack.c.bf16 %v2286_v36, %v2278_v12  ;;  %v2293_v3 = vpop.permute.xlu0 %2292  ;;  %v2291_v53 = vpop.permute.xlu1 %2290  ;;  %v3711_v0 = vpack.c.bf16 %v2477_v63, %v2476_v62 }
 0x8be   : > { %v2294_v28 = vsel %vm1120_vm7, %v2291_v53, %v2293_v3  ;;  %v5658_v3 = vadd.s32 4294967295, %v2548_v55 }
 0x8bf   : > { %3685 = vmatpush3.bf16.msra.mxu0 %v3684_v9 }
 0x8c0   : > { %3686 = vmatprep.subr.bf16.mxu0 %v4191_v59  ;;  %vm2556_vm3 = vcmp.ge.s32.totalorder %v5658_v3, 0 }
 0x8c3   : > { %3688 = vmatpush3.bf16.msra.mxu0 %v3687_v54 }
 0x8c4   : > { %3456 = vmatprep.subr.mxu0 %v6101_v33 }
 0x8c7   : > { %3457 = vmatpush3.msra.mxu0 %v2294_v28 }
 0x8c8   : > { %3459 = vmatmul.mubr.msk.f32.vlgmr.msra.gmra.mrb[6].mxu0 %vm6010_vm15, %v2296_v57  ;;  %3713 = vmatprep.subr.bf16.mxu0 %v4191_v59 }
 0x8c9   : > { %3514 = vmatprep.mubr.msk.f32.mxu0 %vm6011_vm1, %v6101_v33 }
 0x8ce   : > { %v2301_v58 = vpop.permute.xlu1 %2300 }
 0x99b   : > { %v2372_v46 = vpop.f32.mrb[6].mxu0 }
 0x99c   : > { %v5564_v40 = vadd.f32 %v2372_v46, %v2301_v58  ;;  %v3460_v39 = vpop.f32.mrb[7].mxu0 }
 0x99e   : > { %v2376_v31 = vmax.f32 %v5564_v40, 0.0 }
 0x9a0   : > { %2378 = vrot.lane.b32.xlu0 %v2376_v31, %s6007_s22  ;;  %s4197_s22 = smov 5  }
 0xa12   : > { %v2379_v15 = vpop.permute.xlu0 %2378 }
 0xa13   : > { %v5612_v49 = vsel %vm1874_vm8, 0.0, %v2379_v15  ;;  %v2382_v61 = vsel %vm1874_vm8, %v2379_v15, 0.0 }
 0xa14   : > { %v2396_v27 = vmul.f32 %v5612_v49, %v5394_v41  ;;  %v2397_v2 = vmul.f32 %v2382_v61, %v5394_v41  ;;  %v2385_v22 = vmul.f32 %v5612_v49, %v5384_v1  ;;  %v2386_v48 = vmul.f32 %v2382_v61, %v5384_v1  ;;  %v2474_v41 = vld [vmem:[%s5944_s10 + $0x60] sm:$0xff]  ;;  %v2475_v1 = vld [vmem:[%s5944_s10 + $0x68] sm:$0xff] }
 0xa15   : > { %v2418_v38 = vmul.f32 %v5612_v49, %v5403_v30  ;;  %v2419_v35 = vmul.f32 %v2382_v61, %v5403_v30  ;;  %v2407_v20 = vmul.f32 %v5612_v49, %v5386_v7  ;;  %v2408_v11 = vmul.f32 %v2382_v61, %v5386_v7 }
 0xa16   : > { %v4117_v51 = vpack.i.bf16 %v2397_v2, %v2396_v27  ;;  %v4112_v37 = vpack.i.bf16 %v2386_v48, %v2385_v22  ;;  %v2440_v30 = vmul.f32 %v5612_v49, %v5411_v26  ;;  %v2441_v47 = vmul.f32 %v2382_v61, %v5411_v26 }
 0xa17   : > { %v3708_v7 = vpack.c.bf16 %v2475_v1, %v2474_v41  ;;  %v4127_v4 = vpack.i.bf16 %v2419_v35, %v2418_v38  ;;  %v4122_v14 = vpack.i.bf16 %v2408_v11, %v2407_v20  ;;  %v2429_v42 = vmul.f32 %v5612_v49, %v5401_v50 }
 0xa18   : > { %4118 = vrot.lane.b32.xlu0 %v4117_v51, %s6087_s16  ;;  %4113 = vrot.lane.b32.xlu1 %v4112_v37, %s6082_s23  ;;  %v2430_v45 = vmul.f32 %v2382_v61, %v5401_v50  ;;  %v2549_v26 = vshra.s32 %v6093_v6, 2  ;;  %v4137_v9 = vpack.i.bf16 %v2441_v47, %v2440_v30  ;;  %v2451_v36 = vmul.f32 %v5612_v49, %v5413_v5 }
 0xa19   : > { %3709 = vmatpush3.bf16.msra.mxu1 %v3708_v7  ;;  %v2452_v12 = vmul.f32 %v2382_v61, %v5413_v5  ;;  %v2383_v56 = vmul.f32 %v5436_v23, %v5612_v49 }
 0xa1a   : > { %3710 = vmatprep.subr.bf16.mxu1 %v4191_v59  ;;  %v4132_v50 = vpack.i.bf16 %v2430_v45, %v2429_v42  ;;  %v2550_v54 = vand.u32 3, %v2549_v26 }
 0xa1b   : > { %v4142_v28 = vpack.i.bf16 %v2452_v12, %v2451_v36  ;;  %v2384_v25 = vmax.f32 %v2376_v31, %v2383_v56 }
 0xa1c   : > { %4128 = vrot.lane.b32.xlu0 %v4127_v4, %s4193_s18  ;;  %4123 = vrot.lane.b32.xlu1 %v4122_v14, %s6113_s28  ;;  %v2551_v53 = vadd.s32 4294967295, %v2550_v54  ;;  %vm2575_vm5 = vcmp.ge.s32.totalorder %v2550_v54, 0  ;;  %vm2576_vm0 = vcmp.lt.s32.totalorder %v2550_v54, 4  ;;  %v2586_v57 = vadd.s32 1, %v2550_v54 }
 0xa1d   : > { %3712 = vmatpush3.bf16.msra.mxu1 %v3711_v0  ;;  %vm5663_vm13 = vmand %vm2575_vm5, %vm2576_vm0  ;;  %v2568_v4 = vadd.s32 1, %v2548_v55 }
 0xa1e   : > { %3725 = vmatprep.subr.bf16.mxu1 %v4191_v59  ;;  %vm2552_vm14 = vcmp.ge.s32.totalorder %v2551_v53, 0  ;;  %vm2553_vm8 = vcmp.lt.s32.totalorder %v2551_v53, 4  ;;  %vm2587_vm15 = vcmp.ge.s32.totalorder %v2586_v57, 0  ;;  %vm2588_vm1 = vcmp.lt.s32.totalorder %v2586_v57, 4  ;;  %vm2578_vm5 = vmand %vm5663_vm13, %vm2556_vm3 }
 0xa1f   : > { %vm5667_vm12 = vmand %vm2552_vm14, %vm2553_vm8  ;;  %v3206_v8 = vsel %vm2578_vm5, 1.0, %v6101_v33  ;;  %vm6128_vm8 = vcmask 261120   ;;  %vm6130_vm5 = vcmask 785408  }
 0xa20   : > { %4138 = vrot.lane.b32.xlu0 %v4137_v9, %s6114_s30  ;;  %4133 = vrot.lane.b32.xlu1 %v4132_v50, %s6084_s25  ;;  %v3204_v46 = vsel %vm5667_vm12, 1.0, %v6101_v33  ;;  %vm5680_vm0 = vmand %vm2587_vm15, %vm2588_vm1  ;;  %s6121_s25 = smov 8   ;;  %vm2606_vm1 = vcmask 39936  }
 0xa21   : > { %vm2590_vm14 = vmand %vm5680_vm0, %vm2556_vm3  ;;  %v3209_v63 = vsel %vm5680_vm0, 1.0, %v6101_v33 }
 0xa22   : > { %v3208_v34 = vsel %vm2590_vm14, 1.0, %v6101_v33  ;;  %vm3102_vm14 = vcmask 516096  }
 0xa24   : > { %4143 = vrot.lane.b32.xlu1 %v4142_v28, %s6083_s24  ;;  %s4196_s24 = smov 4  }
 0xa28   : > { %2612 = vrot.lane.b32.xlu1 %v3204_v46, %s6102_s26  ;;  %s6123_s26 = smov 10  }
 0xa2c   : > { %2622 = vrot.lane.b32.xlu1 %v3206_v8, %s4196_s24 }
 0xa30   : > { %2632 = vrot.lane.b32.xlu1 %v3208_v34, %s6121_s25 }
 0xa8a   : > { %v4119_v10 = vpop.permute.xlu0 %4118  ;;  %v4114_v24 = vpop.permute.xlu1 %4113 }
 0xa8b   : > { %v4121_v19 = vunpack.i.h.bf16 %v4119_v10  ;;  %v4120_v44 = vunpack.i.l.bf16 %v4119_v10  ;;  %v4116_v60 = vunpack.i.h.bf16 %v4114_v24  ;;  %v4115_v43 = vunpack.i.l.bf16 %v4114_v24  ;;  %v2675_v10 = vld [vmem:[%s5946_s12] sm:$0xff] }
 0xa8d   : > { %v2393_v29 = vsel %vm1048_vm9, %v4115_v43, %v4116_v60  ;;  %v2404_v18 = vsel %vm1072_vm6, %v4120_v44, %v4121_v19  ;;  %vm6122_vm9 = vmmov 0   ;;  %vm2571_vm6 = vcmp.lt.s32.totalorder %v2568_v4, 4 }
 0xa8e   : > { %v2395_v16 = vmax.f32 %v2384_v25, %v2393_v29  ;;  %v4129_v21 = vpop.permute.xlu0 %4128  ;;  %v4124_v17 = vpop.permute.xlu1 %4123  ;;  %vm2572_vm15 = vmand %vm5667_vm12, %vm2571_vm6 }
 0xa8f   : > { %v4131_v15 = vunpack.i.h.bf16 %v4129_v21  ;;  %v4130_v32 = vunpack.i.l.bf16 %v4129_v21  ;;  %v4126_v52 = vunpack.i.h.bf16 %v4124_v17  ;;  %v4125_v23 = vunpack.i.l.bf16 %v4124_v17  ;;  %v2674_v17 = vld [vmem:[%s5945_s11] sm:$0xff] }
 0xa90   : > { %v2406_v49 = vmax.f32 %v2395_v16, %v2404_v18  ;;  %v3205_v6 = vsel %vm2572_vm15, 1.0, %v6101_v33 }
 0xa91   : > { %v2415_v61 = vsel %vm1942_vm11, %v4125_v23, %v4126_v52  ;;  %v2426_v13 = vsel %vm1951_vm2, %v4130_v32, %v4131_v15  ;;  %vm2608_vm11 = vcmask 302080   ;;  %vm2557_vm2 = vmand %vm5667_vm12, %vm2556_vm3  ;;  %vm6125_vm3 = vcmask 588800  }
 0xa92   : > { %v2417_v27 = vmax.f32 %v2406_v49, %v2415_v61  ;;  %v4139_v2 = vpop.permute.xlu0 %4138  ;;  %v4134_v40 = vpop.permute.xlu1 %4133  ;;  %v3203_v24 = vsel %vm2557_vm2, 1.0, %v6101_v33  ;;  %vm6126_vm12 = vmmov %vm6125_vm3 }
 0xa93   : > { %v4141_v31 = vunpack.i.h.bf16 %v4139_v2  ;;  %v4140_v22 = vunpack.i.l.bf16 %v4139_v2  ;;  %v4136_v48 = vunpack.i.h.bf16 %v4134_v40  ;;  %v4135_v38 = vunpack.i.l.bf16 %v4134_v40 }
 0xa94   : > { %v2428_v35 = vmax.f32 %v2417_v27, %v2426_v13 }
 0xa95   : > { %v2437_v51 = vsel %vm1096_vm4, %v4135_v38, %v4136_v48  ;;  %v2448_v11 = vsel %vm1968_vm10, %v4140_v22, %v4141_v31  ;;  %vm2599_vm4 = vmand %vm5680_vm0, %vm2571_vm6  ;;  %vm2907_vm10 = vcmask 523264  }
 0xa96   : > { %v2439_v37 = vmax.f32 %v2428_v35, %v2437_v51  ;;  %v4144_v20 = vpop.permute.xlu1 %4143  ;;  %v3210_v14 = vsel %vm2599_vm4, 1.0, %v6101_v33  ;;  %v2798_v51 = vld [vmem:[%s5948_s14] sm:$0xff]  ;;  %vm6131_vm0 = vmmov %vm6130_vm5 }
 0xa97   : > { %v4146_v41 = vunpack.i.h.bf16 %v4144_v20  ;;  %v4145_v1 = vunpack.i.l.bf16 %v4144_v20  ;;  %2642 = vrot.lane.b32.xlu1 %v3210_v14, %s6123_s26 }
 0xa98   : > { %v2450_v30 = vmax.f32 %v2439_v37, %v2448_v11 }
 0xa99   : > { %v2459_v47 = vsel %vm1120_vm7, %v4145_v1, %v4146_v41  ;;  %vm2583_vm7 = vmand %vm5663_vm13, %vm2571_vm6 }
 0xa9a   : > { %v2461_v7 = vmax.f32 %v2450_v30, %v2459_v47  ;;  %v3207_v62 = vsel %vm2583_vm7, 1.0, %v6101_v33  ;;  %v5726_v0 = vpop.permute.xlu1 %2612  ;;  %vm6129_vm13 = vmmov %vm6128_vm8 }
 0xa9c   : > { %3494 = vmatmul.mubr.f32.vlgmr.msra.gmra.mrb[6].mxu1 %v2461_v7 }
 0xa9d   : > { %3535 = vmatprep.mubr.msk.f32.mxu1 %vm6122_vm9, %v6101_v33 }
 0xa9e   : > { %v5728_v26 = vpop.permute.xlu1 %2622 }
 0xaa2   : > { %v5734_v53 = vpop.permute.xlu1 %2632 }
 0xb09   : > { %v2643_v39 = vpop.permute.xlu1 %2642 }
 0xb6f   : > { %v5713_v42 = vpop.f32.mrb[6].mxu1 }
 0xb70   : > { %2603 = vrot.lane.b32.xlu0 %v5713_v42, %s4197_s22  ;;  %v3495_v45 = vpop.f32.mrb[7].mxu1 }
 0xb74   : > { %2617 = vrot.lane.b32.xlu0 %v3205_v6, %s6111_s19  ;;  %s4199_s19 = smov 124  }
 0xb78   : > { %2627 = vrot.lane.b32.xlu0 %v3207_v62, %s4198_s2  ;;  %v2797_v62 = vld [vmem:[%s5947_s13] sm:$0xff] }
 0xb7c   : > { %2637 = vrot.lane.b32.xlu0 %v3209_v63, %s6124_s29  ;;  %s6133_s29 = sld [smem:[#allocation20_spill]] }
 0xbe2   : > { %v2604_v55 = vpop.permute.xlu0 %2603 }
 0xbe3   : > { %v2607_v9 = vsel %vm2606_vm1, 0.0, %v2604_v55  ;;  %v2915_v55 = vld [vmem:[%s5949_s15] sm:$0xff] }
 0xbe4   : > { %v2609_v50 = vsel %vm2608_vm11, %v2607_v9, 0.0 }
 0xbe5   : > { %v2615_v36 = vmul.f32 %v5726_v0, %v2609_v50  ;;  %v2625_v57 = vmul.f32 %v5728_v26, %v2609_v50  ;;  %v2635_v46 = vmul.f32 %v5734_v53, %v2609_v50  ;;  %v2645_v56 = vmul.f32 %v2643_v39, %v2609_v50 }
 0xbe6   : > { %v2618_v12 = vpop.permute.xlu0 %2617  ;;  %v2610_v19 = vmul.f32 %v3203_v24, %v2609_v50 }
 0xbe7   : > { %v2620_v54 = vmul.f32 %v2618_v12, %v2609_v50  ;;  %2647 = vrot.lane.b32.xlu0 %v2615_v36, %s6082_s23  ;;  %v2934_v36 = vld [vmem:[%s5949_s15 + $0x98] sm:$0xff] }
 0xbe9   : > { %2651 = vrot.lane.b32.xlu1 %v2620_v54, %s6087_s16 }
 0xbea   : > { %v2628_v28 = vpop.permute.xlu0 %2627 }
 0xbeb   : > { %v2630_v5 = vmul.f32 %v2628_v28, %v2609_v50  ;;  %2655 = vrot.lane.b32.xlu0 %v2625_v57, %s4199_s19  ;;  %v2918_v57 = vld [vmem:[%s5949_s15 + $0x18] sm:$0xff] }
 0xbed   : > { %2659 = vrot.lane.b32.xlu1 %v2630_v5, %s4200_s0  ;;  %v2936_v5 = vld [vmem:[%s5949_s15 + $0xa8] sm:$0xff] }
 0xbee   : > { %v2638_v8 = vpop.permute.xlu0 %2637 }
 0xbef   : > { %v2640_v34 = vmul.f32 %v2638_v8, %v2609_v50  ;;  %2663 = vrot.lane.b32.xlu0 %v2635_v46, %s6113_s28  ;;  %v2916_v50 = vld [vmem:[%s5949_s15 + $0x8] sm:$0xff] }
 0xbf1   : > { %2667 = vrot.lane.b32.xlu1 %v2640_v34, %s4201_s20  ;;  %v2920_v34 = vld [vmem:[%s5949_s15 + $0x28] sm:$0xff] }
 0xbf3   : > { %2671 = vrot.lane.b32.xlu0 %v2645_v56, %s4193_s18  ;;  %v2937_v56 = vld [vmem:[%s5949_s15 + $0xb0] sm:$0xff] }
 0xbf5   : > { %2678 = vperm.xlu1 %3951, %v2675_v10   ;;  %v2938_v10 = vld [vmem:[%s5949_s15 + $0xb8] sm:$0xff] }
 0xc59   : > { %v2648_v44 = vpop.permute.xlu0 %2647 }
 0xc5a   : > { %v3714_v60 = vpack.c.bf16 %v2648_v44, %v2610_v19  ;;  %v3749_v19 = vpack.c.bf16 %v2938_v10, %v2937_v56  ;;  %v2921_v44 = vld [vmem:[%s5949_s15 + $0x30] sm:$0xff] }
 0xc5b   : > { %v2652_v43 = vpop.permute.xlu1 %2651 }
 0xc5c   : > { %3715 = vmatpush3.bf16.msra.mxu0 %v3714_v60  ;;  %v2922_v60 = vld [vmem:[%s5949_s15 + $0x38] sm:$0xff] }
 0xc5d   : > { %v2656_v25 = vpop.permute.xlu0 %2655  ;;  %3716 = vmatprep.subr.bf16.mxu0 %v4191_v59 }
 0xc5e   : > { %v3717_v29 = vpack.c.bf16 %v2656_v25, %v2652_v43  ;;  %v2939_v43 = vld [vmem:[%s5949_s15 + $0xc0] sm:$0xff]  ;;  %v2940_v25 = vld [vmem:[%s5949_s15 + $0xc8] sm:$0xff] }
 0xc5f   : > { %v2660_v18 = vpop.permute.xlu1 %2659 }
 0xc60   : > { %3718 = vmatpush3.bf16.msra.mxu0 %v3717_v29  ;;  %v3720_v3 = vpack.c.bf16 %v2660_v18, %v5713_v42  ;;  %v3751_v29 = vpack.c.bf16 %v2922_v60, %v2921_v44  ;;  %v3753_v18 = vpack.c.bf16 %v2940_v25, %v2939_v43  ;;  %v3023_v25 = vld [vmem:[%s5951_s17 + $0x20] sm:$0xff] }
 0xc61   : > { %3719 = vmatprep.subr.bf16.mxu0 %v4191_v59  ;;  %v2664_v58 = vpop.permute.xlu0 %2663 }
 0xc63   : > { %v2668_v16 = vpop.permute.xlu1 %2667 }
 0xc64   : > { %3721 = vmatpush3.bf16.msra.mxu0 %v3720_v3  ;;  %v3723_v21 = vpack.c.bf16 %v2668_v16, %v2664_v58  ;;  %v2923_v3 = vld [vmem:[%s5949_s15 + $0x40] sm:$0xff]  ;;  %v2924_v16 = vld [vmem:[%s5949_s15 + $0x48] sm:$0xff]  ;;  %v2941_v58 = vld [vmem:[%s5949_s15 + $0xd0] sm:$0xff] }
 0xc65   : > { %3722 = vmatprep.subr.bf16.mxu0 %v4191_v59  ;;  %v2672_v15 = vpop.permute.xlu0 %2671 }
 0xc68   : > { %3724 = vmatpush3.bf16.msra.mxu0 %v3723_v21  ;;  %v2942_v21 = vld [vmem:[%s5949_s15 + $0xd8] sm:$0xff] }
 0xc69   : > { %3512 = vmatprep.subr.mxu0 %v6101_v33 }
 0xc6c   : > { %3513 = vmatpush3.msra.mxu0 %v2672_v15  ;;  %v3757_v15 = vpack.c.bf16 %v2942_v21, %v2941_v58 }
 0xc6d   : > { %3515 = vmatmul.mubr.msk.f32.vlgmr.msra.gmra.mrb[8].mxu0 %vm6125_vm3, %v2674_v17  ;;  %v3755_v17 = vpack.c.bf16 %v2924_v16, %v2923_v3  ;;  %v3026_v16 = vld [vmem:[%s5951_s17 + $0x38] sm:$0xff] }
 0xc74   : > { %v2679_v32 = vpop.permute.xlu1 %2678 }
 0xd40   : > { %v2750_v52 = vpop.f32.mrb[8].mxu0 }
 0xd41   : > { %v2751_v23 = vadd.f32 %v2750_v52, %v2679_v32  ;;  %v3516_v49 = vpop.f32.mrb[9].mxu0 }
 0xd42   : > { %v2926_v49 = vld [vmem:[%s5949_s15 + $0x58] sm:$0xff] }
 0xd43   : > { %v2754_v61 = vmax.f32 %v2751_v23, 0.0  ;;  %v2925_v23 = vld [vmem:[%s5949_s15 + $0x50] sm:$0xff] }
 0xd45   : > { %2756 = vrot.lane.b32.xlu0 %v2754_v61, %s4197_s22 }
 0xdb7   : > { %v2757_v13 = vpop.permute.xlu0 %2756 }
 0xdb8   : > { %v2759_v27 = vsel %vm2606_vm1, 0.0, %v2757_v13 }
 0xdb9   : > { %v2760_v2 = vsel %vm2608_vm11, %v2759_v27, 0.0 }
 0xdba   : > { %v2763_v40 = vmul.f32 %v2760_v2, %v2618_v12  ;;  %v2762_v31 = vmul.f32 %v2760_v2, %v5726_v0  ;;  %v2765_v22 = vmul.f32 %v2760_v2, %v2628_v28  ;;  %v2764_v48 = vmul.f32 %v2760_v2, %v5728_v26  ;;  %v2931_v0 = vld [vmem:[%s5949_s15 + $0x80] sm:$0xff]  ;;  %v2932_v26 = vld [vmem:[%s5949_s15 + $0x88] sm:$0xff] }
 0xdbb   : > { %v2767_v38 = vmul.f32 %v2760_v2, %v2638_v8  ;;  %v2766_v35 = vmul.f32 %v2760_v2, %v5734_v53  ;;  %v2768_v37 = vmul.f32 %v2760_v2, %v2643_v39  ;;  %v2761_v20 = vmul.f32 %v3203_v24, %v2760_v2  ;;  %v2917_v53 = vld [vmem:[%s5949_s15 + $0x10] sm:$0xff]  ;;  %v2935_v28 = vld [vmem:[%s5949_s15 + $0xa0] sm:$0xff] }
 0xdbc   : > { %2774 = vrot.lane.b32.xlu0 %v2763_v40, %s6087_s16  ;;  %2770 = vrot.lane.b32.xlu1 %v2762_v31, %s6082_s23  ;;  %v3737_v9 = vpack.c.bf16 %v2932_v26, %v2931_v0  ;;  %v3739_v12 = vpack.c.bf16 %v2916_v50, %v2915_v55  ;;  %v3743_v46 = vpack.c.bf16 %v2918_v57, %v2917_v53  ;;  %v2919_v8 = vld [vmem:[%s5949_s15 + $0x20] sm:$0xff]  ;;  %v2944_v40 = vld [vmem:[%s5949_s15 + $0xe8] sm:$0xff] }
 0xdbd   : > { %v3745_v39 = vpack.c.bf16 %v2936_v5, %v2935_v28  ;;  %v3747_v24 = vpack.c.bf16 %v2920_v34, %v2919_v8  ;;  %v3759_v2 = vpack.c.bf16 %v2926_v49, %v2925_v23  ;;  %v3020_v0 = vld [vmem:[%s5951_s17 + $0x8] sm:$0xff]  ;;  %v3021_v26 = vld [vmem:[%s5951_s17 + $0x10] sm:$0xff] }
 0xdbe   : > { %3738 = vmatprep.subr.bf16.mxu0 %v3737_v9  ;;  %v3022_v9 = vld [vmem:[%s5951_s17 + $0x18] sm:$0xff] }
 0xdbf   : > { %3740 = vmatpush3.bf16.msra.mxu0 %v3739_v12  ;;  %v3773_v50 = vpack.c.bf16 %v3022_v9, %v3021_v26 }
 0xdc0   : > { %2782 = vrot.lane.b32.xlu0 %v2765_v22, %s4200_s0  ;;  %2778 = vrot.lane.b32.xlu1 %v2764_v48, %s4199_s19 }
 0xdc4   : > { %2790 = vrot.lane.b32.xlu0 %v2767_v38, %s4201_s20  ;;  %2786 = vrot.lane.b32.xlu1 %v2766_v35, %s6113_s28  ;;  %v2927_v38 = vld [vmem:[%s5949_s15 + $0x60] sm:$0xff]  ;;  %v2928_v35 = vld [vmem:[%s5949_s15 + $0x68] sm:$0xff]  ;;  %s6132_s28 = sld [smem:[#allocation3_spill]]  ;;  %s6134_s20 = sld [smem:[#allocation21_spill]] }
 0xdc8   : > { %2794 = vrot.lane.b32.xlu1 %v2768_v37, %s4193_s18  ;;  %2801 = vperm.xlu0 %4147, %v2798_v51   ;;  %v2945_v51 = vld [vmem:[%s5949_s15 + $0xf0] sm:$0xff]  ;;  %v3763_v37 = vpack.c.bf16 %v2928_v35, %v2927_v38 }
 0xdca   : > { %v3027_v49 = vld [vmem:[%s6134_s20] sm:$0x1] }
 0xe2e   : > { %v2775_v11 = vpop.permute.xlu0 %2774  ;;  %v2771_v41 = vpop.permute.xlu1 %2770 }
 0xe2f   : > { %v3726_v1 = vpack.c.bf16 %v2771_v41, %v2761_v20  ;;  %v2946_v20 = vld [vmem:[%s5949_s15 + $0xf8] sm:$0xff] }
 0xe31   : > { %3727 = vmatpush3.bf16.msra.mxu1 %v3726_v1 }
 0xe32   : > { %v2783_v30 = vpop.permute.xlu0 %2782  ;;  %v2779_v47 = vpop.permute.xlu1 %2778  ;;  %3728 = vmatprep.subr.bf16.mxu1 %v4191_v59 }
 0xe33   : > { %v3729_v7 = vpack.c.bf16 %v2779_v47, %v2775_v11  ;;  %v3732_v4 = vpack.c.bf16 %v2783_v30, %v2754_v61  ;;  %v2943_v61 = vld [vmem:[%s5949_s15 + $0xe0] sm:$0xff]  ;;  %v2930_v11 = vld [vmem:[%s5949_s15 + $0x78] sm:$0xff] }
 0xe34   : > { %v3761_v31 = vpack.c.bf16 %v2944_v40, %v2943_v61 }
 0xe35   : > { %3730 = vmatpush3.bf16.msra.mxu1 %v3729_v7 }
 0xe36   : > { %3731 = vmatprep.subr.bf16.mxu1 %v4191_v59  ;;  %v2791_v14 = vpop.permute.xlu0 %2790  ;;  %v2787_v45 = vpop.permute.xlu1 %2786 }
 0xe37   : > { %v3735_v6 = vpack.c.bf16 %v2791_v14, %v2787_v45 }
 0xe39   : > { %3733 = vmatpush3.bf16.msra.mxu1 %v3732_v4  ;;  %v3765_v4 = vpack.c.bf16 %v2946_v20, %v2945_v51 }
 0xe3a   : > { %3734 = vmatprep.subr.bf16.mxu1 %v4191_v59  ;;  %v2795_v63 = vpop.permute.xlu1 %2794 }
 0xe3d   : > { %3736 = vmatpush3.bf16.msra.mxu1 %v3735_v6 }
 0xe3e   : > { %3533 = vmatprep.subr.mxu1 %v6101_v33 }
 0xe41   : > { %3534 = vmatpush3.msra.mxu1 %v2795_v63  ;;  %v3019_v63 = vld [vmem:[%s5951_s17] sm:$0xff] }
 0xe42   : > { %3536 = vmatmul.mubr.msk.f32.vlgmr.msra.gmra.mrb[8].mxu1 %vm6126_vm12, %v2797_v62  ;;  %3769 = vmatprep.subr.bf16.mxu1 %v4191_v59  ;;  %v3770_v55 = vpack.c.bf16 %v3020_v0, %v3019_v63 }
 0xe43   : > { %3554 = vmatprep.mubr.msk.f32.mxu1 %vm6122_vm9, %v6101_v33  ;;  %v2933_v33 = vld [vmem:[%s5949_s15 + $0x90] sm:$0xff] }
 0xe44   : > { %v3741_v54 = vpack.c.bf16 %v2934_v36, %v2933_v33  ;;  %3771 = vmatpush3.bf16.msra.mxu1 %v3770_v55 }
 0xe45   : > { %3772 = vmatprep.subr.bf16.mxu1 %v4191_v59 }
 0xe46   : > { %3742 = vmatprep.subr.bf16.mxu0 %v3741_v54 }
 0xe47   : > { %3744 = vmatpush3.bf16.msra.mxu0 %v3743_v46  ;;  %v2802_v32 = vpop.permute.xlu0 %2801 }
 0xe48   : > { %3746 = vmatprep.subr.bf16.mxu0 %v3745_v39  ;;  %3774 = vmatpush3.bf16.msra.mxu1 %v3773_v50 }
 0xe49   : > { %3775 = vmatprep.subr.bf16.mxu1 %v4191_v59 }
 0xe4b   : > { %3748 = vmatpush3.bf16.msra.mxu0 %v3747_v24 }
 0xe4c   : > { %3750 = vmatprep.subr.bf16.mxu0 %v3749_v19 }
 0xe4f   : > { %3752 = vmatpush3.bf16.msra.mxu0 %v3751_v29  ;;  %v3024_v29 = vld [vmem:[%s5951_s17 + $0x28] sm:$0xff] }
 0xe50   : > { %3754 = vmatprep.subr.bf16.mxu0 %v3753_v18  ;;  %v3025_v18 = vld [vmem:[%s5951_s17 + $0x30] sm:$0xff]  ;;  %v3776_v3 = vpack.c.bf16 %v3024_v29, %v3023_v25 }
 0xe51   : > { %v3779_v58 = vpack.c.bf16 %v3026_v16, %v3025_v18 }
 0xe52   : > { %3777 = vmatpush3.bf16.msra.mxu1 %v3776_v3 }
 0xe53   : > { %3756 = vmatpush3.bf16.msra.mxu0 %v3755_v17  ;;  %3778 = vmatprep.subr.bf16.mxu1 %v4191_v59  ;;  %v2947_v17 = vld [vmem:[%s6133_s29] sm:$0x1] }
 0xe54   : > { %3758 = vmatprep.subr.bf16.mxu0 %v3757_v15 }
 0xe56   : > { %3780 = vmatpush3.bf16.msra.mxu1 %v3779_v58 }
 0xe57   : > { %3760 = vmatpush3.bf16.msra.mxu0 %v3759_v2 }
 0xe58   : > { %3762 = vmatprep.subr.bf16.mxu0 %v3761_v31 }
 0xe5b   : > { %3764 = vmatpush3.bf16.msra.mxu0 %v3763_v37 }
 0xe5c   : > { %3766 = vmatprep.subr.bf16.mxu0 %v3765_v4 }
 0xf15   : > { %v2873_v52 = vpop.f32.mrb[8].mxu1 }
 0xf16   : > { %v2874_v13 = vadd.f32 %v2873_v52, %v2802_v32  ;;  %v3537_v27 = vpop.f32.mrb[9].mxu1 }
 0xf18   : > { %v2877_v22 = vmax.f32 %v2874_v13, 0.0 }
 0xf1a   : > { %v2878_v48 = vadd.f32 %v2877_v22, %v5713_v42  ;;  %v2929_v42 = vld [vmem:[%s5949_s15 + $0x70] sm:$0xff] }
 0xf1b   : > { %v3767_v62 = vpack.c.bf16 %v2930_v11, %v2929_v42 }
 0xf1c   : > { %v2888_v41 = vrot.slane %v2878_v48, 3  ;;  %v2902_v1 = vrot.slane %v2878_v48, 7  ;;  %v2880_v30 = vrot.slane %v2878_v48, 1  ;;  %v2894_v47 = vrot.slane %v2878_v48, 5 }
 0xf1d   : > { %v2884_v7 = vrot.slane %v2878_v48, 2  ;;  %v2898_v6 = vrot.slane %v2878_v48, 6  ;;  %3768 = vmatpush3.bf16.msra.mxu0 %v3767_v62  ;;  %v2892_v57 = vrot.slane %v2878_v48, 4 }
 0xf1e   : > { %v4158_v14 = vpack.i.bf16 %v2888_v41, %v2902_v1  ;;  %v4148_v45 = vpack.i.bf16 %v2880_v30, %v2894_v47 }
 0xf1f   : > { %v4153_v33 = vpack.i.bf16 %v2884_v7, %v2898_v6 }
 0xf20   : > { %4159 = vrot.lane.b32.xlu0 %v4158_v14, %s6086_s21  ;;  %4149 = vrot.lane.b32.xlu1 %v4148_v45, %s6127_s3  ;;  %s6135_s21 = sld [smem:[#allocation22_spill]] }
 0xf24   : > { %4154 = vrot.lane.b32.xlu1 %v4153_v33, %s4202_s1 }
 0xf26   : > { %s598_s30 = scalar_lea.vmem %s6135_s21, %s6132_s28 }
 0xf92   : > { %v4150_v36 = vpop.permute.xlu1 %4149  ;;  %v4160_v53 = vpop.permute.xlu0 %4159 }
 0xf93   : > { %v4152_v12 = vunpack.i.h.bf16 %v4150_v36  ;;  %v4151_v54 = vunpack.i.l.bf16 %v4150_v36  ;;  %v4162_v39 = vunpack.i.h.bf16 %v4160_v53  ;;  %v4161_v8 = vunpack.i.l.bf16 %v4160_v53 }
 0xf95   : > { %v2906_v34 = vsel %vm6128_vm8, %v2878_v48, %v4152_v12  ;;  %v2910_v56 = vsel %vm6129_vm13, %v2892_v57, %v4151_v54 }
 0xf96   : > { %v4155_v28 = vpop.permute.xlu1 %4154 }
 0xf97   : > { %v4157_v5 = vunpack.i.h.bf16 %v4155_v28  ;;  %v4156_v46 = vunpack.i.l.bf16 %v4155_v28 }
 0xf99   : > { %v2908_v10 = vsel %vm2907_vm10, %v2906_v34, %v4157_v5  ;;  %v2911_v24 = vsel %vm2907_vm10, %v2910_v56, %v4156_v46 }
 0xf9a   : > { %v2909_v19 = vsel %vm6130_vm5, %v2908_v10, %v4162_v39  ;;  %v2912_v44 = vsel %vm6131_vm0, %v2911_v24, %v4161_v8 }
 0xf9b   : > { %v2914_v60 = vmax.f32 %v2912_v44, 0.0  ;;  %v2913_v43 = vmax.f32 %v2909_v19, 0.0 }
 0xf9d   : > { %3012 = vmatprep.mubr.f32.mxu0 %v2914_v60 }
 0xf9e   : > { %3013 = vmatmul.mubr.f32.vlgmr.msra.gmra.mrb[10].mxu0 %v2913_v43 }
0x1071   : > { %v3386_v21 = vpop.f32.mrb[10].mxu0 }
0x1072   : > { %v3387_v15 = vpop.f32.mrb[11].mxu0 }
0x1073   : > { %v3388_v32 = vadd.f32 %v3387_v15, %v3386_v21 }
0x1075   : > { %v3015_v52 = vadd.f32 %v3388_v32, %v2947_v17 }
0x1077   : > { %v3018_v23 = vmax.f32 %v3015_v52, 0.0 }
0x1079   : > { %3555 = vmatmul.mubr.msk.f32.vlgmr.msra.gmra.mrb[10].mxu1 %vm2907_vm10, %v3018_v23 }
0x114c   : > { %v3097_v61 = vpop.f32.mrb[10].mxu1 }
0x114d   : > { %v3098_v13 = vadd.f32 %v3097_v61, %v3027_v49  ;;  %v3556_v27 = vpop.f32.mrb[11].mxu1 }
0x114f   : > { %v3101_v59 = vmax.f32 %v3098_v13, 0.0 }
0x1151   : > { %3103 = vst.msk [vmem:[%s598_s30] sm:$0x1] %vm3102_vm14, %v3101_v59 }
0x1152 PF: > { %s6136_s24 = sld [smem:[#allocation2_spill]] }
0x1158   : > { %s29_s0 = sadd.s32 1, %s6136_s24  }
0x1159   : > { %p26_p4 = scmp.ge.s32.totalorder %s29_s0, 4  }
0x115b   :  { %28 = sbr.rel (!%p26_p4) target bundleno = 8 (0x8), region = 126 }

</bundles_post_ra>
